<compile_context>
chip_gen: v5e
topology: v5e:2x2
jax: 0.10.0
libtpu: 0.0.40
codegen_flags: <defaults>
</compile_context>

<pallas_src>
import functools

import jax
import jax.numpy as jnp
from jax.experimental import pallas as pl
from jax.experimental.pallas import tpu as pltpu


# ----------------------------------------------------------------------------
# Pallas kernel: fused multi-source, multi-tap GEMM-conv (+bias, +ReLU)
# ----------------------------------------------------------------------------
def _gemm_conv_kernel(n_src, offsets, relu, *refs):
    """out[Cout, M] = sum_s sum_t W_s[t] @ X_s[:, off_t : off_t + M] + b.

    refs = (x_0..x_{n_src-1}, w_0..w_{n_src-1}, b, out)
      x_s : (1, Cin_s, L_s)   flattened (padded) image, bf16
      w_s : (T, Cout, Cin_s)  per-tap weights, bf16
      b   : (Cout, 1)         f32
      out : (1, Cout, M)      lane-dense (spatial on the 128-lane axis)
    """
    x_refs = refs[:n_src]
    w_refs = refs[n_src:2 * n_src]
    b_ref = refs[2 * n_src]
    o_ref = refs[2 * n_src + 1]
    m = o_ref.shape[2]

    acc = None
    for s in range(n_src):
        cin = x_refs[s].shape[1]
        for t, off in enumerate(offsets):
            w_t = w_refs[s][t]                      # (Cout, Cin_s)
            x_t = x_refs[s][0, :, off:off + m]      # static shifted load (Cin_s, M)
            if cin == 1:
                # Degenerate K=1 contraction: keep it on the VPU (f32).
                part = w_t.astype(jnp.float32) * x_t.astype(jnp.float32)
            else:
                part = jnp.dot(w_t, x_t, preferred_element_type=jnp.float32)
            acc = part if acc is None else acc + part

    y = acc + b_ref[...]                            # (Cout, 1) broadcast over lanes
    if relu:
        y = jnp.maximum(y, 0.0)
    o_ref[0] = y.astype(o_ref.dtype)


def _gemm_conv(xs, ws, b, offsets, m_out, *, relu, out_dtype):
    """Dispatch the fused conv GEMM.

    xs : list of (N, Cin_s, L_s) bf16 flattened inputs
    ws : list of (T, Cout, Cin_s) bf16 tap weights
    b  : (Cout,) or (Cout*,) f32 bias
    returns (N, Cout, m_out) in out_dtype.
    """
    n_src = len(xs)
    n = xs[0].shape[0]
    cout = ws[0].shape[1]
    b2 = b.reshape(cout, 1).astype(jnp.float32)

    in_specs = []
    for x in xs:
        in_specs.append(pl.BlockSpec((1, x.shape[1], x.shape[2]),
                                     lambda i: (i, 0, 0)))
    for w in ws:
        in_specs.append(pl.BlockSpec(w.shape, lambda i: (0, 0, 0)))
    in_specs.append(pl.BlockSpec((cout, 1), lambda i: (0, 0)))

    flops = 2 * n * len(offsets) * m_out * cout * sum(int(x.shape[1]) for x in xs)
    bytes_accessed = int(
        sum(x.size * x.dtype.itemsize for x in xs)
        + sum(w.size * w.dtype.itemsize for w in ws)
        + b2.size * 4
        + n * cout * m_out * jnp.dtype(out_dtype).itemsize)

    return pl.pallas_call(
        functools.partial(_gemm_conv_kernel, n_src, tuple(offsets), relu),
        out_shape=jax.ShapeDtypeStruct((n, cout, m_out), out_dtype),
        grid=(n,),
        in_specs=in_specs,
        out_specs=pl.BlockSpec((1, cout, m_out), lambda i: (i, 0, 0)),
        compiler_params=pltpu.CompilerParams(
            dimension_semantics=("parallel",),        # batch steps independent
            vmem_limit_bytes=64 * 1024 * 1024),       # fits v7x's 64 MiB VMEM
        cost_estimate=pl.CostEstimate(
            flops=int(flops), transcendentals=0, bytes_accessed=bytes_accessed),
    )(*xs, *ws, b2)


# ----------------------------------------------------------------------------
# Conv layers built on the fused kernel
# ----------------------------------------------------------------------------
def conv3x3(xs, ws, b, *, padding, relu, out_dtype=jnp.bfloat16):
    """3x3 conv (+bias, +ReLU) over one or more channel-concatenated sources.

    xs : list of NCHW tensors with identical spatial dims (PyTorch's channel
         concat is expressed as split-K accumulation; the concatenated tensor
         is never materialized in HBM).
    ws : list of (9, Cout, Cin_s) tap weights (tap index = 3*dy + dx).
    """
    n = xs[0].shape[0]
    flats = []
    for x in xs:
        xp = jnp.pad(x, ((0, 0), (0, 0), (1, 1), (1, 1))) if padding else x
        hp, wp = xp.shape[2], xp.shape[3]
        xf = xp.reshape(n, xp.shape[1], hp * wp)
        # +2 tail so the bottom-right taps of the (cropped-away) garbage
        # columns never read out of bounds.
        xf = jnp.pad(xf, ((0, 0), (0, 0), (0, 2)))
        flats.append(xf.astype(jnp.bfloat16))
    ho, wo = hp - 2, wp - 2
    offsets = tuple(dy * wp + dx for dy in range(3) for dx in range(3))
    ws16 = [w.astype(jnp.bfloat16) for w in ws]

    wide = _gemm_conv(flats, ws16, b, offsets, ho * wp,
                      relu=relu, out_dtype=out_dtype)     # (N, Cout, Ho*Wp)
    # Drop the 2 wrap-around garbage columns per row (XLA glue; fuses with the
    # consumer's pad/pool).
    return wide.reshape(n, -1, ho, wp)[:, :, :, :wo]


def upconv2x2(x, w, b, out_dtype=jnp.bfloat16):
    """ConvTranspose2d(k=2, stride=2): one lane-dense GEMM over the 4 phases.

    w : (4, Cout, Cin), phase index = 2*dy + dx.
    """
    n, cin, h, w_sp = x.shape
    cout = w.shape[1]
    xf = x.reshape(n, cin, h * w_sp).astype(jnp.bfloat16)
    w_all = w.reshape(1, 4 * cout, cin).astype(jnp.bfloat16)   # single tap
    b_all = jnp.tile(b, 4)                                     # phase-major
    y = _gemm_conv([xf], [w_all], b_all, (0,), h * w_sp,
                   relu=False, out_dtype=out_dtype)            # (N, 4*Cout, H*W)
    # Interleave the 4 (dy,dx) phases into (N, Cout, 2H, 2W).
    # TODO(synk): fuse this scatter into the kernel store (2-axis strided
    #             stores) to save one XLA transpose pass of the up tensor.
    y = y.reshape(n, 2, 2, cout, h, w_sp)
    y = y.transpose(0, 3, 4, 1, 5, 2).reshape(n, cout, 2 * h, 2 * w_sp)
    return y


def conv1x1(x, w, b, out_dtype=jnp.float32):
    """1x1 conv; w: (Cout, Cin)."""
    n, cin, h, w_sp = x.shape
    cout = w.shape[0]
    xf = x.reshape(n, cin, h * w_sp).astype(jnp.bfloat16)
    y = _gemm_conv([xf], [w.reshape(1, cout, cin).astype(jnp.bfloat16)], b,
                   (0,), h * w_sp, relu=False, out_dtype=out_dtype)
    return y.reshape(n, cout, h, w_sp)


def max_pool2x2(x):
    """F.max_pool2d(x, 2) on NCHW (floor behavior for odd dims).

    Kept in XLA on purpose: the pre-pool activation must be materialized in
    HBM anyway (it is the skip connection), and this lowers to a single full
    read + quarter-size write — strictly less traffic than the previous
    host transpose-copy + extra pallas_call.
    TODO(synk): fold the 2x2 max into the conv kernel's store epilogue once
                lane-strided stores are practical; saves one full read/block.
    """
    n, c, h, w = x.shape
    h2, w2 = h // 2, w // 2
    x = x[:, :, :h2 * 2, :w2 * 2]
    return x.reshape(n, c, h2, 2, w2, 2).max(axis=(3, 5))


# ----------------------------------------------------------------------------
# UNet parameters + forward
# ----------------------------------------------------------------------------
def init_unet_params(key, in_channels=1, n_classes=2, depth=3, wf=2):
    """Weights are stored directly in the kernel layout:
         3x3 conv : (9, Cout, Cin)   tap   = 3*dy + dx   (PyTorch: (Cout,Cin,3,3))
         up conv  : (4, Cout, Cin)   phase = 2*dy + dx   (PyTorch: (Cin,Cout,2,2))
         1x1 conv : (Cout, Cin)
       NOTE: loading real PyTorch weights would require those transposes.
    """
    def nk():
        nonlocal key
        key, sub = jax.random.split(key)
        return sub

    def uinit(k, shape, fan_in):
        bound = 1.0 / float(fan_in) ** 0.5
        return jax.random.uniform(k, shape, jnp.float32, -bound, bound)

    def conv(taps, cin, cout):
        kw, kb = jax.random.split(nk())
        fan = taps * cin
        return uinit(kw, (taps, cout, cin), fan), uinit(kb, (cout,), fan)

    params = {"down": [], "up": []}
    prev = in_channels
    for i in range(depth):
        out = 2 ** (wf + i)
        w1, b1 = conv(9, prev, out)
        w2, b2 = conv(9, out, out)
        params["down"].append({"w1": w1, "b1": b1, "w2": w2, "b2": b2})
        prev = out
    for i in reversed(range(depth - 1)):
        out = 2 ** (wf + i)
        wu, bu = conv(4, prev, out)          # transposed-conv phases
        w1, b1 = conv(9, prev, out)          # conv block sees cat() = prev ch
        w2, b2 = conv(9, out, out)
        params["up"].append({"wu": wu, "bu": bu,
                             "w1": w1, "b1": b1, "w2": w2, "b2": b2})
        prev = out
    kw, kb = jax.random.split(nk())
    params["last_w"] = uinit(kw, (n_classes, prev), prev)
    params["last_b"] = uinit(kb, (n_classes,), prev)
    return params


def unet_forward(params, x_nchw, *, padding):
    x = x_nchw                       # channels-first throughout (PyTorch NCHW)
    blocks = []
    ndown = len(params["down"])
    # down path
    for i, blk in enumerate(params["down"]):
        x = conv3x3([x], [blk["w1"]], blk["b1"], padding=padding, relu=True)
        x = conv3x3([x], [blk["w2"]], blk["b2"], padding=padding, relu=True)
        if i != ndown - 1:
            blocks.append(x)
            x = max_pool2x2(x)
    # up path
    for i, blk in enumerate(params["up"]):
        up = upconv2x2(x, blk["wu"], blk["bu"])
        bridge = blocks[-i - 1]
        th, tw = up.shape[2], up.shape[3]
        dy = (bridge.shape[2] - th) // 2
        dx = (bridge.shape[3] - tw) // 2
        crop = bridge[:, :, dy:dy + th, dx:dx + tw]            # center_crop
        c1 = up.shape[1]
        # conv(cat([up, crop], 1)) computed as split-K over the two sources.
        x = conv3x3([up, crop],
                    [blk["w1"][:, :, :c1], blk["w1"][:, :, c1:]],
                    blk["b1"], padding=padding, relu=True)
        x = conv3x3([x], [blk["w2"]], blk["b2"], padding=padding, relu=True)
    return conv1x1(x, params["last_w"], params["last_b"])       # f32 logits


if __name__ == "__main__":
    key = jax.random.PRNGKey(0)
    pkey, xkey = jax.random.split(key)
    params = init_unet_params(pkey, in_channels=1, n_classes=2, depth=3, wf=2)
    x = jax.random.normal(xkey, (2, 1, 16, 16), jnp.float32)  # NCHW input

    fwd = jax.jit(functools.partial(unet_forward, padding=True))
    y = fwd(params, x)
    jax.block_until_ready(y)
    assert y.shape == (2, 2, 16, 16), y.shape
    assert bool(jnp.all(jnp.isfinite(y)))
    print("KERNEL_OK")
</pallas_src>

<mosaic_0001>
module attributes {stable_mosaic.version = 11 : i64} {
  func.func @_gemm_conv_kernel(%arg0: i32, %arg1: memref<1x1x326xbf16, #tpu.memory_space<vmem>>, %arg2: memref<9x4x1xbf16, #tpu.memory_space<vmem>>, %arg3: memref<4x1xf32, #tpu.memory_space<vmem>>, %arg4: memref<1x4x288xbf16, #tpu.memory_space<vmem>>) attributes {dimension_semantics = [#tpu.dimension_semantics<parallel>], iteration_bounds = array<i64: 2>, scalar_prefetch = 0 : i64, scratch_operands = 0 : i64, tpu.core_type = #tpu.core_type<tc>, window_params = [{transform_indices = @transform_0, window_bounds = array<i64: 1, 1, 326>}, {pipeline_mode = #tpu.pipeline_mode<synchronous>, transform_indices = @transform_1, window_bounds = array<i64: 9, 4, 1>}, {pipeline_mode = #tpu.pipeline_mode<synchronous>, transform_indices = @transform_2, window_bounds = array<i64: 4, 1>}, {transform_indices = @transform_3, window_bounds = array<i64: 1, 4, 288>}]} {
    %c0 = arith.constant 0 : index
    %c0_0 = arith.constant 0 : index
    %c0_1 = arith.constant 0 : index
    %0 = vector.load %arg2[%c0, %c0_0, %c0_1] : memref<9x4x1xbf16, #tpu.memory_space<vmem>>, vector<1x4x1xbf16>
    %1 = vector.shape_cast %0 : vector<1x4x1xbf16> to vector<4x1xbf16>
    %c0_2 = arith.constant 0 : index
    %c0_3 = arith.constant 0 : index
    %c0_4 = arith.constant 0 : index
    %2 = vector.load %arg1[%c0_2, %c0_3, %c0_4] : memref<1x1x326xbf16, #tpu.memory_space<vmem>>, vector<1x1x288xbf16>
    %3 = vector.shape_cast %2 : vector<1x1x288xbf16> to vector<1x288xbf16>
    %4 = arith.extf %1 : vector<4x1xbf16> to vector<4x1xf32>
    %5 = arith.extf %3 : vector<1x288xbf16> to vector<1x288xf32>
    %6 = vector.broadcast %4 : vector<4x1xf32> to vector<4x288xf32>
    %7 = vector.broadcast %5 : vector<1x288xf32> to vector<4x288xf32>
    %8 = arith.mulf %6, %7 : vector<4x288xf32>
    %c1 = arith.constant 1 : index
    %c0_5 = arith.constant 0 : index
    %c0_6 = arith.constant 0 : index
    %9 = vector.load %arg2[%c1, %c0_5, %c0_6] : memref<9x4x1xbf16, #tpu.memory_space<vmem>>, vector<1x4x1xbf16>
    %10 = vector.shape_cast %9 : vector<1x4x1xbf16> to vector<4x1xbf16>
    %c0_7 = arith.constant 0 : index
    %c0_8 = arith.constant 0 : index
    %c1_9 = arith.constant 1 : index
    %11 = vector.load %arg1[%c0_7, %c0_8, %c1_9] : memref<1x1x326xbf16, #tpu.memory_space<vmem>>, vector<1x1x288xbf16>
    %12 = vector.shape_cast %11 : vector<1x1x288xbf16> to vector<1x288xbf16>
    %13 = arith.extf %10 : vector<4x1xbf16> to vector<4x1xf32>
    %14 = arith.extf %12 : vector<1x288xbf16> to vector<1x288xf32>
    %15 = vector.broadcast %13 : vector<4x1xf32> to vector<4x288xf32>
    %16 = vector.broadcast %14 : vector<1x288xf32> to vector<4x288xf32>
    %17 = arith.mulf %15, %16 : vector<4x288xf32>
    %18 = arith.addf %8, %17 : vector<4x288xf32>
    %c2 = arith.constant 2 : index
    %c0_10 = arith.constant 0 : index
    %c0_11 = arith.constant 0 : index
    %19 = vector.load %arg2[%c2, %c0_10, %c0_11] : memref<9x4x1xbf16, #tpu.memory_space<vmem>>, vector<1x4x1xbf16>
    %20 = vector.shape_cast %19 : vector<1x4x1xbf16> to vector<4x1xbf16>
    %c0_12 = arith.constant 0 : index
    %c0_13 = arith.constant 0 : index
    %c2_14 = arith.constant 2 : index
    %21 = vector.load %arg1[%c0_12, %c0_13, %c2_14] : memref<1x1x326xbf16, #tpu.memory_space<vmem>>, vector<1x1x288xbf16>
    %22 = vector.shape_cast %21 : vector<1x1x288xbf16> to vector<1x288xbf16>
    %23 = arith.extf %20 : vector<4x1xbf16> to vector<4x1xf32>
    %24 = arith.extf %22 : vector<1x288xbf16> to vector<1x288xf32>
    %25 = vector.broadcast %23 : vector<4x1xf32> to vector<4x288xf32>
    %26 = vector.broadcast %24 : vector<1x288xf32> to vector<4x288xf32>
    %27 = arith.mulf %25, %26 : vector<4x288xf32>
    %28 = arith.addf %18, %27 : vector<4x288xf32>
    %c3 = arith.constant 3 : index
    %c0_15 = arith.constant 0 : index
    %c0_16 = arith.constant 0 : index
    %29 = vector.load %arg2[%c3, %c0_15, %c0_16] : memref<9x4x1xbf16, #tpu.memory_space<vmem>>, vector<1x4x1xbf16>
    %30 = vector.shape_cast %29 : vector<1x4x1xbf16> to vector<4x1xbf16>
    %c0_17 = arith.constant 0 : index
    %c0_18 = arith.constant 0 : index
    %c18 = arith.constant 18 : index
    %31 = vector.load %arg1[%c0_17, %c0_18, %c18] : memref<1x1x326xbf16, #tpu.memory_space<vmem>>, vector<1x1x288xbf16>
    %32 = vector.shape_cast %31 : vector<1x1x288xbf16> to vector<1x288xbf16>
    %33 = arith.extf %30 : vector<4x1xbf16> to vector<4x1xf32>
    %34 = arith.extf %32 : vector<1x288xbf16> to vector<1x288xf32>
    %35 = vector.broadcast %33 : vector<4x1xf32> to vector<4x288xf32>
    %36 = vector.broadcast %34 : vector<1x288xf32> to vector<4x288xf32>
    %37 = arith.mulf %35, %36 : vector<4x288xf32>
    %38 = arith.addf %28, %37 : vector<4x288xf32>
    %c4 = arith.constant 4 : index
    %c0_19 = arith.constant 0 : index
    %c0_20 = arith.constant 0 : index
    %39 = vector.load %arg2[%c4, %c0_19, %c0_20] : memref<9x4x1xbf16, #tpu.memory_space<vmem>>, vector<1x4x1xbf16>
    %40 = vector.shape_cast %39 : vector<1x4x1xbf16> to vector<4x1xbf16>
    %c0_21 = arith.constant 0 : index
    %c0_22 = arith.constant 0 : index
    %c19 = arith.constant 19 : index
    %41 = vector.load %arg1[%c0_21, %c0_22, %c19] : memref<1x1x326xbf16, #tpu.memory_space<vmem>>, vector<1x1x288xbf16>
    %42 = vector.shape_cast %41 : vector<1x1x288xbf16> to vector<1x288xbf16>
    %43 = arith.extf %40 : vector<4x1xbf16> to vector<4x1xf32>
    %44 = arith.extf %42 : vector<1x288xbf16> to vector<1x288xf32>
    %45 = vector.broadcast %43 : vector<4x1xf32> to vector<4x288xf32>
    %46 = vector.broadcast %44 : vector<1x288xf32> to vector<4x288xf32>
    %47 = arith.mulf %45, %46 : vector<4x288xf32>
    %48 = arith.addf %38, %47 : vector<4x288xf32>
    %c5 = arith.constant 5 : index
    %c0_23 = arith.constant 0 : index
    %c0_24 = arith.constant 0 : index
    %49 = vector.load %arg2[%c5, %c0_23, %c0_24] : memref<9x4x1xbf16, #tpu.memory_space<vmem>>, vector<1x4x1xbf16>
    %50 = vector.shape_cast %49 : vector<1x4x1xbf16> to vector<4x1xbf16>
    %c0_25 = arith.constant 0 : index
    %c0_26 = arith.constant 0 : index
    %c20 = arith.constant 20 : index
    %51 = vector.load %arg1[%c0_25, %c0_26, %c20] : memref<1x1x326xbf16, #tpu.memory_space<vmem>>, vector<1x1x288xbf16>
    %52 = vector.shape_cast %51 : vector<1x1x288xbf16> to vector<1x288xbf16>
    %53 = arith.extf %50 : vector<4x1xbf16> to vector<4x1xf32>
    %54 = arith.extf %52 : vector<1x288xbf16> to vector<1x288xf32>
    %55 = vector.broadcast %53 : vector<4x1xf32> to vector<4x288xf32>
    %56 = vector.broadcast %54 : vector<1x288xf32> to vector<4x288xf32>
    %57 = arith.mulf %55, %56 : vector<4x288xf32>
    %58 = arith.addf %48, %57 : vector<4x288xf32>
    %c6 = arith.constant 6 : index
    %c0_27 = arith.constant 0 : index
    %c0_28 = arith.constant 0 : index
    %59 = vector.load %arg2[%c6, %c0_27, %c0_28] : memref<9x4x1xbf16, #tpu.memory_space<vmem>>, vector<1x4x1xbf16>
    %60 = vector.shape_cast %59 : vector<1x4x1xbf16> to vector<4x1xbf16>
    %c0_29 = arith.constant 0 : index
    %c0_30 = arith.constant 0 : index
    %c36 = arith.constant 36 : index
    %61 = vector.load %arg1[%c0_29, %c0_30, %c36] : memref<1x1x326xbf16, #tpu.memory_space<vmem>>, vector<1x1x288xbf16>
    %62 = vector.shape_cast %61 : vector<1x1x288xbf16> to vector<1x288xbf16>
    %63 = arith.extf %60 : vector<4x1xbf16> to vector<4x1xf32>
    %64 = arith.extf %62 : vector<1x288xbf16> to vector<1x288xf32>
    %65 = vector.broadcast %63 : vector<4x1xf32> to vector<4x288xf32>
    %66 = vector.broadcast %64 : vector<1x288xf32> to vector<4x288xf32>
    %67 = arith.mulf %65, %66 : vector<4x288xf32>
    %68 = arith.addf %58, %67 : vector<4x288xf32>
    %c7 = arith.constant 7 : index
    %c0_31 = arith.constant 0 : index
    %c0_32 = arith.constant 0 : index
    %69 = vector.load %arg2[%c7, %c0_31, %c0_32] : memref<9x4x1xbf16, #tpu.memory_space<vmem>>, vector<1x4x1xbf16>
    %70 = vector.shape_cast %69 : vector<1x4x1xbf16> to vector<4x1xbf16>
    %c0_33 = arith.constant 0 : index
    %c0_34 = arith.constant 0 : index
    %c37 = arith.constant 37 : index
    %71 = vector.load %arg1[%c0_33, %c0_34, %c37] : memref<1x1x326xbf16, #tpu.memory_space<vmem>>, vector<1x1x288xbf16>
    %72 = vector.shape_cast %71 : vector<1x1x288xbf16> to vector<1x288xbf16>
    %73 = arith.extf %70 : vector<4x1xbf16> to vector<4x1xf32>
    %74 = arith.extf %72 : vector<1x288xbf16> to vector<1x288xf32>
    %75 = vector.broadcast %73 : vector<4x1xf32> to vector<4x288xf32>
    %76 = vector.broadcast %74 : vector<1x288xf32> to vector<4x288xf32>
    %77 = arith.mulf %75, %76 : vector<4x288xf32>
    %78 = arith.addf %68, %77 : vector<4x288xf32>
    %c8 = arith.constant 8 : index
    %c0_35 = arith.constant 0 : index
    %c0_36 = arith.constant 0 : index
    %79 = vector.load %arg2[%c8, %c0_35, %c0_36] : memref<9x4x1xbf16, #tpu.memory_space<vmem>>, vector<1x4x1xbf16>
    %80 = vector.shape_cast %79 : vector<1x4x1xbf16> to vector<4x1xbf16>
    %c0_37 = arith.constant 0 : index
    %c0_38 = arith.constant 0 : index
    %c38 = arith.constant 38 : index
    %81 = vector.load %arg1[%c0_37, %c0_38, %c38] : memref<1x1x326xbf16, #tpu.memory_space<vmem>>, vector<1x1x288xbf16>
    %82 = vector.shape_cast %81 : vector<1x1x288xbf16> to vector<1x288xbf16>
    %83 = arith.extf %80 : vector<4x1xbf16> to vector<4x1xf32>
    %84 = arith.extf %82 : vector<1x288xbf16> to vector<1x288xf32>
    %85 = vector.broadcast %83 : vector<4x1xf32> to vector<4x288xf32>
    %86 = vector.broadcast %84 : vector<1x288xf32> to vector<4x288xf32>
    %87 = arith.mulf %85, %86 : vector<4x288xf32>
    %88 = arith.addf %78, %87 : vector<4x288xf32>
    %c0_39 = arith.constant 0 : index
    %c0_40 = arith.constant 0 : index
    %89 = vector.load %arg3[%c0_39, %c0_40] : memref<4x1xf32, #tpu.memory_space<vmem>>, vector<4x1xf32>
    %90 = vector.broadcast %89 : vector<4x1xf32> to vector<4x288xf32>
    %91 = arith.addf %88, %90 : vector<4x288xf32>
    %cst = arith.constant 0.000000e+00 : f32
    %92 = vector.broadcast %cst : f32 to vector<4x288xf32>
    %93 = arith.maximumf %91, %92 : vector<4x288xf32>
    %94 = arith.truncf %93 : vector<4x288xf32> to vector<4x288xbf16>
    %c0_41 = arith.constant 0 : index
    %c0_42 = arith.constant 0 : index
    %c0_43 = arith.constant 0 : index
    %95 = vector.load %arg4[%c0_41, %c0_42, %c0_43] : memref<1x4x288xbf16, #tpu.memory_space<vmem>>, vector<1x4x288xbf16>
    %96 = vector.shape_cast %95 : vector<1x4x288xbf16> to vector<4x288xbf16>
    %97 = vector.shape_cast %94 : vector<4x288xbf16> to vector<1x4x288xbf16>
    tpu.vector_store %arg4[%c0_41, %c0_42, %c0_43], %97 {strides = array<i32>} : memref<1x4x288xbf16, #tpu.memory_space<vmem>>, vector<1x4x288xbf16>,
    return
  }
  func.func @transform_0(%arg0: i32) -> (i32, i32, i32) {
    %c0_i32 = arith.constant 0 : i32
    %c0_i32_0 = arith.constant 0 : i32
    %c0_i32_1 = arith.constant 0 : i32
    return %arg0, %c0_i32, %c0_i32_0 : i32, i32, i32
  }
  func.func @transform_1(%arg0: i32) -> (i32, i32, i32) {
    %c0_i32 = arith.constant 0 : i32
    %c0_i32_0 = arith.constant 0 : i32
    %c0_i32_1 = arith.constant 0 : i32
    %c0_i32_2 = arith.constant 0 : i32
    return %c0_i32, %c0_i32_0, %c0_i32_1 : i32, i32, i32
  }
  func.func @transform_2(%arg0: i32) -> (i32, i32) {
    %c0_i32 = arith.constant 0 : i32
    %c0_i32_0 = arith.constant 0 : i32
    %c0_i32_1 = arith.constant 0 : i32
    return %c0_i32, %c0_i32_0 : i32, i32
  }
  func.func @transform_3(%arg0: i32) -> (i32, i32, i32) {
    %c0_i32 = arith.constant 0 : i32
    %c0_i32_0 = arith.constant 0 : i32
    %c0_i32_1 = arith.constant 0 : i32
    return %arg0, %c0_i32, %c0_i32_0 : i32, i32, i32
  }
}

module attributes {stable_mosaic.version = 11 : i64} {
  func.func @_gemm_conv_kernel(%arg0: i32, %arg1: memref<1x4x326xbf16, #tpu.memory_space<vmem>>, %arg2: memref<9x4x4xbf16, #tpu.memory_space<vmem>>, %arg3: memref<4x1xf32, #tpu.memory_space<vmem>>, %arg4: memref<1x4x288xbf16, #tpu.memory_space<vmem>>) attributes {dimension_semantics = [#tpu.dimension_semantics<parallel>], iteration_bounds = array<i64: 2>, scalar_prefetch = 0 : i64, scratch_operands = 0 : i64, tpu.core_type = #tpu.core_type<tc>, window_params = [{transform_indices = @transform_0, window_bounds = array<i64: 1, 4, 326>}, {pipeline_mode = #tpu.pipeline_mode<synchronous>, transform_indices = @transform_1, window_bounds = array<i64: 9, 4, 4>}, {pipeline_mode = #tpu.pipeline_mode<synchronous>, transform_indices = @transform_2, window_bounds = array<i64: 4, 1>}, {transform_indices = @transform_3, window_bounds = array<i64: 1, 4, 288>}]} {
    %c0 = arith.constant 0 : index
    %c0_0 = arith.constant 0 : index
    %c0_1 = arith.constant 0 : index
    %0 = vector.load %arg2[%c0, %c0_0, %c0_1] : memref<9x4x4xbf16, #tpu.memory_space<vmem>>, vector<1x4x4xbf16>
    %1 = vector.shape_cast %0 : vector<1x4x4xbf16> to vector<4x4xbf16>
    %c0_2 = arith.constant 0 : index
    %c0_3 = arith.constant 0 : index
    %c0_4 = arith.constant 0 : index
    %2 = vector.load %arg1[%c0_2, %c0_3, %c0_4] : memref<1x4x326xbf16, #tpu.memory_space<vmem>>, vector<1x4x288xbf16>
    %3 = vector.shape_cast %2 : vector<1x4x288xbf16> to vector<4x288xbf16>
    %cst = arith.constant dense<0.000000e+00> : vector<4x288xf32>
    %4 = tpu.matmul %1, %3, %cst {dimension_numbers = #tpu.dot_dimension_numbers<[1], [0], [0], [1], [0, 0, 1, 1], [], []>} : vector<4x4xbf16>, vector<4x288xbf16>, vector<4x288xf32> -> vector<4x288xf32>
    %c1 = arith.constant 1 : index
    %c0_5 = arith.constant 0 : index
    %c0_6 = arith.constant 0 : index
    %5 = vector.load %arg2[%c1, %c0_5, %c0_6] : memref<9x4x4xbf16, #tpu.memory_space<vmem>>, vector<1x4x4xbf16>
    %6 = vector.shape_cast %5 : vector<1x4x4xbf16> to vector<4x4xbf16>
    %c0_7 = arith.constant 0 : index
    %c0_8 = arith.constant 0 : index
    %c1_9 = arith.constant 1 : index
    %7 = vector.load %arg1[%c0_7, %c0_8, %c1_9] : memref<1x4x326xbf16, #tpu.memory_space<vmem>>, vector<1x4x288xbf16>
    %8 = vector.shape_cast %7 : vector<1x4x288xbf16> to vector<4x288xbf16>
    %cst_10 = arith.constant dense<0.000000e+00> : vector<4x288xf32>
    %9 = tpu.matmul %6, %8, %cst_10 {dimension_numbers = #tpu.dot_dimension_numbers<[1], [0], [0], [1], [0, 0, 1, 1], [], []>} : vector<4x4xbf16>, vector<4x288xbf16>, vector<4x288xf32> -> vector<4x288xf32>
    %10 = arith.addf %4, %9 : vector<4x288xf32>
    %c2 = arith.constant 2 : index
    %c0_11 = arith.constant 0 : index
    %c0_12 = arith.constant 0 : index
    %11 = vector.load %arg2[%c2, %c0_11, %c0_12] : memref<9x4x4xbf16, #tpu.memory_space<vmem>>, vector<1x4x4xbf16>
    %12 = vector.shape_cast %11 : vector<1x4x4xbf16> to vector<4x4xbf16>
    %c0_13 = arith.constant 0 : index
    %c0_14 = arith.constant 0 : index
    %c2_15 = arith.constant 2 : index
    %13 = vector.load %arg1[%c0_13, %c0_14, %c2_15] : memref<1x4x326xbf16, #tpu.memory_space<vmem>>, vector<1x4x288xbf16>
    %14 = vector.shape_cast %13 : vector<1x4x288xbf16> to vector<4x288xbf16>
    %cst_16 = arith.constant dense<0.000000e+00> : vector<4x288xf32>
    %15 = tpu.matmul %12, %14, %cst_16 {dimension_numbers = #tpu.dot_dimension_numbers<[1], [0], [0], [1], [0, 0, 1, 1], [], []>} : vector<4x4xbf16>, vector<4x288xbf16>, vector<4x288xf32> -> vector<4x288xf32>
    %16 = arith.addf %10, %15 : vector<4x288xf32>
    %c3 = arith.constant 3 : index
    %c0_17 = arith.constant 0 : index
    %c0_18 = arith.constant 0 : index
    %17 = vector.load %arg2[%c3, %c0_17, %c0_18] : memref<9x4x4xbf16, #tpu.memory_space<vmem>>, vector<1x4x4xbf16>
    %18 = vector.shape_cast %17 : vector<1x4x4xbf16> to vector<4x4xbf16>
    %c0_19 = arith.constant 0 : index
    %c0_20 = arith.constant 0 : index
    %c18 = arith.constant 18 : index
    %19 = vector.load %arg1[%c0_19, %c0_20, %c18] : memref<1x4x326xbf16, #tpu.memory_space<vmem>>, vector<1x4x288xbf16>
    %20 = vector.shape_cast %19 : vector<1x4x288xbf16> to vector<4x288xbf16>
    %cst_21 = arith.constant dense<0.000000e+00> : vector<4x288xf32>
    %21 = tpu.matmul %18, %20, %cst_21 {dimension_numbers = #tpu.dot_dimension_numbers<[1], [0], [0], [1], [0, 0, 1, 1], [], []>} : vector<4x4xbf16>, vector<4x288xbf16>, vector<4x288xf32> -> vector<4x288xf32>
    %22 = arith.addf %16, %21 : vector<4x288xf32>
    %c4 = arith.constant 4 : index
    %c0_22 = arith.constant 0 : index
    %c0_23 = arith.constant 0 : index
    %23 = vector.load %arg2[%c4, %c0_22, %c0_23] : memref<9x4x4xbf16, #tpu.memory_space<vmem>>, vector<1x4x4xbf16>
    %24 = vector.shape_cast %23 : vector<1x4x4xbf16> to vector<4x4xbf16>
    %c0_24 = arith.constant 0 : index
    %c0_25 = arith.constant 0 : index
    %c19 = arith.constant 19 : index
    %25 = vector.load %arg1[%c0_24, %c0_25, %c19] : memref<1x4x326xbf16, #tpu.memory_space<vmem>>, vector<1x4x288xbf16>
    %26 = vector.shape_cast %25 : vector<1x4x288xbf16> to vector<4x288xbf16>
    %cst_26 = arith.constant dense<0.000000e+00> : vector<4x288xf32>
    %27 = tpu.matmul %24, %26, %cst_26 {dimension_numbers = #tpu.dot_dimension_numbers<[1], [0], [0], [1], [0, 0, 1, 1], [], []>} : vector<4x4xbf16>, vector<4x288xbf16>, vector<4x288xf32> -> vector<4x288xf32>
    %28 = arith.addf %22, %27 : vector<4x288xf32>
    %c5 = arith.constant 5 : index
    %c0_27 = arith.constant 0 : index
    %c0_28 = arith.constant 0 : index
    %29 = vector.load %arg2[%c5, %c0_27, %c0_28] : memref<9x4x4xbf16, #tpu.memory_space<vmem>>, vector<1x4x4xbf16>
    %30 = vector.shape_cast %29 : vector<1x4x4xbf16> to vector<4x4xbf16>
    %c0_29 = arith.constant 0 : index
    %c0_30 = arith.constant 0 : index
    %c20 = arith.constant 20 : index
    %31 = vector.load %arg1[%c0_29, %c0_30, %c20] : memref<1x4x326xbf16, #tpu.memory_space<vmem>>, vector<1x4x288xbf16>
    %32 = vector.shape_cast %31 : vector<1x4x288xbf16> to vector<4x288xbf16>
    %cst_31 = arith.constant dense<0.000000e+00> : vector<4x288xf32>
    %33 = tpu.matmul %30, %32, %cst_31 {dimension_numbers = #tpu.dot_dimension_numbers<[1], [0], [0], [1], [0, 0, 1, 1], [], []>} : vector<4x4xbf16>, vector<4x288xbf16>, vector<4x288xf32> -> vector<4x288xf32>
    %34 = arith.addf %28, %33 : vector<4x288xf32>
    %c6 = arith.constant 6 : index
    %c0_32 = arith.constant 0 : index
    %c0_33 = arith.constant 0 : index
    %35 = vector.load %arg2[%c6, %c0_32, %c0_33] : memref<9x4x4xbf16, #tpu.memory_space<vmem>>, vector<1x4x4xbf16>
    %36 = vector.shape_cast %35 : vector<1x4x4xbf16> to vector<4x4xbf16>
    %c0_34 = arith.constant 0 : index
    %c0_35 = arith.constant 0 : index
    %c36 = arith.constant 36 : index
    %37 = vector.load %arg1[%c0_34, %c0_35, %c36] : memref<1x4x326xbf16, #tpu.memory_space<vmem>>, vector<1x4x288xbf16>
    %38 = vector.shape_cast %37 : vector<1x4x288xbf16> to vector<4x288xbf16>
    %cst_36 = arith.constant dense<0.000000e+00> : vector<4x288xf32>
    %39 = tpu.matmul %36, %38, %cst_36 {dimension_numbers = #tpu.dot_dimension_numbers<[1], [0], [0], [1], [0, 0, 1, 1], [], []>} : vector<4x4xbf16>, vector<4x288xbf16>, vector<4x288xf32> -> vector<4x288xf32>
    %40 = arith.addf %34, %39 : vector<4x288xf32>
    %c7 = arith.constant 7 : index
    %c0_37 = arith.constant 0 : index
    %c0_38 = arith.constant 0 : index
    %41 = vector.load %arg2[%c7, %c0_37, %c0_38] : memref<9x4x4xbf16, #tpu.memory_space<vmem>>, vector<1x4x4xbf16>
    %42 = vector.shape_cast %41 : vector<1x4x4xbf16> to vector<4x4xbf16>
    %c0_39 = arith.constant 0 : index
    %c0_40 = arith.constant 0 : index
    %c37 = arith.constant 37 : index
    %43 = vector.load %arg1[%c0_39, %c0_40, %c37] : memref<1x4x326xbf16, #tpu.memory_space<vmem>>, vector<1x4x288xbf16>
    %44 = vector.shape_cast %43 : vector<1x4x288xbf16> to vector<4x288xbf16>
    %cst_41 = arith.constant dense<0.000000e+00> : vector<4x288xf32>
    %45 = tpu.matmul %42, %44, %cst_41 {dimension_numbers = #tpu.dot_dimension_numbers<[1], [0], [0], [1], [0, 0, 1, 1], [], []>} : vector<4x4xbf16>, vector<4x288xbf16>, vector<4x288xf32> -> vector<4x288xf32>
    %46 = arith.addf %40, %45 : vector<4x288xf32>
    %c8 = arith.constant 8 : index
    %c0_42 = arith.constant 0 : index
    %c0_43 = arith.constant 0 : index
    %47 = vector.load %arg2[%c8, %c0_42, %c0_43] : memref<9x4x4xbf16, #tpu.memory_space<vmem>>, vector<1x4x4xbf16>
    %48 = vector.shape_cast %47 : vector<1x4x4xbf16> to vector<4x4xbf16>
    %c0_44 = arith.constant 0 : index
    %c0_45 = arith.constant 0 : index
    %c38 = arith.constant 38 : index
    %49 = vector.load %arg1[%c0_44, %c0_45, %c38] : memref<1x4x326xbf16, #tpu.memory_space<vmem>>, vector<1x4x288xbf16>
    %50 = vector.shape_cast %49 : vector<1x4x288xbf16> to vector<4x288xbf16>
    %cst_46 = arith.constant dense<0.000000e+00> : vector<4x288xf32>
    %51 = tpu.matmul %48, %50, %cst_46 {dimension_numbers = #tpu.dot_dimension_numbers<[1], [0], [0], [1], [0, 0, 1, 1], [], []>} : vector<4x4xbf16>, vector<4x288xbf16>, vector<4x288xf32> -> vector<4x288xf32>
    %52 = arith.addf %46, %51 : vector<4x288xf32>
    %c0_47 = arith.constant 0 : index
    %c0_48 = arith.constant 0 : index
    %53 = vector.load %arg3[%c0_47, %c0_48] : memref<4x1xf32, #tpu.memory_space<vmem>>, vector<4x1xf32>
    %54 = vector.broadcast %53 : vector<4x1xf32> to vector<4x288xf32>
    %55 = arith.addf %52, %54 : vector<4x288xf32>
    %cst_49 = arith.constant 0.000000e+00 : f32
    %56 = vector.broadcast %cst_49 : f32 to vector<4x288xf32>
    %57 = arith.maximumf %55, %56 : vector<4x288xf32>
    %58 = arith.truncf %57 : vector<4x288xf32> to vector<4x288xbf16>
    %c0_50 = arith.constant 0 : index
    %c0_51 = arith.constant 0 : index
    %c0_52 = arith.constant 0 : index
    %59 = vector.load %arg4[%c0_50, %c0_51, %c0_52] : memref<1x4x288xbf16, #tpu.memory_space<vmem>>, vector<1x4x288xbf16>
    %60 = vector.shape_cast %59 : vector<1x4x288xbf16> to vector<4x288xbf16>
    %61 = vector.shape_cast %58 : vector<4x288xbf16> to vector<1x4x288xbf16>
    tpu.vector_store %arg4[%c0_50, %c0_51, %c0_52], %61 {strides = array<i32>} : memref<1x4x288xbf16, #tpu.memory_space<vmem>>, vector<1x4x288xbf16>,
    return
  }
  func.func @transform_0(%arg0: i32) -> (i32, i32, i32) {
    %c0_i32 = arith.constant 0 : i32
    %c0_i32_0 = arith.constant 0 : i32
    %c0_i32_1 = arith.constant 0 : i32
    return %arg0, %c0_i32, %c0_i32_0 : i32, i32, i32
  }
  func.func @transform_1(%arg0: i32) -> (i32, i32, i32) {
    %c0_i32 = arith.constant 0 : i32
    %c0_i32_0 = arith.constant 0 : i32
    %c0_i32_1 = arith.constant 0 : i32
    %c0_i32_2 = arith.constant 0 : i32
    return %c0_i32, %c0_i32_0, %c0_i32_1 : i32, i32, i32
  }
  func.func @transform_2(%arg0: i32) -> (i32, i32) {
    %c0_i32 = arith.constant 0 : i32
    %c0_i32_0 = arith.constant 0 : i32
    %c0_i32_1 = arith.constant 0 : i32
    return %c0_i32, %c0_i32_0 : i32, i32
  }
  func.func @transform_3(%arg0: i32) -> (i32, i32, i32) {
    %c0_i32 = arith.constant 0 : i32
    %c0_i32_0 = arith.constant 0 : i32
    %c0_i32_1 = arith.constant 0 : i32
    return %arg0, %c0_i32, %c0_i32_0 : i32, i32, i32
  }
}

module attributes {stable_mosaic.version = 11 : i64} {
  func.func @_gemm_conv_kernel(%arg0: i32, %arg1: memref<1x4x102xbf16, #tpu.memory_space<vmem>>, %arg2: memref<9x8x4xbf16, #tpu.memory_space<vmem>>, %arg3: memref<8x1xf32, #tpu.memory_space<vmem>>, %arg4: memref<1x8x80xbf16, #tpu.memory_space<vmem>>) attributes {dimension_semantics = [#tpu.dimension_semantics<parallel>], iteration_bounds = array<i64: 2>, scalar_prefetch = 0 : i64, scratch_operands = 0 : i64, tpu.core_type = #tpu.core_type<tc>, window_params = [{transform_indices = @transform_0, window_bounds = array<i64: 1, 4, 102>}, {pipeline_mode = #tpu.pipeline_mode<synchronous>, transform_indices = @transform_1, window_bounds = array<i64: 9, 8, 4>}, {pipeline_mode = #tpu.pipeline_mode<synchronous>, transform_indices = @transform_2, window_bounds = array<i64: 8, 1>}, {transform_indices = @transform_3, window_bounds = array<i64: 1, 8, 80>}]} {
    %c0 = arith.constant 0 : index
    %c0_0 = arith.constant 0 : index
    %c0_1 = arith.constant 0 : index
    %0 = vector.load %arg2[%c0, %c0_0, %c0_1] : memref<9x8x4xbf16, #tpu.memory_space<vmem>>, vector<1x8x4xbf16>
    %1 = vector.shape_cast %0 : vector<1x8x4xbf16> to vector<8x4xbf16>
    %c0_2 = arith.constant 0 : index
    %c0_3 = arith.constant 0 : index
    %c0_4 = arith.constant 0 : index
    %2 = vector.load %arg1[%c0_2, %c0_3, %c0_4] : memref<1x4x102xbf16, #tpu.memory_space<vmem>>, vector<1x4x80xbf16>
    %3 = vector.shape_cast %2 : vector<1x4x80xbf16> to vector<4x80xbf16>
    %cst = arith.constant dense<0.000000e+00> : vector<8x80xf32>
    %4 = tpu.matmul %1, %3, %cst {dimension_numbers = #tpu.dot_dimension_numbers<[1], [0], [0], [1], [0, 0, 1, 1], [], []>} : vector<8x4xbf16>, vector<4x80xbf16>, vector<8x80xf32> -> vector<8x80xf32>
    %c1 = arith.constant 1 : index
    %c0_5 = arith.constant 0 : index
    %c0_6 = arith.constant 0 : index
    %5 = vector.load %arg2[%c1, %c0_5, %c0_6] : memref<9x8x4xbf16, #tpu.memory_space<vmem>>, vector<1x8x4xbf16>
    %6 = vector.shape_cast %5 : vector<1x8x4xbf16> to vector<8x4xbf16>
    %c0_7 = arith.constant 0 : index
    %c0_8 = arith.constant 0 : index
    %c1_9 = arith.constant 1 : index
    %7 = vector.load %arg1[%c0_7, %c0_8, %c1_9] : memref<1x4x102xbf16, #tpu.memory_space<vmem>>, vector<1x4x80xbf16>
    %8 = vector.shape_cast %7 : vector<1x4x80xbf16> to vector<4x80xbf16>
    %cst_10 = arith.constant dense<0.000000e+00> : vector<8x80xf32>
    %9 = tpu.matmul %6, %8, %cst_10 {dimension_numbers = #tpu.dot_dimension_numbers<[1], [0], [0], [1], [0, 0, 1, 1], [], []>} : vector<8x4xbf16>, vector<4x80xbf16>, vector<8x80xf32> -> vector<8x80xf32>
    %10 = arith.addf %4, %9 : vector<8x80xf32>
    %c2 = arith.constant 2 : index
    %c0_11 = arith.constant 0 : index
    %c0_12 = arith.constant 0 : index
    %11 = vector.load %arg2[%c2, %c0_11, %c0_12] : memref<9x8x4xbf16, #tpu.memory_space<vmem>>, vector<1x8x4xbf16>
    %12 = vector.shape_cast %11 : vector<1x8x4xbf16> to vector<8x4xbf16>
    %c0_13 = arith.constant 0 : index
    %c0_14 = arith.constant 0 : index
    %c2_15 = arith.constant 2 : index
    %13 = vector.load %arg1[%c0_13, %c0_14, %c2_15] : memref<1x4x102xbf16, #tpu.memory_space<vmem>>, vector<1x4x80xbf16>
    %14 = vector.shape_cast %13 : vector<1x4x80xbf16> to vector<4x80xbf16>
    %cst_16 = arith.constant dense<0.000000e+00> : vector<8x80xf32>
    %15 = tpu.matmul %12, %14, %cst_16 {dimension_numbers = #tpu.dot_dimension_numbers<[1], [0], [0], [1], [0, 0, 1, 1], [], []>} : vector<8x4xbf16>, vector<4x80xbf16>, vector<8x80xf32> -> vector<8x80xf32>
    %16 = arith.addf %10, %15 : vector<8x80xf32>
    %c3 = arith.constant 3 : index
    %c0_17 = arith.constant 0 : index
    %c0_18 = arith.constant 0 : index
    %17 = vector.load %arg2[%c3, %c0_17, %c0_18] : memref<9x8x4xbf16, #tpu.memory_space<vmem>>, vector<1x8x4xbf16>
    %18 = vector.shape_cast %17 : vector<1x8x4xbf16> to vector<8x4xbf16>
    %c0_19 = arith.constant 0 : index
    %c0_20 = arith.constant 0 : index
    %c10 = arith.constant 10 : index
    %19 = vector.load %arg1[%c0_19, %c0_20, %c10] : memref<1x4x102xbf16, #tpu.memory_space<vmem>>, vector<1x4x80xbf16>
    %20 = vector.shape_cast %19 : vector<1x4x80xbf16> to vector<4x80xbf16>
    %cst_21 = arith.constant dense<0.000000e+00> : vector<8x80xf32>
    %21 = tpu.matmul %18, %20, %cst_21 {dimension_numbers = #tpu.dot_dimension_numbers<[1], [0], [0], [1], [0, 0, 1, 1], [], []>} : vector<8x4xbf16>, vector<4x80xbf16>, vector<8x80xf32> -> vector<8x80xf32>
    %22 = arith.addf %16, %21 : vector<8x80xf32>
    %c4 = arith.constant 4 : index
    %c0_22 = arith.constant 0 : index
    %c0_23 = arith.constant 0 : index
    %23 = vector.load %arg2[%c4, %c0_22, %c0_23] : memref<9x8x4xbf16, #tpu.memory_space<vmem>>, vector<1x8x4xbf16>
    %24 = vector.shape_cast %23 : vector<1x8x4xbf16> to vector<8x4xbf16>
    %c0_24 = arith.constant 0 : index
    %c0_25 = arith.constant 0 : index
    %c11 = arith.constant 11 : index
    %25 = vector.load %arg1[%c0_24, %c0_25, %c11] : memref<1x4x102xbf16, #tpu.memory_space<vmem>>, vector<1x4x80xbf16>
    %26 = vector.shape_cast %25 : vector<1x4x80xbf16> to vector<4x80xbf16>
    %cst_26 = arith.constant dense<0.000000e+00> : vector<8x80xf32>
    %27 = tpu.matmul %24, %26, %cst_26 {dimension_numbers = #tpu.dot_dimension_numbers<[1], [0], [0], [1], [0, 0, 1, 1], [], []>} : vector<8x4xbf16>, vector<4x80xbf16>, vector<8x80xf32> -> vector<8x80xf32>
    %28 = arith.addf %22, %27 : vector<8x80xf32>
    %c5 = arith.constant 5 : index
    %c0_27 = arith.constant 0 : index
    %c0_28 = arith.constant 0 : index
    %29 = vector.load %arg2[%c5, %c0_27, %c0_28] : memref<9x8x4xbf16, #tpu.memory_space<vmem>>, vector<1x8x4xbf16>
    %30 = vector.shape_cast %29 : vector<1x8x4xbf16> to vector<8x4xbf16>
    %c0_29 = arith.constant 0 : index
    %c0_30 = arith.constant 0 : index
    %c12 = arith.constant 12 : index
    %31 = vector.load %arg1[%c0_29, %c0_30, %c12] : memref<1x4x102xbf16, #tpu.memory_space<vmem>>, vector<1x4x80xbf16>
    %32 = vector.shape_cast %31 : vector<1x4x80xbf16> to vector<4x80xbf16>
    %cst_31 = arith.constant dense<0.000000e+00> : vector<8x80xf32>
    %33 = tpu.matmul %30, %32, %cst_31 {dimension_numbers = #tpu.dot_dimension_numbers<[1], [0], [0], [1], [0, 0, 1, 1], [], []>} : vector<8x4xbf16>, vector<4x80xbf16>, vector<8x80xf32> -> vector<8x80xf32>
    %34 = arith.addf %28, %33 : vector<8x80xf32>
    %c6 = arith.constant 6 : index
    %c0_32 = arith.constant 0 : index
    %c0_33 = arith.constant 0 : index
    %35 = vector.load %arg2[%c6, %c0_32, %c0_33] : memref<9x8x4xbf16, #tpu.memory_space<vmem>>, vector<1x8x4xbf16>
    %36 = vector.shape_cast %35 : vector<1x8x4xbf16> to vector<8x4xbf16>
    %c0_34 = arith.constant 0 : index
    %c0_35 = arith.constant 0 : index
    %c20 = arith.constant 20 : index
    %37 = vector.load %arg1[%c0_34, %c0_35, %c20] : memref<1x4x102xbf16, #tpu.memory_space<vmem>>, vector<1x4x80xbf16>
    %38 = vector.shape_cast %37 : vector<1x4x80xbf16> to vector<4x80xbf16>
    %cst_36 = arith.constant dense<0.000000e+00> : vector<8x80xf32>
    %39 = tpu.matmul %36, %38, %cst_36 {dimension_numbers = #tpu.dot_dimension_numbers<[1], [0], [0], [1], [0, 0, 1, 1], [], []>} : vector<8x4xbf16>, vector<4x80xbf16>, vector<8x80xf32> -> vector<8x80xf32>
    %40 = arith.addf %34, %39 : vector<8x80xf32>
    %c7 = arith.constant 7 : index
    %c0_37 = arith.constant 0 : index
    %c0_38 = arith.constant 0 : index
    %41 = vector.load %arg2[%c7, %c0_37, %c0_38] : memref<9x8x4xbf16, #tpu.memory_space<vmem>>, vector<1x8x4xbf16>
    %42 = vector.shape_cast %41 : vector<1x8x4xbf16> to vector<8x4xbf16>
    %c0_39 = arith.constant 0 : index
    %c0_40 = arith.constant 0 : index
    %c21 = arith.constant 21 : index
    %43 = vector.load %arg1[%c0_39, %c0_40, %c21] : memref<1x4x102xbf16, #tpu.memory_space<vmem>>, vector<1x4x80xbf16>
    %44 = vector.shape_cast %43 : vector<1x4x80xbf16> to vector<4x80xbf16>
    %cst_41 = arith.constant dense<0.000000e+00> : vector<8x80xf32>
    %45 = tpu.matmul %42, %44, %cst_41 {dimension_numbers = #tpu.dot_dimension_numbers<[1], [0], [0], [1], [0, 0, 1, 1], [], []>} : vector<8x4xbf16>, vector<4x80xbf16>, vector<8x80xf32> -> vector<8x80xf32>
    %46 = arith.addf %40, %45 : vector<8x80xf32>
    %c8 = arith.constant 8 : index
    %c0_42 = arith.constant 0 : index
    %c0_43 = arith.constant 0 : index
    %47 = vector.load %arg2[%c8, %c0_42, %c0_43] : memref<9x8x4xbf16, #tpu.memory_space<vmem>>, vector<1x8x4xbf16>
    %48 = vector.shape_cast %47 : vector<1x8x4xbf16> to vector<8x4xbf16>
    %c0_44 = arith.constant 0 : index
    %c0_45 = arith.constant 0 : index
    %c22 = arith.constant 22 : index
    %49 = vector.load %arg1[%c0_44, %c0_45, %c22] : memref<1x4x102xbf16, #tpu.memory_space<vmem>>, vector<1x4x80xbf16>
    %50 = vector.shape_cast %49 : vector<1x4x80xbf16> to vector<4x80xbf16>
    %cst_46 = arith.constant dense<0.000000e+00> : vector<8x80xf32>
    %51 = tpu.matmul %48, %50, %cst_46 {dimension_numbers = #tpu.dot_dimension_numbers<[1], [0], [0], [1], [0, 0, 1, 1], [], []>} : vector<8x4xbf16>, vector<4x80xbf16>, vector<8x80xf32> -> vector<8x80xf32>
    %52 = arith.addf %46, %51 : vector<8x80xf32>
    %c0_47 = arith.constant 0 : index
    %c0_48 = arith.constant 0 : index
    %53 = vector.load %arg3[%c0_47, %c0_48] : memref<8x1xf32, #tpu.memory_space<vmem>>, vector<8x1xf32>
    %54 = vector.broadcast %53 : vector<8x1xf32> to vector<8x80xf32>
    %55 = arith.addf %52, %54 : vector<8x80xf32>
    %cst_49 = arith.constant 0.000000e+00 : f32
    %56 = vector.broadcast %cst_49 : f32 to vector<8x80xf32>
    %57 = arith.maximumf %55, %56 : vector<8x80xf32>
    %58 = arith.truncf %57 : vector<8x80xf32> to vector<8x80xbf16>
    %c0_50 = arith.constant 0 : index
    %c0_51 = arith.constant 0 : index
    %c0_52 = arith.constant 0 : index
    %59 = vector.load %arg4[%c0_50, %c0_51, %c0_52] : memref<1x8x80xbf16, #tpu.memory_space<vmem>>, vector<1x8x80xbf16>
    %60 = vector.shape_cast %59 : vector<1x8x80xbf16> to vector<8x80xbf16>
    %61 = vector.shape_cast %58 : vector<8x80xbf16> to vector<1x8x80xbf16>
    tpu.vector_store %arg4[%c0_50, %c0_51, %c0_52], %61 {strides = array<i32>} : memref<1x8x80xbf16, #tpu.memory_space<vmem>>, vector<1x8x80xbf16>,
    return
  }
  func.func @transform_0(%arg0: i32) -> (i32, i32, i32) {
    %c0_i32 = arith.constant 0 : i32
    %c0_i32_0 = arith.constant 0 : i32
    %c0_i32_1 = arith.constant 0 : i32
    return %arg0, %c0_i32, %c0_i32_0 : i32, i32, i32
  }
  func.func @transform_1(%arg0: i32) -> (i32, i32, i32) {
    %c0_i32 = arith.constant 0 : i32
    %c0_i32_0 = arith.constant 0 : i32
    %c0_i32_1 = arith.constant 0 : i32
    %c0_i32_2 = arith.constant 0 : i32
    return %c0_i32, %c0_i32_0, %c0_i32_1 : i32, i32, i32
  }
  func.func @transform_2(%arg0: i32) -> (i32, i32) {
    %c0_i32 = arith.constant 0 : i32
    %c0_i32_0 = arith.constant 0 : i32
    %c0_i32_1 = arith.constant 0 : i32
    return %c0_i32, %c0_i32_0 : i32, i32
  }
  func.func @transform_3(%arg0: i32) -> (i32, i32, i32) {
    %c0_i32 = arith.constant 0 : i32
    %c0_i32_0 = arith.constant 0 : i32
    %c0_i32_1 = arith.constant 0 : i32
    return %arg0, %c0_i32, %c0_i32_0 : i32, i32, i32
  }
}

module attributes {stable_mosaic.version = 11 : i64} {
  func.func @_gemm_conv_kernel(%arg0: i32, %arg1: memref<1x8x102xbf16, #tpu.memory_space<vmem>>, %arg2: memref<9x8x8xbf16, #tpu.memory_space<vmem>>, %arg3: memref<8x1xf32, #tpu.memory_space<vmem>>, %arg4: memref<1x8x80xbf16, #tpu.memory_space<vmem>>) attributes {dimension_semantics = [#tpu.dimension_semantics<parallel>], iteration_bounds = array<i64: 2>, scalar_prefetch = 0 : i64, scratch_operands = 0 : i64, tpu.core_type = #tpu.core_type<tc>, window_params = [{transform_indices = @transform_0, window_bounds = array<i64: 1, 8, 102>}, {pipeline_mode = #tpu.pipeline_mode<synchronous>, transform_indices = @transform_1, window_bounds = array<i64: 9, 8, 8>}, {pipeline_mode = #tpu.pipeline_mode<synchronous>, transform_indices = @transform_2, window_bounds = array<i64: 8, 1>}, {transform_indices = @transform_3, window_bounds = array<i64: 1, 8, 80>}]} {
    %c0 = arith.constant 0 : index
    %c0_0 = arith.constant 0 : index
    %c0_1 = arith.constant 0 : index
    %0 = vector.load %arg2[%c0, %c0_0, %c0_1] : memref<9x8x8xbf16, #tpu.memory_space<vmem>>, vector<1x8x8xbf16>
    %1 = vector.shape_cast %0 : vector<1x8x8xbf16> to vector<8x8xbf16>
    %c0_2 = arith.constant 0 : index
    %c0_3 = arith.constant 0 : index
    %c0_4 = arith.constant 0 : index
    %2 = vector.load %arg1[%c0_2, %c0_3, %c0_4] : memref<1x8x102xbf16, #tpu.memory_space<vmem>>, vector<1x8x80xbf16>
    %3 = vector.shape_cast %2 : vector<1x8x80xbf16> to vector<8x80xbf16>
    %cst = arith.constant dense<0.000000e+00> : vector<8x80xf32>
    %4 = tpu.matmul %1, %3, %cst {dimension_numbers = #tpu.dot_dimension_numbers<[1], [0], [0], [1], [0, 0, 1, 1], [], []>} : vector<8x8xbf16>, vector<8x80xbf16>, vector<8x80xf32> -> vector<8x80xf32>
    %c1 = arith.constant 1 : index
    %c0_5 = arith.constant 0 : index
    %c0_6 = arith.constant 0 : index
    %5 = vector.load %arg2[%c1, %c0_5, %c0_6] : memref<9x8x8xbf16, #tpu.memory_space<vmem>>, vector<1x8x8xbf16>
    %6 = vector.shape_cast %5 : vector<1x8x8xbf16> to vector<8x8xbf16>
    %c0_7 = arith.constant 0 : index
    %c0_8 = arith.constant 0 : index
    %c1_9 = arith.constant 1 : index
    %7 = vector.load %arg1[%c0_7, %c0_8, %c1_9] : memref<1x8x102xbf16, #tpu.memory_space<vmem>>, vector<1x8x80xbf16>
    %8 = vector.shape_cast %7 : vector<1x8x80xbf16> to vector<8x80xbf16>
    %cst_10 = arith.constant dense<0.000000e+00> : vector<8x80xf32>
    %9 = tpu.matmul %6, %8, %cst_10 {dimension_numbers = #tpu.dot_dimension_numbers<[1], [0], [0], [1], [0, 0, 1, 1], [], []>} : vector<8x8xbf16>, vector<8x80xbf16>, vector<8x80xf32> -> vector<8x80xf32>
    %10 = arith.addf %4, %9 : vector<8x80xf32>
    %c2 = arith.constant 2 : index
    %c0_11 = arith.constant 0 : index
    %c0_12 = arith.constant 0 : index
    %11 = vector.load %arg2[%c2, %c0_11, %c0_12] : memref<9x8x8xbf16, #tpu.memory_space<vmem>>, vector<1x8x8xbf16>
    %12 = vector.shape_cast %11 : vector<1x8x8xbf16> to vector<8x8xbf16>
    %c0_13 = arith.constant 0 : index
    %c0_14 = arith.constant 0 : index
    %c2_15 = arith.constant 2 : index
    %13 = vector.load %arg1[%c0_13, %c0_14, %c2_15] : memref<1x8x102xbf16, #tpu.memory_space<vmem>>, vector<1x8x80xbf16>
    %14 = vector.shape_cast %13 : vector<1x8x80xbf16> to vector<8x80xbf16>
    %cst_16 = arith.constant dense<0.000000e+00> : vector<8x80xf32>
    %15 = tpu.matmul %12, %14, %cst_16 {dimension_numbers = #tpu.dot_dimension_numbers<[1], [0], [0], [1], [0, 0, 1, 1], [], []>} : vector<8x8xbf16>, vector<8x80xbf16>, vector<8x80xf32> -> vector<8x80xf32>
    %16 = arith.addf %10, %15 : vector<8x80xf32>
    %c3 = arith.constant 3 : index
    %c0_17 = arith.constant 0 : index
    %c0_18 = arith.constant 0 : index
    %17 = vector.load %arg2[%c3, %c0_17, %c0_18] : memref<9x8x8xbf16, #tpu.memory_space<vmem>>, vector<1x8x8xbf16>
    %18 = vector.shape_cast %17 : vector<1x8x8xbf16> to vector<8x8xbf16>
    %c0_19 = arith.constant 0 : index
    %c0_20 = arith.constant 0 : index
    %c10 = arith.constant 10 : index
    %19 = vector.load %arg1[%c0_19, %c0_20, %c10] : memref<1x8x102xbf16, #tpu.memory_space<vmem>>, vector<1x8x80xbf16>
    %20 = vector.shape_cast %19 : vector<1x8x80xbf16> to vector<8x80xbf16>
    %cst_21 = arith.constant dense<0.000000e+00> : vector<8x80xf32>
    %21 = tpu.matmul %18, %20, %cst_21 {dimension_numbers = #tpu.dot_dimension_numbers<[1], [0], [0], [1], [0, 0, 1, 1], [], []>} : vector<8x8xbf16>, vector<8x80xbf16>, vector<8x80xf32> -> vector<8x80xf32>
    %22 = arith.addf %16, %21 : vector<8x80xf32>
    %c4 = arith.constant 4 : index
    %c0_22 = arith.constant 0 : index
    %c0_23 = arith.constant 0 : index
    %23 = vector.load %arg2[%c4, %c0_22, %c0_23] : memref<9x8x8xbf16, #tpu.memory_space<vmem>>, vector<1x8x8xbf16>
    %24 = vector.shape_cast %23 : vector<1x8x8xbf16> to vector<8x8xbf16>
    %c0_24 = arith.constant 0 : index
    %c0_25 = arith.constant 0 : index
    %c11 = arith.constant 11 : index
    %25 = vector.load %arg1[%c0_24, %c0_25, %c11] : memref<1x8x102xbf16, #tpu.memory_space<vmem>>, vector<1x8x80xbf16>
    %26 = vector.shape_cast %25 : vector<1x8x80xbf16> to vector<8x80xbf16>
    %cst_26 = arith.constant dense<0.000000e+00> : vector<8x80xf32>
    %27 = tpu.matmul %24, %26, %cst_26 {dimension_numbers = #tpu.dot_dimension_numbers<[1], [0], [0], [1], [0, 0, 1, 1], [], []>} : vector<8x8xbf16>, vector<8x80xbf16>, vector<8x80xf32> -> vector<8x80xf32>
    %28 = arith.addf %22, %27 : vector<8x80xf32>
    %c5 = arith.constant 5 : index
    %c0_27 = arith.constant 0 : index
    %c0_28 = arith.constant 0 : index
    %29 = vector.load %arg2[%c5, %c0_27, %c0_28] : memref<9x8x8xbf16, #tpu.memory_space<vmem>>, vector<1x8x8xbf16>
    %30 = vector.shape_cast %29 : vector<1x8x8xbf16> to vector<8x8xbf16>
    %c0_29 = arith.constant 0 : index
    %c0_30 = arith.constant 0 : index
    %c12 = arith.constant 12 : index
    %31 = vector.load %arg1[%c0_29, %c0_30, %c12] : memref<1x8x102xbf16, #tpu.memory_space<vmem>>, vector<1x8x80xbf16>
    %32 = vector.shape_cast %31 : vector<1x8x80xbf16> to vector<8x80xbf16>
    %cst_31 = arith.constant dense<0.000000e+00> : vector<8x80xf32>
    %33 = tpu.matmul %30, %32, %cst_31 {dimension_numbers = #tpu.dot_dimension_numbers<[1], [0], [0], [1], [0, 0, 1, 1], [], []>} : vector<8x8xbf16>, vector<8x80xbf16>, vector<8x80xf32> -> vector<8x80xf32>
    %34 = arith.addf %28, %33 : vector<8x80xf32>
    %c6 = arith.constant 6 : index
    %c0_32 = arith.constant 0 : index
    %c0_33 = arith.constant 0 : index
    %35 = vector.load %arg2[%c6, %c0_32, %c0_33] : memref<9x8x8xbf16, #tpu.memory_space<vmem>>, vector<1x8x8xbf16>
    %36 = vector.shape_cast %35 : vector<1x8x8xbf16> to vector<8x8xbf16>
    %c0_34 = arith.constant 0 : index
    %c0_35 = arith.constant 0 : index
    %c20 = arith.constant 20 : index
    %37 = vector.load %arg1[%c0_34, %c0_35, %c20] : memref<1x8x102xbf16, #tpu.memory_space<vmem>>, vector<1x8x80xbf16>
    %38 = vector.shape_cast %37 : vector<1x8x80xbf16> to vector<8x80xbf16>
    %cst_36 = arith.constant dense<0.000000e+00> : vector<8x80xf32>
    %39 = tpu.matmul %36, %38, %cst_36 {dimension_numbers = #tpu.dot_dimension_numbers<[1], [0], [0], [1], [0, 0, 1, 1], [], []>} : vector<8x8xbf16>, vector<8x80xbf16>, vector<8x80xf32> -> vector<8x80xf32>
    %40 = arith.addf %34, %39 : vector<8x80xf32>
    %c7 = arith.constant 7 : index
    %c0_37 = arith.constant 0 : index
    %c0_38 = arith.constant 0 : index
    %41 = vector.load %arg2[%c7, %c0_37, %c0_38] : memref<9x8x8xbf16, #tpu.memory_space<vmem>>, vector<1x8x8xbf16>
    %42 = vector.shape_cast %41 : vector<1x8x8xbf16> to vector<8x8xbf16>
    %c0_39 = arith.constant 0 : index
    %c0_40 = arith.constant 0 : index
    %c21 = arith.constant 21 : index
    %43 = vector.load %arg1[%c0_39, %c0_40, %c21] : memref<1x8x102xbf16, #tpu.memory_space<vmem>>, vector<1x8x80xbf16>
    %44 = vector.shape_cast %43 : vector<1x8x80xbf16> to vector<8x80xbf16>
    %cst_41 = arith.constant dense<0.000000e+00> : vector<8x80xf32>
    %45 = tpu.matmul %42, %44, %cst_41 {dimension_numbers = #tpu.dot_dimension_numbers<[1], [0], [0], [1], [0, 0, 1, 1], [], []>} : vector<8x8xbf16>, vector<8x80xbf16>, vector<8x80xf32> -> vector<8x80xf32>
    %46 = arith.addf %40, %45 : vector<8x80xf32>
    %c8 = arith.constant 8 : index
    %c0_42 = arith.constant 0 : index
    %c0_43 = arith.constant 0 : index
    %47 = vector.load %arg2[%c8, %c0_42, %c0_43] : memref<9x8x8xbf16, #tpu.memory_space<vmem>>, vector<1x8x8xbf16>
    %48 = vector.shape_cast %47 : vector<1x8x8xbf16> to vector<8x8xbf16>
    %c0_44 = arith.constant 0 : index
    %c0_45 = arith.constant 0 : index
    %c22 = arith.constant 22 : index
    %49 = vector.load %arg1[%c0_44, %c0_45, %c22] : memref<1x8x102xbf16, #tpu.memory_space<vmem>>, vector<1x8x80xbf16>
    %50 = vector.shape_cast %49 : vector<1x8x80xbf16> to vector<8x80xbf16>
    %cst_46 = arith.constant dense<0.000000e+00> : vector<8x80xf32>
    %51 = tpu.matmul %48, %50, %cst_46 {dimension_numbers = #tpu.dot_dimension_numbers<[1], [0], [0], [1], [0, 0, 1, 1], [], []>} : vector<8x8xbf16>, vector<8x80xbf16>, vector<8x80xf32> -> vector<8x80xf32>
    %52 = arith.addf %46, %51 : vector<8x80xf32>
    %c0_47 = arith.constant 0 : index
    %c0_48 = arith.constant 0 : index
    %53 = vector.load %arg3[%c0_47, %c0_48] : memref<8x1xf32, #tpu.memory_space<vmem>>, vector<8x1xf32>
    %54 = vector.broadcast %53 : vector<8x1xf32> to vector<8x80xf32>
    %55 = arith.addf %52, %54 : vector<8x80xf32>
    %cst_49 = arith.constant 0.000000e+00 : f32
    %56 = vector.broadcast %cst_49 : f32 to vector<8x80xf32>
    %57 = arith.maximumf %55, %56 : vector<8x80xf32>
    %58 = arith.truncf %57 : vector<8x80xf32> to vector<8x80xbf16>
    %c0_50 = arith.constant 0 : index
    %c0_51 = arith.constant 0 : index
    %c0_52 = arith.constant 0 : index
    %59 = vector.load %arg4[%c0_50, %c0_51, %c0_52] : memref<1x8x80xbf16, #tpu.memory_space<vmem>>, vector<1x8x80xbf16>
    %60 = vector.shape_cast %59 : vector<1x8x80xbf16> to vector<8x80xbf16>
    %61 = vector.shape_cast %58 : vector<8x80xbf16> to vector<1x8x80xbf16>
    tpu.vector_store %arg4[%c0_50, %c0_51, %c0_52], %61 {strides = array<i32>} : memref<1x8x80xbf16, #tpu.memory_space<vmem>>, vector<1x8x80xbf16>,
    return
  }
  func.func @transform_0(%arg0: i32) -> (i32, i32, i32) {
    %c0_i32 = arith.constant 0 : i32
    %c0_i32_0 = arith.constant 0 : i32
    %c0_i32_1 = arith.constant 0 : i32
    return %arg0, %c0_i32, %c0_i32_0 : i32, i32, i32
  }
  func.func @transform_1(%arg0: i32) -> (i32, i32, i32) {
    %c0_i32 = arith.constant 0 : i32
    %c0_i32_0 = arith.constant 0 : i32
    %c0_i32_1 = arith.constant 0 : i32
    %c0_i32_2 = arith.constant 0 : i32
    return %c0_i32, %c0_i32_0, %c0_i32_1 : i32, i32, i32
  }
  func.func @transform_2(%arg0: i32) -> (i32, i32) {
    %c0_i32 = arith.constant 0 : i32
    %c0_i32_0 = arith.constant 0 : i32
    %c0_i32_1 = arith.constant 0 : i32
    return %c0_i32, %c0_i32_0 : i32, i32
  }
  func.func @transform_3(%arg0: i32) -> (i32, i32, i32) {
    %c0_i32 = arith.constant 0 : i32
    %c0_i32_0 = arith.constant 0 : i32
    %c0_i32_1 = arith.constant 0 : i32
    return %arg0, %c0_i32, %c0_i32_0 : i32, i32, i32
  }
}

module attributes {stable_mosaic.version = 11 : i64} {
  func.func @_gemm_conv_kernel(%arg0: i32, %arg1: memref<1x8x38xbf16, #tpu.memory_space<vmem>>, %arg2: memref<9x16x8xbf16, #tpu.memory_space<vmem>>, %arg3: memref<16x1xf32, #tpu.memory_space<vmem>>, %arg4: memref<1x16x24xbf16, #tpu.memory_space<vmem>>) attributes {dimension_semantics = [#tpu.dimension_semantics<parallel>], iteration_bounds = array<i64: 2>, scalar_prefetch = 0 : i64, scratch_operands = 0 : i64, tpu.core_type = #tpu.core_type<tc>, window_params = [{transform_indices = @transform_0, window_bounds = array<i64: 1, 8, 38>}, {pipeline_mode = #tpu.pipeline_mode<synchronous>, transform_indices = @transform_1, window_bounds = array<i64: 9, 16, 8>}, {pipeline_mode = #tpu.pipeline_mode<synchronous>, transform_indices = @transform_2, window_bounds = array<i64: 16, 1>}, {transform_indices = @transform_3, window_bounds = array<i64: 1, 16, 24>}]} {
    %c0 = arith.constant 0 : index
    %c0_0 = arith.constant 0 : index
    %c0_1 = arith.constant 0 : index
    %0 = vector.load %arg2[%c0, %c0_0, %c0_1] : memref<9x16x8xbf16, #tpu.memory_space<vmem>>, vector<1x16x8xbf16>
    %1 = vector.shape_cast %0 : vector<1x16x8xbf16> to vector<16x8xbf16>
    %c0_2 = arith.constant 0 : index
    %c0_3 = arith.constant 0 : index
    %c0_4 = arith.constant 0 : index
    %2 = vector.load %arg1[%c0_2, %c0_3, %c0_4] : memref<1x8x38xbf16, #tpu.memory_space<vmem>>, vector<1x8x24xbf16>
    %3 = vector.shape_cast %2 : vector<1x8x24xbf16> to vector<8x24xbf16>
    %cst = arith.constant dense<0.000000e+00> : vector<16x24xf32>
    %4 = tpu.matmul %1, %3, %cst {dimension_numbers = #tpu.dot_dimension_numbers<[1], [0], [0], [1], [0, 0, 1, 1], [], []>} : vector<16x8xbf16>, vector<8x24xbf16>, vector<16x24xf32> -> vector<16x24xf32>
    %c1 = arith.constant 1 : index
    %c0_5 = arith.constant 0 : index
    %c0_6 = arith.constant 0 : index
    %5 = vector.load %arg2[%c1, %c0_5, %c0_6] : memref<9x16x8xbf16, #tpu.memory_space<vmem>>, vector<1x16x8xbf16>
    %6 = vector.shape_cast %5 : vector<1x16x8xbf16> to vector<16x8xbf16>
    %c0_7 = arith.constant 0 : index
    %c0_8 = arith.constant 0 : index
    %c1_9 = arith.constant 1 : index
    %7 = vector.load %arg1[%c0_7, %c0_8, %c1_9] : memref<1x8x38xbf16, #tpu.memory_space<vmem>>, vector<1x8x24xbf16>
    %8 = vector.shape_cast %7 : vector<1x8x24xbf16> to vector<8x24xbf16>
    %cst_10 = arith.constant dense<0.000000e+00> : vector<16x24xf32>
    %9 = tpu.matmul %6, %8, %cst_10 {dimension_numbers = #tpu.dot_dimension_numbers<[1], [0], [0], [1], [0, 0, 1, 1], [], []>} : vector<16x8xbf16>, vector<8x24xbf16>, vector<16x24xf32> -> vector<16x24xf32>
    %10 = arith.addf %4, %9 : vector<16x24xf32>
    %c2 = arith.constant 2 : index
    %c0_11 = arith.constant 0 : index
    %c0_12 = arith.constant 0 : index
    %11 = vector.load %arg2[%c2, %c0_11, %c0_12] : memref<9x16x8xbf16, #tpu.memory_space<vmem>>, vector<1x16x8xbf16>
    %12 = vector.shape_cast %11 : vector<1x16x8xbf16> to vector<16x8xbf16>
    %c0_13 = arith.constant 0 : index
    %c0_14 = arith.constant 0 : index
    %c2_15 = arith.constant 2 : index
    %13 = vector.load %arg1[%c0_13, %c0_14, %c2_15] : memref<1x8x38xbf16, #tpu.memory_space<vmem>>, vector<1x8x24xbf16>
    %14 = vector.shape_cast %13 : vector<1x8x24xbf16> to vector<8x24xbf16>
    %cst_16 = arith.constant dense<0.000000e+00> : vector<16x24xf32>
    %15 = tpu.matmul %12, %14, %cst_16 {dimension_numbers = #tpu.dot_dimension_numbers<[1], [0], [0], [1], [0, 0, 1, 1], [], []>} : vector<16x8xbf16>, vector<8x24xbf16>, vector<16x24xf32> -> vector<16x24xf32>
    %16 = arith.addf %10, %15 : vector<16x24xf32>
    %c3 = arith.constant 3 : index
    %c0_17 = arith.constant 0 : index
    %c0_18 = arith.constant 0 : index
    %17 = vector.load %arg2[%c3, %c0_17, %c0_18] : memref<9x16x8xbf16, #tpu.memory_space<vmem>>, vector<1x16x8xbf16>
    %18 = vector.shape_cast %17 : vector<1x16x8xbf16> to vector<16x8xbf16>
    %c0_19 = arith.constant 0 : index
    %c0_20 = arith.constant 0 : index
    %c6 = arith.constant 6 : index
    %19 = vector.load %arg1[%c0_19, %c0_20, %c6] : memref<1x8x38xbf16, #tpu.memory_space<vmem>>, vector<1x8x24xbf16>
    %20 = vector.shape_cast %19 : vector<1x8x24xbf16> to vector<8x24xbf16>
    %cst_21 = arith.constant dense<0.000000e+00> : vector<16x24xf32>
    %21 = tpu.matmul %18, %20, %cst_21 {dimension_numbers = #tpu.dot_dimension_numbers<[1], [0], [0], [1], [0, 0, 1, 1], [], []>} : vector<16x8xbf16>, vector<8x24xbf16>, vector<16x24xf32> -> vector<16x24xf32>
    %22 = arith.addf %16, %21 : vector<16x24xf32>
    %c4 = arith.constant 4 : index
    %c0_22 = arith.constant 0 : index
    %c0_23 = arith.constant 0 : index
    %23 = vector.load %arg2[%c4, %c0_22, %c0_23] : memref<9x16x8xbf16, #tpu.memory_space<vmem>>, vector<1x16x8xbf16>
    %24 = vector.shape_cast %23 : vector<1x16x8xbf16> to vector<16x8xbf16>
    %c0_24 = arith.constant 0 : index
    %c0_25 = arith.constant 0 : index
    %c7 = arith.constant 7 : index
    %25 = vector.load %arg1[%c0_24, %c0_25, %c7] : memref<1x8x38xbf16, #tpu.memory_space<vmem>>, vector<1x8x24xbf16>
    %26 = vector.shape_cast %25 : vector<1x8x24xbf16> to vector<8x24xbf16>
    %cst_26 = arith.constant dense<0.000000e+00> : vector<16x24xf32>
    %27 = tpu.matmul %24, %26, %cst_26 {dimension_numbers = #tpu.dot_dimension_numbers<[1], [0], [0], [1], [0, 0, 1, 1], [], []>} : vector<16x8xbf16>, vector<8x24xbf16>, vector<16x24xf32> -> vector<16x24xf32>
    %28 = arith.addf %22, %27 : vector<16x24xf32>
    %c5 = arith.constant 5 : index
    %c0_27 = arith.constant 0 : index
    %c0_28 = arith.constant 0 : index
    %29 = vector.load %arg2[%c5, %c0_27, %c0_28] : memref<9x16x8xbf16, #tpu.memory_space<vmem>>, vector<1x16x8xbf16>
    %30 = vector.shape_cast %29 : vector<1x16x8xbf16> to vector<16x8xbf16>
    %c0_29 = arith.constant 0 : index
    %c0_30 = arith.constant 0 : index
    %c8 = arith.constant 8 : index
    %31 = vector.load %arg1[%c0_29, %c0_30, %c8] : memref<1x8x38xbf16, #tpu.memory_space<vmem>>, vector<1x8x24xbf16>
    %32 = vector.shape_cast %31 : vector<1x8x24xbf16> to vector<8x24xbf16>
    %cst_31 = arith.constant dense<0.000000e+00> : vector<16x24xf32>
    %33 = tpu.matmul %30, %32, %cst_31 {dimension_numbers = #tpu.dot_dimension_numbers<[1], [0], [0], [1], [0, 0, 1, 1], [], []>} : vector<16x8xbf16>, vector<8x24xbf16>, vector<16x24xf32> -> vector<16x24xf32>
    %34 = arith.addf %28, %33 : vector<16x24xf32>
    %c6_32 = arith.constant 6 : index
    %c0_33 = arith.constant 0 : index
    %c0_34 = arith.constant 0 : index
    %35 = vector.load %arg2[%c6_32, %c0_33, %c0_34] : memref<9x16x8xbf16, #tpu.memory_space<vmem>>, vector<1x16x8xbf16>
    %36 = vector.shape_cast %35 : vector<1x16x8xbf16> to vector<16x8xbf16>
    %c0_35 = arith.constant 0 : index
    %c0_36 = arith.constant 0 : index
    %c12 = arith.constant 12 : index
    %37 = vector.load %arg1[%c0_35, %c0_36, %c12] : memref<1x8x38xbf16, #tpu.memory_space<vmem>>, vector<1x8x24xbf16>
    %38 = vector.shape_cast %37 : vector<1x8x24xbf16> to vector<8x24xbf16>
    %cst_37 = arith.constant dense<0.000000e+00> : vector<16x24xf32>
    %39 = tpu.matmul %36, %38, %cst_37 {dimension_numbers = #tpu.dot_dimension_numbers<[1], [0], [0], [1], [0, 0, 1, 1], [], []>} : vector<16x8xbf16>, vector<8x24xbf16>, vector<16x24xf32> -> vector<16x24xf32>
    %40 = arith.addf %34, %39 : vector<16x24xf32>
    %c7_38 = arith.constant 7 : index
    %c0_39 = arith.constant 0 : index
    %c0_40 = arith.constant 0 : index
    %41 = vector.load %arg2[%c7_38, %c0_39, %c0_40] : memref<9x16x8xbf16, #tpu.memory_space<vmem>>, vector<1x16x8xbf16>
    %42 = vector.shape_cast %41 : vector<1x16x8xbf16> to vector<16x8xbf16>
    %c0_41 = arith.constant 0 : index
    %c0_42 = arith.constant 0 : index
    %c13 = arith.constant 13 : index
    %43 = vector.load %arg1[%c0_41, %c0_42, %c13] : memref<1x8x38xbf16, #tpu.memory_space<vmem>>, vector<1x8x24xbf16>
    %44 = vector.shape_cast %43 : vector<1x8x24xbf16> to vector<8x24xbf16>
    %cst_43 = arith.constant dense<0.000000e+00> : vector<16x24xf32>
    %45 = tpu.matmul %42, %44, %cst_43 {dimension_numbers = #tpu.dot_dimension_numbers<[1], [0], [0], [1], [0, 0, 1, 1], [], []>} : vector<16x8xbf16>, vector<8x24xbf16>, vector<16x24xf32> -> vector<16x24xf32>
    %46 = arith.addf %40, %45 : vector<16x24xf32>
    %c8_44 = arith.constant 8 : index
    %c0_45 = arith.constant 0 : index
    %c0_46 = arith.constant 0 : index
    %47 = vector.load %arg2[%c8_44, %c0_45, %c0_46] : memref<9x16x8xbf16, #tpu.memory_space<vmem>>, vector<1x16x8xbf16>
    %48 = vector.shape_cast %47 : vector<1x16x8xbf16> to vector<16x8xbf16>
    %c0_47 = arith.constant 0 : index
    %c0_48 = arith.constant 0 : index
    %c14 = arith.constant 14 : index
    %49 = vector.load %arg1[%c0_47, %c0_48, %c14] : memref<1x8x38xbf16, #tpu.memory_space<vmem>>, vector<1x8x24xbf16>
    %50 = vector.shape_cast %49 : vector<1x8x24xbf16> to vector<8x24xbf16>
    %cst_49 = arith.constant dense<0.000000e+00> : vector<16x24xf32>
    %51 = tpu.matmul %48, %50, %cst_49 {dimension_numbers = #tpu.dot_dimension_numbers<[1], [0], [0], [1], [0, 0, 1, 1], [], []>} : vector<16x8xbf16>, vector<8x24xbf16>, vector<16x24xf32> -> vector<16x24xf32>
    %52 = arith.addf %46, %51 : vector<16x24xf32>
    %c0_50 = arith.constant 0 : index
    %c0_51 = arith.constant 0 : index
    %53 = vector.load %arg3[%c0_50, %c0_51] : memref<16x1xf32, #tpu.memory_space<vmem>>, vector<16x1xf32>
    %54 = vector.broadcast %53 : vector<16x1xf32> to vector<16x24xf32>
    %55 = arith.addf %52, %54 : vector<16x24xf32>
    %cst_52 = arith.constant 0.000000e+00 : f32
    %56 = vector.broadcast %cst_52 : f32 to vector<16x24xf32>
    %57 = arith.maximumf %55, %56 : vector<16x24xf32>
    %58 = arith.truncf %57 : vector<16x24xf32> to vector<16x24xbf16>
    %c0_53 = arith.constant 0 : index
    %c0_54 = arith.constant 0 : index
    %c0_55 = arith.constant 0 : index
    %59 = vector.load %arg4[%c0_53, %c0_54, %c0_55] : memref<1x16x24xbf16, #tpu.memory_space<vmem>>, vector<1x16x24xbf16>
    %60 = vector.shape_cast %59 : vector<1x16x24xbf16> to vector<16x24xbf16>
    %61 = vector.shape_cast %58 : vector<16x24xbf16> to vector<1x16x24xbf16>
    tpu.vector_store %arg4[%c0_53, %c0_54, %c0_55], %61 {strides = array<i32>} : memref<1x16x24xbf16, #tpu.memory_space<vmem>>, vector<1x16x24xbf16>,
    return
  }
  func.func @transform_0(%arg0: i32) -> (i32, i32, i32) {
    %c0_i32 = arith.constant 0 : i32
    %c0_i32_0 = arith.constant 0 : i32
    %c0_i32_1 = arith.constant 0 : i32
    return %arg0, %c0_i32, %c0_i32_0 : i32, i32, i32
  }
  func.func @transform_1(%arg0: i32) -> (i32, i32, i32) {
    %c0_i32 = arith.constant 0 : i32
    %c0_i32_0 = arith.constant 0 : i32
    %c0_i32_1 = arith.constant 0 : i32
    %c0_i32_2 = arith.constant 0 : i32
    return %c0_i32, %c0_i32_0, %c0_i32_1 : i32, i32, i32
  }
  func.func @transform_2(%arg0: i32) -> (i32, i32) {
    %c0_i32 = arith.constant 0 : i32
    %c0_i32_0 = arith.constant 0 : i32
    %c0_i32_1 = arith.constant 0 : i32
    return %c0_i32, %c0_i32_0 : i32, i32
  }
  func.func @transform_3(%arg0: i32) -> (i32, i32, i32) {
    %c0_i32 = arith.constant 0 : i32
    %c0_i32_0 = arith.constant 0 : i32
    %c0_i32_1 = arith.constant 0 : i32
    return %arg0, %c0_i32, %c0_i32_0 : i32, i32, i32
  }
}

module attributes {stable_mosaic.version = 11 : i64} {
  func.func @_gemm_conv_kernel(%arg0: i32, %arg1: memref<1x16x38xbf16, #tpu.memory_space<vmem>>, %arg2: memref<9x16x16xbf16, #tpu.memory_space<vmem>>, %arg3: memref<16x1xf32, #tpu.memory_space<vmem>>, %arg4: memref<1x16x24xbf16, #tpu.memory_space<vmem>>) attributes {dimension_semantics = [#tpu.dimension_semantics<parallel>], iteration_bounds = array<i64: 2>, scalar_prefetch = 0 : i64, scratch_operands = 0 : i64, tpu.core_type = #tpu.core_type<tc>, window_params = [{transform_indices = @transform_0, window_bounds = array<i64: 1, 16, 38>}, {pipeline_mode = #tpu.pipeline_mode<synchronous>, transform_indices = @transform_1, window_bounds = array<i64: 9, 16, 16>}, {pipeline_mode = #tpu.pipeline_mode<synchronous>, transform_indices = @transform_2, window_bounds = array<i64: 16, 1>}, {transform_indices = @transform_3, window_bounds = array<i64: 1, 16, 24>}]} {
    %c0 = arith.constant 0 : index
    %c0_0 = arith.constant 0 : index
    %c0_1 = arith.constant 0 : index
    %0 = vector.load %arg2[%c0, %c0_0, %c0_1] : memref<9x16x16xbf16, #tpu.memory_space<vmem>>, vector<1x16x16xbf16>
    %1 = vector.shape_cast %0 : vector<1x16x16xbf16> to vector<16x16xbf16>
    %c0_2 = arith.constant 0 : index
    %c0_3 = arith.constant 0 : index
    %c0_4 = arith.constant 0 : index
    %2 = vector.load %arg1[%c0_2, %c0_3, %c0_4] : memref<1x16x38xbf16, #tpu.memory_space<vmem>>, vector<1x16x24xbf16>
    %3 = vector.shape_cast %2 : vector<1x16x24xbf16> to vector<16x24xbf16>
    %cst = arith.constant dense<0.000000e+00> : vector<16x24xf32>
    %4 = tpu.matmul %1, %3, %cst {dimension_numbers = #tpu.dot_dimension_numbers<[1], [0], [0], [1], [0, 0, 1, 1], [], []>} : vector<16x16xbf16>, vector<16x24xbf16>, vector<16x24xf32> -> vector<16x24xf32>
    %c1 = arith.constant 1 : index
    %c0_5 = arith.constant 0 : index
    %c0_6 = arith.constant 0 : index
    %5 = vector.load %arg2[%c1, %c0_5, %c0_6] : memref<9x16x16xbf16, #tpu.memory_space<vmem>>, vector<1x16x16xbf16>
    %6 = vector.shape_cast %5 : vector<1x16x16xbf16> to vector<16x16xbf16>
    %c0_7 = arith.constant 0 : index
    %c0_8 = arith.constant 0 : index
    %c1_9 = arith.constant 1 : index
    %7 = vector.load %arg1[%c0_7, %c0_8, %c1_9] : memref<1x16x38xbf16, #tpu.memory_space<vmem>>, vector<1x16x24xbf16>
    %8 = vector.shape_cast %7 : vector<1x16x24xbf16> to vector<16x24xbf16>
    %cst_10 = arith.constant dense<0.000000e+00> : vector<16x24xf32>
    %9 = tpu.matmul %6, %8, %cst_10 {dimension_numbers = #tpu.dot_dimension_numbers<[1], [0], [0], [1], [0, 0, 1, 1], [], []>} : vector<16x16xbf16>, vector<16x24xbf16>, vector<16x24xf32> -> vector<16x24xf32>
    %10 = arith.addf %4, %9 : vector<16x24xf32>
    %c2 = arith.constant 2 : index
    %c0_11 = arith.constant 0 : index
    %c0_12 = arith.constant 0 : index
    %11 = vector.load %arg2[%c2, %c0_11, %c0_12] : memref<9x16x16xbf16, #tpu.memory_space<vmem>>, vector<1x16x16xbf16>
    %12 = vector.shape_cast %11 : vector<1x16x16xbf16> to vector<16x16xbf16>
    %c0_13 = arith.constant 0 : index
    %c0_14 = arith.constant 0 : index
    %c2_15 = arith.constant 2 : index
    %13 = vector.load %arg1[%c0_13, %c0_14, %c2_15] : memref<1x16x38xbf16, #tpu.memory_space<vmem>>, vector<1x16x24xbf16>
    %14 = vector.shape_cast %13 : vector<1x16x24xbf16> to vector<16x24xbf16>
    %cst_16 = arith.constant dense<0.000000e+00> : vector<16x24xf32>
    %15 = tpu.matmul %12, %14, %cst_16 {dimension_numbers = #tpu.dot_dimension_numbers<[1], [0], [0], [1], [0, 0, 1, 1], [], []>} : vector<16x16xbf16>, vector<16x24xbf16>, vector<16x24xf32> -> vector<16x24xf32>
    %16 = arith.addf %10, %15 : vector<16x24xf32>
    %c3 = arith.constant 3 : index
    %c0_17 = arith.constant 0 : index
    %c0_18 = arith.constant 0 : index
    %17 = vector.load %arg2[%c3, %c0_17, %c0_18] : memref<9x16x16xbf16, #tpu.memory_space<vmem>>, vector<1x16x16xbf16>
    %18 = vector.shape_cast %17 : vector<1x16x16xbf16> to vector<16x16xbf16>
    %c0_19 = arith.constant 0 : index
    %c0_20 = arith.constant 0 : index
    %c6 = arith.constant 6 : index
    %19 = vector.load %arg1[%c0_19, %c0_20, %c6] : memref<1x16x38xbf16, #tpu.memory_space<vmem>>, vector<1x16x24xbf16>
    %20 = vector.shape_cast %19 : vector<1x16x24xbf16> to vector<16x24xbf16>
    %cst_21 = arith.constant dense<0.000000e+00> : vector<16x24xf32>
    %21 = tpu.matmul %18, %20, %cst_21 {dimension_numbers = #tpu.dot_dimension_numbers<[1], [0], [0], [1], [0, 0, 1, 1], [], []>} : vector<16x16xbf16>, vector<16x24xbf16>, vector<16x24xf32> -> vector<16x24xf32>
    %22 = arith.addf %16, %21 : vector<16x24xf32>
    %c4 = arith.constant 4 : index
    %c0_22 = arith.constant 0 : index
    %c0_23 = arith.constant 0 : index
    %23 = vector.load %arg2[%c4, %c0_22, %c0_23] : memref<9x16x16xbf16, #tpu.memory_space<vmem>>, vector<1x16x16xbf16>
    %24 = vector.shape_cast %23 : vector<1x16x16xbf16> to vector<16x16xbf16>
    %c0_24 = arith.constant 0 : index
    %c0_25 = arith.constant 0 : index
    %c7 = arith.constant 7 : index
    %25 = vector.load %arg1[%c0_24, %c0_25, %c7] : memref<1x16x38xbf16, #tpu.memory_space<vmem>>, vector<1x16x24xbf16>
    %26 = vector.shape_cast %25 : vector<1x16x24xbf16> to vector<16x24xbf16>
    %cst_26 = arith.constant dense<0.000000e+00> : vector<16x24xf32>
    %27 = tpu.matmul %24, %26, %cst_26 {dimension_numbers = #tpu.dot_dimension_numbers<[1], [0], [0], [1], [0, 0, 1, 1], [], []>} : vector<16x16xbf16>, vector<16x24xbf16>, vector<16x24xf32> -> vector<16x24xf32>
    %28 = arith.addf %22, %27 : vector<16x24xf32>
    %c5 = arith.constant 5 : index
    %c0_27 = arith.constant 0 : index
    %c0_28 = arith.constant 0 : index
    %29 = vector.load %arg2[%c5, %c0_27, %c0_28] : memref<9x16x16xbf16, #tpu.memory_space<vmem>>, vector<1x16x16xbf16>
    %30 = vector.shape_cast %29 : vector<1x16x16xbf16> to vector<16x16xbf16>
    %c0_29 = arith.constant 0 : index
    %c0_30 = arith.constant 0 : index
    %c8 = arith.constant 8 : index
    %31 = vector.load %arg1[%c0_29, %c0_30, %c8] : memref<1x16x38xbf16, #tpu.memory_space<vmem>>, vector<1x16x24xbf16>
    %32 = vector.shape_cast %31 : vector<1x16x24xbf16> to vector<16x24xbf16>
    %cst_31 = arith.constant dense<0.000000e+00> : vector<16x24xf32>
    %33 = tpu.matmul %30, %32, %cst_31 {dimension_numbers = #tpu.dot_dimension_numbers<[1], [0], [0], [1], [0, 0, 1, 1], [], []>} : vector<16x16xbf16>, vector<16x24xbf16>, vector<16x24xf32> -> vector<16x24xf32>
    %34 = arith.addf %28, %33 : vector<16x24xf32>
    %c6_32 = arith.constant 6 : index
    %c0_33 = arith.constant 0 : index
    %c0_34 = arith.constant 0 : index
    %35 = vector.load %arg2[%c6_32, %c0_33, %c0_34] : memref<9x16x16xbf16, #tpu.memory_space<vmem>>, vector<1x16x16xbf16>
    %36 = vector.shape_cast %35 : vector<1x16x16xbf16> to vector<16x16xbf16>
    %c0_35 = arith.constant 0 : index
    %c0_36 = arith.constant 0 : index
    %c12 = arith.constant 12 : index
    %37 = vector.load %arg1[%c0_35, %c0_36, %c12] : memref<1x16x38xbf16, #tpu.memory_space<vmem>>, vector<1x16x24xbf16>
    %38 = vector.shape_cast %37 : vector<1x16x24xbf16> to vector<16x24xbf16>
    %cst_37 = arith.constant dense<0.000000e+00> : vector<16x24xf32>
    %39 = tpu.matmul %36, %38, %cst_37 {dimension_numbers = #tpu.dot_dimension_numbers<[1], [0], [0], [1], [0, 0, 1, 1], [], []>} : vector<16x16xbf16>, vector<16x24xbf16>, vector<16x24xf32> -> vector<16x24xf32>
    %40 = arith.addf %34, %39 : vector<16x24xf32>
    %c7_38 = arith.constant 7 : index
    %c0_39 = arith.constant 0 : index
    %c0_40 = arith.constant 0 : index
    %41 = vector.load %arg2[%c7_38, %c0_39, %c0_40] : memref<9x16x16xbf16, #tpu.memory_space<vmem>>, vector<1x16x16xbf16>
    %42 = vector.shape_cast %41 : vector<1x16x16xbf16> to vector<16x16xbf16>
    %c0_41 = arith.constant 0 : index
    %c0_42 = arith.constant 0 : index
    %c13 = arith.constant 13 : index
    %43 = vector.load %arg1[%c0_41, %c0_42, %c13] : memref<1x16x38xbf16, #tpu.memory_space<vmem>>, vector<1x16x24xbf16>
    %44 = vector.shape_cast %43 : vector<1x16x24xbf16> to vector<16x24xbf16>
    %cst_43 = arith.constant dense<0.000000e+00> : vector<16x24xf32>
    %45 = tpu.matmul %42, %44, %cst_43 {dimension_numbers = #tpu.dot_dimension_numbers<[1], [0], [0], [1], [0, 0, 1, 1], [], []>} : vector<16x16xbf16>, vector<16x24xbf16>, vector<16x24xf32> -> vector<16x24xf32>
    %46 = arith.addf %40, %45 : vector<16x24xf32>
    %c8_44 = arith.constant 8 : index
    %c0_45 = arith.constant 0 : index
    %c0_46 = arith.constant 0 : index
    %47 = vector.load %arg2[%c8_44, %c0_45, %c0_46] : memref<9x16x16xbf16, #tpu.memory_space<vmem>>, vector<1x16x16xbf16>
    %48 = vector.shape_cast %47 : vector<1x16x16xbf16> to vector<16x16xbf16>
    %c0_47 = arith.constant 0 : index
    %c0_48 = arith.constant 0 : index
    %c14 = arith.constant 14 : index
    %49 = vector.load %arg1[%c0_47, %c0_48, %c14] : memref<1x16x38xbf16, #tpu.memory_space<vmem>>, vector<1x16x24xbf16>
    %50 = vector.shape_cast %49 : vector<1x16x24xbf16> to vector<16x24xbf16>
    %cst_49 = arith.constant dense<0.000000e+00> : vector<16x24xf32>
    %51 = tpu.matmul %48, %50, %cst_49 {dimension_numbers = #tpu.dot_dimension_numbers<[1], [0], [0], [1], [0, 0, 1, 1], [], []>} : vector<16x16xbf16>, vector<16x24xbf16>, vector<16x24xf32> -> vector<16x24xf32>
    %52 = arith.addf %46, %51 : vector<16x24xf32>
    %c0_50 = arith.constant 0 : index
    %c0_51 = arith.constant 0 : index
    %53 = vector.load %arg3[%c0_50, %c0_51] : memref<16x1xf32, #tpu.memory_space<vmem>>, vector<16x1xf32>
    %54 = vector.broadcast %53 : vector<16x1xf32> to vector<16x24xf32>
    %55 = arith.addf %52, %54 : vector<16x24xf32>
    %cst_52 = arith.constant 0.000000e+00 : f32
    %56 = vector.broadcast %cst_52 : f32 to vector<16x24xf32>
    %57 = arith.maximumf %55, %56 : vector<16x24xf32>
    %58 = arith.truncf %57 : vector<16x24xf32> to vector<16x24xbf16>
    %c0_53 = arith.constant 0 : index
    %c0_54 = arith.constant 0 : index
    %c0_55 = arith.constant 0 : index
    %59 = vector.load %arg4[%c0_53, %c0_54, %c0_55] : memref<1x16x24xbf16, #tpu.memory_space<vmem>>, vector<1x16x24xbf16>
    %60 = vector.shape_cast %59 : vector<1x16x24xbf16> to vector<16x24xbf16>
    %61 = vector.shape_cast %58 : vector<16x24xbf16> to vector<1x16x24xbf16>
    tpu.vector_store %arg4[%c0_53, %c0_54, %c0_55], %61 {strides = array<i32>} : memref<1x16x24xbf16, #tpu.memory_space<vmem>>, vector<1x16x24xbf16>,
    return
  }
  func.func @transform_0(%arg0: i32) -> (i32, i32, i32) {
    %c0_i32 = arith.constant 0 : i32
    %c0_i32_0 = arith.constant 0 : i32
    %c0_i32_1 = arith.constant 0 : i32
    return %arg0, %c0_i32, %c0_i32_0 : i32, i32, i32
  }
  func.func @transform_1(%arg0: i32) -> (i32, i32, i32) {
    %c0_i32 = arith.constant 0 : i32
    %c0_i32_0 = arith.constant 0 : i32
    %c0_i32_1 = arith.constant 0 : i32
    %c0_i32_2 = arith.constant 0 : i32
    return %c0_i32, %c0_i32_0, %c0_i32_1 : i32, i32, i32
  }
  func.func @transform_2(%arg0: i32) -> (i32, i32) {
    %c0_i32 = arith.constant 0 : i32
    %c0_i32_0 = arith.constant 0 : i32
    %c0_i32_1 = arith.constant 0 : i32
    return %c0_i32, %c0_i32_0 : i32, i32
  }
  func.func @transform_3(%arg0: i32) -> (i32, i32, i32) {
    %c0_i32 = arith.constant 0 : i32
    %c0_i32_0 = arith.constant 0 : i32
    %c0_i32_1 = arith.constant 0 : i32
    return %arg0, %c0_i32, %c0_i32_0 : i32, i32, i32
  }
}

module attributes {stable_mosaic.version = 11 : i64} {
  func.func @_gemm_conv_kernel(%arg0: i32, %arg1: memref<1x16x16xbf16, #tpu.memory_space<vmem>>, %arg2: memref<1x32x16xbf16, #tpu.memory_space<vmem>>, %arg3: memref<32x1xf32, #tpu.memory_space<vmem>>, %arg4: memref<1x32x16xbf16, #tpu.memory_space<vmem>>) attributes {dimension_semantics = [#tpu.dimension_semantics<parallel>], iteration_bounds = array<i64: 2>, scalar_prefetch = 0 : i64, scratch_operands = 0 : i64, tpu.core_type = #tpu.core_type<tc>, window_params = [{transform_indices = @transform_0, window_bounds = array<i64: 1, 16, 16>}, {pipeline_mode = #tpu.pipeline_mode<synchronous>, transform_indices = @transform_1, window_bounds = array<i64: 1, 32, 16>}, {pipeline_mode = #tpu.pipeline_mode<synchronous>, transform_indices = @transform_2, window_bounds = array<i64: 32, 1>}, {transform_indices = @transform_3, window_bounds = array<i64: 1, 32, 16>}]} {
    %c0 = arith.constant 0 : index
    %c0_0 = arith.constant 0 : index
    %c0_1 = arith.constant 0 : index
    %0 = vector.load %arg2[%c0, %c0_0, %c0_1] : memref<1x32x16xbf16, #tpu.memory_space<vmem>>, vector<1x32x16xbf16>
    %1 = vector.shape_cast %0 : vector<1x32x16xbf16> to vector<32x16xbf16>
    %c0_2 = arith.constant 0 : index
    %c0_3 = arith.constant 0 : index
    %c0_4 = arith.constant 0 : index
    %2 = vector.load %arg1[%c0_2, %c0_3, %c0_4] : memref<1x16x16xbf16, #tpu.memory_space<vmem>>, vector<1x16x16xbf16>
    %3 = vector.shape_cast %2 : vector<1x16x16xbf16> to vector<16x16xbf16>
    %cst = arith.constant dense<0.000000e+00> : vector<32x16xf32>
    %4 = tpu.matmul %1, %3, %cst {dimension_numbers = #tpu.dot_dimension_numbers<[1], [0], [0], [1], [0, 0, 1, 1], [], []>} : vector<32x16xbf16>, vector<16x16xbf16>, vector<32x16xf32> -> vector<32x16xf32>
    %c0_5 = arith.constant 0 : index
    %c0_6 = arith.constant 0 : index
    %5 = vector.load %arg3[%c0_5, %c0_6] : memref<32x1xf32, #tpu.memory_space<vmem>>, vector<32x1xf32>
    %6 = vector.broadcast %5 : vector<32x1xf32> to vector<32x16xf32>
    %7 = arith.addf %4, %6 : vector<32x16xf32>
    %8 = arith.truncf %7 : vector<32x16xf32> to vector<32x16xbf16>
    %c0_7 = arith.constant 0 : index
    %c0_8 = arith.constant 0 : index
    %c0_9 = arith.constant 0 : index
    %9 = vector.load %arg4[%c0_7, %c0_8, %c0_9] : memref<1x32x16xbf16, #tpu.memory_space<vmem>>, vector<1x32x16xbf16>
    %10 = vector.shape_cast %9 : vector<1x32x16xbf16> to vector<32x16xbf16>
    %11 = vector.shape_cast %8 : vector<32x16xbf16> to vector<1x32x16xbf16>
    tpu.vector_store %arg4[%c0_7, %c0_8, %c0_9], %11 {strides = array<i32>} : memref<1x32x16xbf16, #tpu.memory_space<vmem>>, vector<1x32x16xbf16>,
    return
  }
  func.func @transform_0(%arg0: i32) -> (i32, i32, i32) {
    %c0_i32 = arith.constant 0 : i32
    %c0_i32_0 = arith.constant 0 : i32
    %c0_i32_1 = arith.constant 0 : i32
    return %arg0, %c0_i32, %c0_i32_0 : i32, i32, i32
  }
  func.func @transform_1(%arg0: i32) -> (i32, i32, i32) {
    %c0_i32 = arith.constant 0 : i32
    %c0_i32_0 = arith.constant 0 : i32
    %c0_i32_1 = arith.constant 0 : i32
    %c0_i32_2 = arith.constant 0 : i32
    return %c0_i32, %c0_i32_0, %c0_i32_1 : i32, i32, i32
  }
  func.func @transform_2(%arg0: i32) -> (i32, i32) {
    %c0_i32 = arith.constant 0 : i32
    %c0_i32_0 = arith.constant 0 : i32
    %c0_i32_1 = arith.constant 0 : i32
    return %c0_i32, %c0_i32_0 : i32, i32
  }
  func.func @transform_3(%arg0: i32) -> (i32, i32, i32) {
    %c0_i32 = arith.constant 0 : i32
    %c0_i32_0 = arith.constant 0 : i32
    %c0_i32_1 = arith.constant 0 : i32
    return %arg0, %c0_i32, %c0_i32_0 : i32, i32, i32
  }
}

module attributes {stable_mosaic.version = 11 : i64} {
  func.func @_gemm_conv_kernel(%arg0: i32, %arg1: memref<1x8x102xbf16, #tpu.memory_space<vmem>>, %arg2: memref<1x8x102xbf16, #tpu.memory_space<vmem>>, %arg3: memref<9x8x8xbf16, #tpu.memory_space<vmem>>, %arg4: memref<9x8x8xbf16, #tpu.memory_space<vmem>>, %arg5: memref<8x1xf32, #tpu.memory_space<vmem>>, %arg6: memref<1x8x80xbf16, #tpu.memory_space<vmem>>) attributes {dimension_semantics = [#tpu.dimension_semantics<parallel>], iteration_bounds = array<i64: 2>, scalar_prefetch = 0 : i64, scratch_operands = 0 : i64, tpu.core_type = #tpu.core_type<tc>, window_params = [{transform_indices = @transform_0, window_bounds = array<i64: 1, 8, 102>}, {transform_indices = @transform_1, window_bounds = array<i64: 1, 8, 102>}, {pipeline_mode = #tpu.pipeline_mode<synchronous>, transform_indices = @transform_2, window_bounds = array<i64: 9, 8, 8>}, {pipeline_mode = #tpu.pipeline_mode<synchronous>, transform_indices = @transform_3, window_bounds = array<i64: 9, 8, 8>}, {pipeline_mode = #tpu.pipeline_mode<synchronous>, transform_indices = @transform_4, window_bounds = array<i64: 8, 1>}, {transform_indices = @transform_5, window_bounds = array<i64: 1, 8, 80>}]} {
    %c0 = arith.constant 0 : index
    %c0_0 = arith.constant 0 : index
    %c0_1 = arith.constant 0 : index
    %0 = vector.load %arg3[%c0, %c0_0, %c0_1] : memref<9x8x8xbf16, #tpu.memory_space<vmem>>, vector<1x8x8xbf16>
    %1 = vector.shape_cast %0 : vector<1x8x8xbf16> to vector<8x8xbf16>
    %c0_2 = arith.constant 0 : index
    %c0_3 = arith.constant 0 : index
    %c0_4 = arith.constant 0 : index
    %2 = vector.load %arg1[%c0_2, %c0_3, %c0_4] : memref<1x8x102xbf16, #tpu.memory_space<vmem>>, vector<1x8x80xbf16>
    %3 = vector.shape_cast %2 : vector<1x8x80xbf16> to vector<8x80xbf16>
    %cst = arith.constant dense<0.000000e+00> : vector<8x80xf32>
    %4 = tpu.matmul %1, %3, %cst {dimension_numbers = #tpu.dot_dimension_numbers<[1], [0], [0], [1], [0, 0, 1, 1], [], []>} : vector<8x8xbf16>, vector<8x80xbf16>, vector<8x80xf32> -> vector<8x80xf32>
    %c1 = arith.constant 1 : index
    %c0_5 = arith.constant 0 : index
    %c0_6 = arith.constant 0 : index
    %5 = vector.load %arg3[%c1, %c0_5, %c0_6] : memref<9x8x8xbf16, #tpu.memory_space<vmem>>, vector<1x8x8xbf16>
    %6 = vector.shape_cast %5 : vector<1x8x8xbf16> to vector<8x8xbf16>
    %c0_7 = arith.constant 0 : index
    %c0_8 = arith.constant 0 : index
    %c1_9 = arith.constant 1 : index
    %7 = vector.load %arg1[%c0_7, %c0_8, %c1_9] : memref<1x8x102xbf16, #tpu.memory_space<vmem>>, vector<1x8x80xbf16>
    %8 = vector.shape_cast %7 : vector<1x8x80xbf16> to vector<8x80xbf16>
    %cst_10 = arith.constant dense<0.000000e+00> : vector<8x80xf32>
    %9 = tpu.matmul %6, %8, %cst_10 {dimension_numbers = #tpu.dot_dimension_numbers<[1], [0], [0], [1], [0, 0, 1, 1], [], []>} : vector<8x8xbf16>, vector<8x80xbf16>, vector<8x80xf32> -> vector<8x80xf32>
    %10 = arith.addf %4, %9 : vector<8x80xf32>
    %c2 = arith.constant 2 : index
    %c0_11 = arith.constant 0 : index
    %c0_12 = arith.constant 0 : index
    %11 = vector.load %arg3[%c2, %c0_11, %c0_12] : memref<9x8x8xbf16, #tpu.memory_space<vmem>>, vector<1x8x8xbf16>
    %12 = vector.shape_cast %11 : vector<1x8x8xbf16> to vector<8x8xbf16>
    %c0_13 = arith.constant 0 : index
    %c0_14 = arith.constant 0 : index
    %c2_15 = arith.constant 2 : index
    %13 = vector.load %arg1[%c0_13, %c0_14, %c2_15] : memref<1x8x102xbf16, #tpu.memory_space<vmem>>, vector<1x8x80xbf16>
    %14 = vector.shape_cast %13 : vector<1x8x80xbf16> to vector<8x80xbf16>
    %cst_16 = arith.constant dense<0.000000e+00> : vector<8x80xf32>
    %15 = tpu.matmul %12, %14, %cst_16 {dimension_numbers = #tpu.dot_dimension_numbers<[1], [0], [0], [1], [0, 0, 1, 1], [], []>} : vector<8x8xbf16>, vector<8x80xbf16>, vector<8x80xf32> -> vector<8x80xf32>
    %16 = arith.addf %10, %15 : vector<8x80xf32>
    %c3 = arith.constant 3 : index
    %c0_17 = arith.constant 0 : index
    %c0_18 = arith.constant 0 : index
    %17 = vector.load %arg3[%c3, %c0_17, %c0_18] : memref<9x8x8xbf16, #tpu.memory_space<vmem>>, vector<1x8x8xbf16>
    %18 = vector.shape_cast %17 : vector<1x8x8xbf16> to vector<8x8xbf16>
    %c0_19 = arith.constant 0 : index
    %c0_20 = arith.constant 0 : index
    %c10 = arith.constant 10 : index
    %19 = vector.load %arg1[%c0_19, %c0_20, %c10] : memref<1x8x102xbf16, #tpu.memory_space<vmem>>, vector<1x8x80xbf16>
    %20 = vector.shape_cast %19 : vector<1x8x80xbf16> to vector<8x80xbf16>
    %cst_21 = arith.constant dense<0.000000e+00> : vector<8x80xf32>
    %21 = tpu.matmul %18, %20, %cst_21 {dimension_numbers = #tpu.dot_dimension_numbers<[1], [0], [0], [1], [0, 0, 1, 1], [], []>} : vector<8x8xbf16>, vector<8x80xbf16>, vector<8x80xf32> -> vector<8x80xf32>
    %22 = arith.addf %16, %21 : vector<8x80xf32>
    %c4 = arith.constant 4 : index
    %c0_22 = arith.constant 0 : index
    %c0_23 = arith.constant 0 : index
    %23 = vector.load %arg3[%c4, %c0_22, %c0_23] : memref<9x8x8xbf16, #tpu.memory_space<vmem>>, vector<1x8x8xbf16>
    %24 = vector.shape_cast %23 : vector<1x8x8xbf16> to vector<8x8xbf16>
    %c0_24 = arith.constant 0 : index
    %c0_25 = arith.constant 0 : index
    %c11 = arith.constant 11 : index
    %25 = vector.load %arg1[%c0_24, %c0_25, %c11] : memref<1x8x102xbf16, #tpu.memory_space<vmem>>, vector<1x8x80xbf16>
    %26 = vector.shape_cast %25 : vector<1x8x80xbf16> to vector<8x80xbf16>
    %cst_26 = arith.constant dense<0.000000e+00> : vector<8x80xf32>
    %27 = tpu.matmul %24, %26, %cst_26 {dimension_numbers = #tpu.dot_dimension_numbers<[1], [0], [0], [1], [0, 0, 1, 1], [], []>} : vector<8x8xbf16>, vector<8x80xbf16>, vector<8x80xf32> -> vector<8x80xf32>
    %28 = arith.addf %22, %27 : vector<8x80xf32>
    %c5 = arith.constant 5 : index
    %c0_27 = arith.constant 0 : index
    %c0_28 = arith.constant 0 : index
    %29 = vector.load %arg3[%c5, %c0_27, %c0_28] : memref<9x8x8xbf16, #tpu.memory_space<vmem>>, vector<1x8x8xbf16>
    %30 = vector.shape_cast %29 : vector<1x8x8xbf16> to vector<8x8xbf16>
    %c0_29 = arith.constant 0 : index
    %c0_30 = arith.constant 0 : index
    %c12 = arith.constant 12 : index
    %31 = vector.load %arg1[%c0_29, %c0_30, %c12] : memref<1x8x102xbf16, #tpu.memory_space<vmem>>, vector<1x8x80xbf16>
    %32 = vector.shape_cast %31 : vector<1x8x80xbf16> to vector<8x80xbf16>
    %cst_31 = arith.constant dense<0.000000e+00> : vector<8x80xf32>
    %33 = tpu.matmul %30, %32, %cst_31 {dimension_numbers = #tpu.dot_dimension_numbers<[1], [0], [0], [1], [0, 0, 1, 1], [], []>} : vector<8x8xbf16>, vector<8x80xbf16>, vector<8x80xf32> -> vector<8x80xf32>
    %34 = arith.addf %28, %33 : vector<8x80xf32>
    %c6 = arith.constant 6 : index
    %c0_32 = arith.constant 0 : index
    %c0_33 = arith.constant 0 : index
    %35 = vector.load %arg3[%c6, %c0_32, %c0_33] : memref<9x8x8xbf16, #tpu.memory_space<vmem>>, vector<1x8x8xbf16>
    %36 = vector.shape_cast %35 : vector<1x8x8xbf16> to vector<8x8xbf16>
    %c0_34 = arith.constant 0 : index
    %c0_35 = arith.constant 0 : index
    %c20 = arith.constant 20 : index
    %37 = vector.load %arg1[%c0_34, %c0_35, %c20] : memref<1x8x102xbf16, #tpu.memory_space<vmem>>, vector<1x8x80xbf16>
    %38 = vector.shape_cast %37 : vector<1x8x80xbf16> to vector<8x80xbf16>
    %cst_36 = arith.constant dense<0.000000e+00> : vector<8x80xf32>
    %39 = tpu.matmul %36, %38, %cst_36 {dimension_numbers = #tpu.dot_dimension_numbers<[1], [0], [0], [1], [0, 0, 1, 1], [], []>} : vector<8x8xbf16>, vector<8x80xbf16>, vector<8x80xf32> -> vector<8x80xf32>
    %40 = arith.addf %34, %39 : vector<8x80xf32>
    %c7 = arith.constant 7 : index
    %c0_37 = arith.constant 0 : index
    %c0_38 = arith.constant 0 : index
    %41 = vector.load %arg3[%c7, %c0_37, %c0_38] : memref<9x8x8xbf16, #tpu.memory_space<vmem>>, vector<1x8x8xbf16>
    %42 = vector.shape_cast %41 : vector<1x8x8xbf16> to vector<8x8xbf16>
    %c0_39 = arith.constant 0 : index
    %c0_40 = arith.constant 0 : index
    %c21 = arith.constant 21 : index
    %43 = vector.load %arg1[%c0_39, %c0_40, %c21] : memref<1x8x102xbf16, #tpu.memory_space<vmem>>, vector<1x8x80xbf16>
    %44 = vector.shape_cast %43 : vector<1x8x80xbf16> to vector<8x80xbf16>
    %cst_41 = arith.constant dense<0.000000e+00> : vector<8x80xf32>
    %45 = tpu.matmul %42, %44, %cst_41 {dimension_numbers = #tpu.dot_dimension_numbers<[1], [0], [0], [1], [0, 0, 1, 1], [], []>} : vector<8x8xbf16>, vector<8x80xbf16>, vector<8x80xf32> -> vector<8x80xf32>
    %46 = arith.addf %40, %45 : vector<8x80xf32>
    %c8 = arith.constant 8 : index
    %c0_42 = arith.constant 0 : index
    %c0_43 = arith.constant 0 : index
    %47 = vector.load %arg3[%c8, %c0_42, %c0_43] : memref<9x8x8xbf16, #tpu.memory_space<vmem>>, vector<1x8x8xbf16>
    %48 = vector.shape_cast %47 : vector<1x8x8xbf16> to vector<8x8xbf16>
    %c0_44 = arith.constant 0 : index
    %c0_45 = arith.constant 0 : index
    %c22 = arith.constant 22 : index
    %49 = vector.load %arg1[%c0_44, %c0_45, %c22] : memref<1x8x102xbf16, #tpu.memory_space<vmem>>, vector<1x8x80xbf16>
    %50 = vector.shape_cast %49 : vector<1x8x80xbf16> to vector<8x80xbf16>
    %cst_46 = arith.constant dense<0.000000e+00> : vector<8x80xf32>
    %51 = tpu.matmul %48, %50, %cst_46 {dimension_numbers = #tpu.dot_dimension_numbers<[1], [0], [0], [1], [0, 0, 1, 1], [], []>} : vector<8x8xbf16>, vector<8x80xbf16>, vector<8x80xf32> -> vector<8x80xf32>
    %52 = arith.addf %46, %51 : vector<8x80xf32>
    %c0_47 = arith.constant 0 : index
    %c0_48 = arith.constant 0 : index
    %c0_49 = arith.constant 0 : index
    %53 = vector.load %arg4[%c0_47, %c0_48, %c0_49] : memref<9x8x8xbf16, #tpu.memory_space<vmem>>, vector<1x8x8xbf16>
    %54 = vector.shape_cast %53 : vector<1x8x8xbf16> to vector<8x8xbf16>
    %c0_50 = arith.constant 0 : index
    %c0_51 = arith.constant 0 : index
    %c0_52 = arith.constant 0 : index
    %55 = vector.load %arg2[%c0_50, %c0_51, %c0_52] : memref<1x8x102xbf16, #tpu.memory_space<vmem>>, vector<1x8x80xbf16>
    %56 = vector.shape_cast %55 : vector<1x8x80xbf16> to vector<8x80xbf16>
    %cst_53 = arith.constant dense<0.000000e+00> : vector<8x80xf32>
    %57 = tpu.matmul %54, %56, %cst_53 {dimension_numbers = #tpu.dot_dimension_numbers<[1], [0], [0], [1], [0, 0, 1, 1], [], []>} : vector<8x8xbf16>, vector<8x80xbf16>, vector<8x80xf32> -> vector<8x80xf32>
    %58 = arith.addf %52, %57 : vector<8x80xf32>
    %c1_54 = arith.constant 1 : index
    %c0_55 = arith.constant 0 : index
    %c0_56 = arith.constant 0 : index
    %59 = vector.load %arg4[%c1_54, %c0_55, %c0_56] : memref<9x8x8xbf16, #tpu.memory_space<vmem>>, vector<1x8x8xbf16>
    %60 = vector.shape_cast %59 : vector<1x8x8xbf16> to vector<8x8xbf16>
    %c0_57 = arith.constant 0 : index
    %c0_58 = arith.constant 0 : index
    %c1_59 = arith.constant 1 : index
    %61 = vector.load %arg2[%c0_57, %c0_58, %c1_59] : memref<1x8x102xbf16, #tpu.memory_space<vmem>>, vector<1x8x80xbf16>
    %62 = vector.shape_cast %61 : vector<1x8x80xbf16> to vector<8x80xbf16>
    %cst_60 = arith.constant dense<0.000000e+00> : vector<8x80xf32>
    %63 = tpu.matmul %60, %62, %cst_60 {dimension_numbers = #tpu.dot_dimension_numbers<[1], [0], [0], [1], [0, 0, 1, 1], [], []>} : vector<8x8xbf16>, vector<8x80xbf16>, vector<8x80xf32> -> vector<8x80xf32>
    %64 = arith.addf %58, %63 : vector<8x80xf32>
    %c2_61 = arith.constant 2 : index
    %c0_62 = arith.constant 0 : index
    %c0_63 = arith.constant 0 : index
    %65 = vector.load %arg4[%c2_61, %c0_62, %c0_63] : memref<9x8x8xbf16, #tpu.memory_space<vmem>>, vector<1x8x8xbf16>
    %66 = vector.shape_cast %65 : vector<1x8x8xbf16> to vector<8x8xbf16>
    %c0_64 = arith.constant 0 : index
    %c0_65 = arith.constant 0 : index
    %c2_66 = arith.constant 2 : index
    %67 = vector.load %arg2[%c0_64, %c0_65, %c2_66] : memref<1x8x102xbf16, #tpu.memory_space<vmem>>, vector<1x8x80xbf16>
    %68 = vector.shape_cast %67 : vector<1x8x80xbf16> to vector<8x80xbf16>
    %cst_67 = arith.constant dense<0.000000e+00> : vector<8x80xf32>
    %69 = tpu.matmul %66, %68, %cst_67 {dimension_numbers = #tpu.dot_dimension_numbers<[1], [0], [0], [1], [0, 0, 1, 1], [], []>} : vector<8x8xbf16>, vector<8x80xbf16>, vector<8x80xf32> -> vector<8x80xf32>
    %70 = arith.addf %64, %69 : vector<8x80xf32>
    %c3_68 = arith.constant 3 : index
    %c0_69 = arith.constant 0 : index
    %c0_70 = arith.constant 0 : index
    %71 = vector.load %arg4[%c3_68, %c0_69, %c0_70] : memref<9x8x8xbf16, #tpu.memory_space<vmem>>, vector<1x8x8xbf16>
    %72 = vector.shape_cast %71 : vector<1x8x8xbf16> to vector<8x8xbf16>
    %c0_71 = arith.constant 0 : index
    %c0_72 = arith.constant 0 : index
    %c10_73 = arith.constant 10 : index
    %73 = vector.load %arg2[%c0_71, %c0_72, %c10_73] : memref<1x8x102xbf16, #tpu.memory_space<vmem>>, vector<1x8x80xbf16>
    %74 = vector.shape_cast %73 : vector<1x8x80xbf16> to vector<8x80xbf16>
    %cst_74 = arith.constant dense<0.000000e+00> : vector<8x80xf32>
    %75 = tpu.matmul %72, %74, %cst_74 {dimension_numbers = #tpu.dot_dimension_numbers<[1], [0], [0], [1], [0, 0, 1, 1], [], []>} : vector<8x8xbf16>, vector<8x80xbf16>, vector<8x80xf32> -> vector<8x80xf32>
    %76 = arith.addf %70, %75 : vector<8x80xf32>
    %c4_75 = arith.constant 4 : index
    %c0_76 = arith.constant 0 : index
    %c0_77 = arith.constant 0 : index
    %77 = vector.load %arg4[%c4_75, %c0_76, %c0_77] : memref<9x8x8xbf16, #tpu.memory_space<vmem>>, vector<1x8x8xbf16>
    %78 = vector.shape_cast %77 : vector<1x8x8xbf16> to vector<8x8xbf16>
    %c0_78 = arith.constant 0 : index
    %c0_79 = arith.constant 0 : index
    %c11_80 = arith.constant 11 : index
    %79 = vector.load %arg2[%c0_78, %c0_79, %c11_80] : memref<1x8x102xbf16, #tpu.memory_space<vmem>>, vector<1x8x80xbf16>
    %80 = vector.shape_cast %79 : vector<1x8x80xbf16> to vector<8x80xbf16>
    %cst_81 = arith.constant dense<0.000000e+00> : vector<8x80xf32>
    %81 = tpu.matmul %78, %80, %cst_81 {dimension_numbers = #tpu.dot_dimension_numbers<[1], [0], [0], [1], [0, 0, 1, 1], [], []>} : vector<8x8xbf16>, vector<8x80xbf16>, vector<8x80xf32> -> vector<8x80xf32>
    %82 = arith.addf %76, %81 : vector<8x80xf32>
    %c5_82 = arith.constant 5 : index
    %c0_83 = arith.constant 0 : index
    %c0_84 = arith.constant 0 : index
    %83 = vector.load %arg4[%c5_82, %c0_83, %c0_84] : memref<9x8x8xbf16, #tpu.memory_space<vmem>>, vector<1x8x8xbf16>
    %84 = vector.shape_cast %83 : vector<1x8x8xbf16> to vector<8x8xbf16>
    %c0_85 = arith.constant 0 : index
    %c0_86 = arith.constant 0 : index
    %c12_87 = arith.constant 12 : index
    %85 = vector.load %arg2[%c0_85, %c0_86, %c12_87] : memref<1x8x102xbf16, #tpu.memory_space<vmem>>, vector<1x8x80xbf16>
    %86 = vector.shape_cast %85 : vector<1x8x80xbf16> to vector<8x80xbf16>
    %cst_88 = arith.constant dense<0.000000e+00> : vector<8x80xf32>
    %87 = tpu.matmul %84, %86, %cst_88 {dimension_numbers = #tpu.dot_dimension_numbers<[1], [0], [0], [1], [0, 0, 1, 1], [], []>} : vector<8x8xbf16>, vector<8x80xbf16>, vector<8x80xf32> -> vector<8x80xf32>
    %88 = arith.addf %82, %87 : vector<8x80xf32>
    %c6_89 = arith.constant 6 : index
    %c0_90 = arith.constant 0 : index
    %c0_91 = arith.constant 0 : index
    %89 = vector.load %arg4[%c6_89, %c0_90, %c0_91] : memref<9x8x8xbf16, #tpu.memory_space<vmem>>, vector<1x8x8xbf16>
    %90 = vector.shape_cast %89 : vector<1x8x8xbf16> to vector<8x8xbf16>
    %c0_92 = arith.constant 0 : index
    %c0_93 = arith.constant 0 : index
    %c20_94 = arith.constant 20 : index
    %91 = vector.load %arg2[%c0_92, %c0_93, %c20_94] : memref<1x8x102xbf16, #tpu.memory_space<vmem>>, vector<1x8x80xbf16>
    %92 = vector.shape_cast %91 : vector<1x8x80xbf16> to vector<8x80xbf16>
    %cst_95 = arith.constant dense<0.000000e+00> : vector<8x80xf32>
    %93 = tpu.matmul %90, %92, %cst_95 {dimension_numbers = #tpu.dot_dimension_numbers<[1], [0], [0], [1], [0, 0, 1, 1], [], []>} : vector<8x8xbf16>, vector<8x80xbf16>, vector<8x80xf32> -> vector<8x80xf32>
    %94 = arith.addf %88, %93 : vector<8x80xf32>
    %c7_96 = arith.constant 7 : index
    %c0_97 = arith.constant 0 : index
    %c0_98 = arith.constant 0 : index
    %95 = vector.load %arg4[%c7_96, %c0_97, %c0_98] : memref<9x8x8xbf16, #tpu.memory_space<vmem>>, vector<1x8x8xbf16>
    %96 = vector.shape_cast %95 : vector<1x8x8xbf16> to vector<8x8xbf16>
    %c0_99 = arith.constant 0 : index
    %c0_100 = arith.constant 0 : index
    %c21_101 = arith.constant 21 : index
    %97 = vector.load %arg2[%c0_99, %c0_100, %c21_101] : memref<1x8x102xbf16, #tpu.memory_space<vmem>>, vector<1x8x80xbf16>
    %98 = vector.shape_cast %97 : vector<1x8x80xbf16> to vector<8x80xbf16>
    %cst_102 = arith.constant dense<0.000000e+00> : vector<8x80xf32>
    %99 = tpu.matmul %96, %98, %cst_102 {dimension_numbers = #tpu.dot_dimension_numbers<[1], [0], [0], [1], [0, 0, 1, 1], [], []>} : vector<8x8xbf16>, vector<8x80xbf16>, vector<8x80xf32> -> vector<8x80xf32>
    %100 = arith.addf %94, %99 : vector<8x80xf32>
    %c8_103 = arith.constant 8 : index
    %c0_104 = arith.constant 0 : index
    %c0_105 = arith.constant 0 : index
    %101 = vector.load %arg4[%c8_103, %c0_104, %c0_105] : memref<9x8x8xbf16, #tpu.memory_space<vmem>>, vector<1x8x8xbf16>
    %102 = vector.shape_cast %101 : vector<1x8x8xbf16> to vector<8x8xbf16>
    %c0_106 = arith.constant 0 : index
    %c0_107 = arith.constant 0 : index
    %c22_108 = arith.constant 22 : index
    %103 = vector.load %arg2[%c0_106, %c0_107, %c22_108] : memref<1x8x102xbf16, #tpu.memory_space<vmem>>, vector<1x8x80xbf16>
    %104 = vector.shape_cast %103 : vector<1x8x80xbf16> to vector<8x80xbf16>
    %cst_109 = arith.constant dense<0.000000e+00> : vector<8x80xf32>
    %105 = tpu.matmul %102, %104, %cst_109 {dimension_numbers = #tpu.dot_dimension_numbers<[1], [0], [0], [1], [0, 0, 1, 1], [], []>} : vector<8x8xbf16>, vector<8x80xbf16>, vector<8x80xf32> -> vector<8x80xf32>
    %106 = arith.addf %100, %105 : vector<8x80xf32>
    %c0_110 = arith.constant 0 : index
    %c0_111 = arith.constant 0 : index
    %107 = vector.load %arg5[%c0_110, %c0_111] : memref<8x1xf32, #tpu.memory_space<vmem>>, vector<8x1xf32>
    %108 = vector.broadcast %107 : vector<8x1xf32> to vector<8x80xf32>
    %109 = arith.addf %106, %108 : vector<8x80xf32>
    %cst_112 = arith.constant 0.000000e+00 : f32
    %110 = vector.broadcast %cst_112 : f32 to vector<8x80xf32>
    %111 = arith.maximumf %109, %110 : vector<8x80xf32>
    %112 = arith.truncf %111 : vector<8x80xf32> to vector<8x80xbf16>
    %c0_113 = arith.constant 0 : index
    %c0_114 = arith.constant 0 : index
    %c0_115 = arith.constant 0 : index
    %113 = vector.load %arg6[%c0_113, %c0_114, %c0_115] : memref<1x8x80xbf16, #tpu.memory_space<vmem>>, vector<1x8x80xbf16>
    %114 = vector.shape_cast %113 : vector<1x8x80xbf16> to vector<8x80xbf16>
    %115 = vector.shape_cast %112 : vector<8x80xbf16> to vector<1x8x80xbf16>
    tpu.vector_store %arg6[%c0_113, %c0_114, %c0_115], %115 {strides = array<i32>} : memref<1x8x80xbf16, #tpu.memory_space<vmem>>, vector<1x8x80xbf16>,
    return
  }
  func.func @transform_0(%arg0: i32) -> (i32, i32, i32) {
    %c0_i32 = arith.constant 0 : i32
    %c0_i32_0 = arith.constant 0 : i32
    %c0_i32_1 = arith.constant 0 : i32
    return %arg0, %c0_i32, %c0_i32_0 : i32, i32, i32
  }
  func.func @transform_1(%arg0: i32) -> (i32, i32, i32) {
    %c0_i32 = arith.constant 0 : i32
    %c0_i32_0 = arith.constant 0 : i32
    %c0_i32_1 = arith.constant 0 : i32
    return %arg0, %c0_i32, %c0_i32_0 : i32, i32, i32
  }
  func.func @transform_2(%arg0: i32) -> (i32, i32, i32) {
    %c0_i32 = arith.constant 0 : i32
    %c0_i32_0 = arith.constant 0 : i32
    %c0_i32_1 = arith.constant 0 : i32
    %c0_i32_2 = arith.constant 0 : i32
    return %c0_i32, %c0_i32_0, %c0_i32_1 : i32, i32, i32
  }
  func.func @transform_3(%arg0: i32) -> (i32, i32, i32) {
    %c0_i32 = arith.constant 0 : i32
    %c0_i32_0 = arith.constant 0 : i32
    %c0_i32_1 = arith.constant 0 : i32
    %c0_i32_2 = arith.constant 0 : i32
    return %c0_i32, %c0_i32_0, %c0_i32_1 : i32, i32, i32
  }
  func.func @transform_4(%arg0: i32) -> (i32, i32) {
    %c0_i32 = arith.constant 0 : i32
    %c0_i32_0 = arith.constant 0 : i32
    %c0_i32_1 = arith.constant 0 : i32
    return %c0_i32, %c0_i32_0 : i32, i32
  }
  func.func @transform_5(%arg0: i32) -> (i32, i32, i32) {
    %c0_i32 = arith.constant 0 : i32
    %c0_i32_0 = arith.constant 0 : i32
    %c0_i32_1 = arith.constant 0 : i32
    return %arg0, %c0_i32, %c0_i32_0 : i32, i32, i32
  }
}

module attributes {stable_mosaic.version = 11 : i64} {
  func.func @_gemm_conv_kernel(%arg0: i32, %arg1: memref<1x8x64xbf16, #tpu.memory_space<vmem>>, %arg2: memref<1x16x8xbf16, #tpu.memory_space<vmem>>, %arg3: memref<16x1xf32, #tpu.memory_space<vmem>>, %arg4: memref<1x16x64xbf16, #tpu.memory_space<vmem>>) attributes {dimension_semantics = [#tpu.dimension_semantics<parallel>], iteration_bounds = array<i64: 2>, scalar_prefetch = 0 : i64, scratch_operands = 0 : i64, tpu.core_type = #tpu.core_type<tc>, window_params = [{transform_indices = @transform_0, window_bounds = array<i64: 1, 8, 64>}, {pipeline_mode = #tpu.pipeline_mode<synchronous>, transform_indices = @transform_1, window_bounds = array<i64: 1, 16, 8>}, {pipeline_mode = #tpu.pipeline_mode<synchronous>, transform_indices = @transform_2, window_bounds = array<i64: 16, 1>}, {transform_indices = @transform_3, window_bounds = array<i64: 1, 16, 64>}]} {
    %c0 = arith.constant 0 : index
    %c0_0 = arith.constant 0 : index
    %c0_1 = arith.constant 0 : index
    %0 = vector.load %arg2[%c0, %c0_0, %c0_1] : memref<1x16x8xbf16, #tpu.memory_space<vmem>>, vector<1x16x8xbf16>
    %1 = vector.shape_cast %0 : vector<1x16x8xbf16> to vector<16x8xbf16>
    %c0_2 = arith.constant 0 : index
    %c0_3 = arith.constant 0 : index
    %c0_4 = arith.constant 0 : index
    %2 = vector.load %arg1[%c0_2, %c0_3, %c0_4] : memref<1x8x64xbf16, #tpu.memory_space<vmem>>, vector<1x8x64xbf16>
    %3 = vector.shape_cast %2 : vector<1x8x64xbf16> to vector<8x64xbf16>
    %cst = arith.constant dense<0.000000e+00> : vector<16x64xf32>
    %4 = tpu.matmul %1, %3, %cst {dimension_numbers = #tpu.dot_dimension_numbers<[1], [0], [0], [1], [0, 0, 1, 1], [], []>} : vector<16x8xbf16>, vector<8x64xbf16>, vector<16x64xf32> -> vector<16x64xf32>
    %c0_5 = arith.constant 0 : index
    %c0_6 = arith.constant 0 : index
    %5 = vector.load %arg3[%c0_5, %c0_6] : memref<16x1xf32, #tpu.memory_space<vmem>>, vector<16x1xf32>
    %6 = vector.broadcast %5 : vector<16x1xf32> to vector<16x64xf32>
    %7 = arith.addf %4, %6 : vector<16x64xf32>
    %8 = arith.truncf %7 : vector<16x64xf32> to vector<16x64xbf16>
    %c0_7 = arith.constant 0 : index
    %c0_8 = arith.constant 0 : index
    %c0_9 = arith.constant 0 : index
    %9 = vector.load %arg4[%c0_7, %c0_8, %c0_9] : memref<1x16x64xbf16, #tpu.memory_space<vmem>>, vector<1x16x64xbf16>
    %10 = vector.shape_cast %9 : vector<1x16x64xbf16> to vector<16x64xbf16>
    %11 = vector.shape_cast %8 : vector<16x64xbf16> to vector<1x16x64xbf16>
    tpu.vector_store %arg4[%c0_7, %c0_8, %c0_9], %11 {strides = array<i32>} : memref<1x16x64xbf16, #tpu.memory_space<vmem>>, vector<1x16x64xbf16>,
    return
  }
  func.func @transform_0(%arg0: i32) -> (i32, i32, i32) {
    %c0_i32 = arith.constant 0 : i32
    %c0_i32_0 = arith.constant 0 : i32
    %c0_i32_1 = arith.constant 0 : i32
    return %arg0, %c0_i32, %c0_i32_0 : i32, i32, i32
  }
  func.func @transform_1(%arg0: i32) -> (i32, i32, i32) {
    %c0_i32 = arith.constant 0 : i32
    %c0_i32_0 = arith.constant 0 : i32
    %c0_i32_1 = arith.constant 0 : i32
    %c0_i32_2 = arith.constant 0 : i32
    return %c0_i32, %c0_i32_0, %c0_i32_1 : i32, i32, i32
  }
  func.func @transform_2(%arg0: i32) -> (i32, i32) {
    %c0_i32 = arith.constant 0 : i32
    %c0_i32_0 = arith.constant 0 : i32
    %c0_i32_1 = arith.constant 0 : i32
    return %c0_i32, %c0_i32_0 : i32, i32
  }
  func.func @transform_3(%arg0: i32) -> (i32, i32, i32) {
    %c0_i32 = arith.constant 0 : i32
    %c0_i32_0 = arith.constant 0 : i32
    %c0_i32_1 = arith.constant 0 : i32
    return %arg0, %c0_i32, %c0_i32_0 : i32, i32, i32
  }
}

module attributes {stable_mosaic.version = 11 : i64} {
  func.func @_gemm_conv_kernel(%arg0: i32, %arg1: memref<1x4x326xbf16, #tpu.memory_space<vmem>>, %arg2: memref<1x4x326xbf16, #tpu.memory_space<vmem>>, %arg3: memref<9x4x4xbf16, #tpu.memory_space<vmem>>, %arg4: memref<9x4x4xbf16, #tpu.memory_space<vmem>>, %arg5: memref<4x1xf32, #tpu.memory_space<vmem>>, %arg6: memref<1x4x288xbf16, #tpu.memory_space<vmem>>) attributes {dimension_semantics = [#tpu.dimension_semantics<parallel>], iteration_bounds = array<i64: 2>, scalar_prefetch = 0 : i64, scratch_operands = 0 : i64, tpu.core_type = #tpu.core_type<tc>, window_params = [{transform_indices = @transform_0, window_bounds = array<i64: 1, 4, 326>}, {transform_indices = @transform_1, window_bounds = array<i64: 1, 4, 326>}, {pipeline_mode = #tpu.pipeline_mode<synchronous>, transform_indices = @transform_2, window_bounds = array<i64: 9, 4, 4>}, {pipeline_mode = #tpu.pipeline_mode<synchronous>, transform_indices = @transform_3, window_bounds = array<i64: 9, 4, 4>}, {pipeline_mode = #tpu.pipeline_mode<synchronous>, transform_indices = @transform_4, window_bounds = array<i64: 4, 1>}, {transform_indices = @transform_5, window_bounds = array<i64: 1, 4, 288>}]} {
    %c0 = arith.constant 0 : index
    %c0_0 = arith.constant 0 : index
    %c0_1 = arith.constant 0 : index
    %0 = vector.load %arg3[%c0, %c0_0, %c0_1] : memref<9x4x4xbf16, #tpu.memory_space<vmem>>, vector<1x4x4xbf16>
    %1 = vector.shape_cast %0 : vector<1x4x4xbf16> to vector<4x4xbf16>
    %c0_2 = arith.constant 0 : index
    %c0_3 = arith.constant 0 : index
    %c0_4 = arith.constant 0 : index
    %2 = vector.load %arg1[%c0_2, %c0_3, %c0_4] : memref<1x4x326xbf16, #tpu.memory_space<vmem>>, vector<1x4x288xbf16>
    %3 = vector.shape_cast %2 : vector<1x4x288xbf16> to vector<4x288xbf16>
    %cst = arith.constant dense<0.000000e+00> : vector<4x288xf32>
    %4 = tpu.matmul %1, %3, %cst {dimension_numbers = #tpu.dot_dimension_numbers<[1], [0], [0], [1], [0, 0, 1, 1], [], []>} : vector<4x4xbf16>, vector<4x288xbf16>, vector<4x288xf32> -> vector<4x288xf32>
    %c1 = arith.constant 1 : index
    %c0_5 = arith.constant 0 : index
    %c0_6 = arith.constant 0 : index
    %5 = vector.load %arg3[%c1, %c0_5, %c0_6] : memref<9x4x4xbf16, #tpu.memory_space<vmem>>, vector<1x4x4xbf16>
    %6 = vector.shape_cast %5 : vector<1x4x4xbf16> to vector<4x4xbf16>
    %c0_7 = arith.constant 0 : index
    %c0_8 = arith.constant 0 : index
    %c1_9 = arith.constant 1 : index
    %7 = vector.load %arg1[%c0_7, %c0_8, %c1_9] : memref<1x4x326xbf16, #tpu.memory_space<vmem>>, vector<1x4x288xbf16>
    %8 = vector.shape_cast %7 : vector<1x4x288xbf16> to vector<4x288xbf16>
    %cst_10 = arith.constant dense<0.000000e+00> : vector<4x288xf32>
    %9 = tpu.matmul %6, %8, %cst_10 {dimension_numbers = #tpu.dot_dimension_numbers<[1], [0], [0], [1], [0, 0, 1, 1], [], []>} : vector<4x4xbf16>, vector<4x288xbf16>, vector<4x288xf32> -> vector<4x288xf32>
    %10 = arith.addf %4, %9 : vector<4x288xf32>
    %c2 = arith.constant 2 : index
    %c0_11 = arith.constant 0 : index
    %c0_12 = arith.constant 0 : index
    %11 = vector.load %arg3[%c2, %c0_11, %c0_12] : memref<9x4x4xbf16, #tpu.memory_space<vmem>>, vector<1x4x4xbf16>
    %12 = vector.shape_cast %11 : vector<1x4x4xbf16> to vector<4x4xbf16>
    %c0_13 = arith.constant 0 : index
    %c0_14 = arith.constant 0 : index
    %c2_15 = arith.constant 2 : index
    %13 = vector.load %arg1[%c0_13, %c0_14, %c2_15] : memref<1x4x326xbf16, #tpu.memory_space<vmem>>, vector<1x4x288xbf16>
    %14 = vector.shape_cast %13 : vector<1x4x288xbf16> to vector<4x288xbf16>
    %cst_16 = arith.constant dense<0.000000e+00> : vector<4x288xf32>
    %15 = tpu.matmul %12, %14, %cst_16 {dimension_numbers = #tpu.dot_dimension_numbers<[1], [0], [0], [1], [0, 0, 1, 1], [], []>} : vector<4x4xbf16>, vector<4x288xbf16>, vector<4x288xf32> -> vector<4x288xf32>
    %16 = arith.addf %10, %15 : vector<4x288xf32>
    %c3 = arith.constant 3 : index
    %c0_17 = arith.constant 0 : index
    %c0_18 = arith.constant 0 : index
    %17 = vector.load %arg3[%c3, %c0_17, %c0_18] : memref<9x4x4xbf16, #tpu.memory_space<vmem>>, vector<1x4x4xbf16>
    %18 = vector.shape_cast %17 : vector<1x4x4xbf16> to vector<4x4xbf16>
    %c0_19 = arith.constant 0 : index
    %c0_20 = arith.constant 0 : index
    %c18 = arith.constant 18 : index
    %19 = vector.load %arg1[%c0_19, %c0_20, %c18] : memref<1x4x326xbf16, #tpu.memory_space<vmem>>, vector<1x4x288xbf16>
    %20 = vector.shape_cast %19 : vector<1x4x288xbf16> to vector<4x288xbf16>
    %cst_21 = arith.constant dense<0.000000e+00> : vector<4x288xf32>
    %21 = tpu.matmul %18, %20, %cst_21 {dimension_numbers = #tpu.dot_dimension_numbers<[1], [0], [0], [1], [0, 0, 1, 1], [], []>} : vector<4x4xbf16>, vector<4x288xbf16>, vector<4x288xf32> -> vector<4x288xf32>
    %22 = arith.addf %16, %21 : vector<4x288xf32>
    %c4 = arith.constant 4 : index
    %c0_22 = arith.constant 0 : index
    %c0_23 = arith.constant 0 : index
    %23 = vector.load %arg3[%c4, %c0_22, %c0_23] : memref<9x4x4xbf16, #tpu.memory_space<vmem>>, vector<1x4x4xbf16>
    %24 = vector.shape_cast %23 : vector<1x4x4xbf16> to vector<4x4xbf16>
    %c0_24 = arith.constant 0 : index
    %c0_25 = arith.constant 0 : index
    %c19 = arith.constant 19 : index
    %25 = vector.load %arg1[%c0_24, %c0_25, %c19] : memref<1x4x326xbf16, #tpu.memory_space<vmem>>, vector<1x4x288xbf16>
    %26 = vector.shape_cast %25 : vector<1x4x288xbf16> to vector<4x288xbf16>
    %cst_26 = arith.constant dense<0.000000e+00> : vector<4x288xf32>
    %27 = tpu.matmul %24, %26, %cst_26 {dimension_numbers = #tpu.dot_dimension_numbers<[1], [0], [0], [1], [0, 0, 1, 1], [], []>} : vector<4x4xbf16>, vector<4x288xbf16>, vector<4x288xf32> -> vector<4x288xf32>
    %28 = arith.addf %22, %27 : vector<4x288xf32>
    %c5 = arith.constant 5 : index
    %c0_27 = arith.constant 0 : index
    %c0_28 = arith.constant 0 : index
    %29 = vector.load %arg3[%c5, %c0_27, %c0_28] : memref<9x4x4xbf16, #tpu.memory_space<vmem>>, vector<1x4x4xbf16>
    %30 = vector.shape_cast %29 : vector<1x4x4xbf16> to vector<4x4xbf16>
    %c0_29 = arith.constant 0 : index
    %c0_30 = arith.constant 0 : index
    %c20 = arith.constant 20 : index
    %31 = vector.load %arg1[%c0_29, %c0_30, %c20] : memref<1x4x326xbf16, #tpu.memory_space<vmem>>, vector<1x4x288xbf16>
    %32 = vector.shape_cast %31 : vector<1x4x288xbf16> to vector<4x288xbf16>
    %cst_31 = arith.constant dense<0.000000e+00> : vector<4x288xf32>
    %33 = tpu.matmul %30, %32, %cst_31 {dimension_numbers = #tpu.dot_dimension_numbers<[1], [0], [0], [1], [0, 0, 1, 1], [], []>} : vector<4x4xbf16>, vector<4x288xbf16>, vector<4x288xf32> -> vector<4x288xf32>
    %34 = arith.addf %28, %33 : vector<4x288xf32>
    %c6 = arith.constant 6 : index
    %c0_32 = arith.constant 0 : index
    %c0_33 = arith.constant 0 : index
    %35 = vector.load %arg3[%c6, %c0_32, %c0_33] : memref<9x4x4xbf16, #tpu.memory_space<vmem>>, vector<1x4x4xbf16>
    %36 = vector.shape_cast %35 : vector<1x4x4xbf16> to vector<4x4xbf16>
    %c0_34 = arith.constant 0 : index
    %c0_35 = arith.constant 0 : index
    %c36 = arith.constant 36 : index
    %37 = vector.load %arg1[%c0_34, %c0_35, %c36] : memref<1x4x326xbf16, #tpu.memory_space<vmem>>, vector<1x4x288xbf16>
    %38 = vector.shape_cast %37 : vector<1x4x288xbf16> to vector<4x288xbf16>
    %cst_36 = arith.constant dense<0.000000e+00> : vector<4x288xf32>
    %39 = tpu.matmul %36, %38, %cst_36 {dimension_numbers = #tpu.dot_dimension_numbers<[1], [0], [0], [1], [0, 0, 1, 1], [], []>} : vector<4x4xbf16>, vector<4x288xbf16>, vector<4x288xf32> -> vector<4x288xf32>
    %40 = arith.addf %34, %39 : vector<4x288xf32>
    %c7 = arith.constant 7 : index
    %c0_37 = arith.constant 0 : index
    %c0_38 = arith.constant 0 : index
    %41 = vector.load %arg3[%c7, %c0_37, %c0_38] : memref<9x4x4xbf16, #tpu.memory_space<vmem>>, vector<1x4x4xbf16>
    %42 = vector.shape_cast %41 : vector<1x4x4xbf16> to vector<4x4xbf16>
    %c0_39 = arith.constant 0 : index
    %c0_40 = arith.constant 0 : index
    %c37 = arith.constant 37 : index
    %43 = vector.load %arg1[%c0_39, %c0_40, %c37] : memref<1x4x326xbf16, #tpu.memory_space<vmem>>, vector<1x4x288xbf16>
    %44 = vector.shape_cast %43 : vector<1x4x288xbf16> to vector<4x288xbf16>
    %cst_41 = arith.constant dense<0.000000e+00> : vector<4x288xf32>
    %45 = tpu.matmul %42, %44, %cst_41 {dimension_numbers = #tpu.dot_dimension_numbers<[1], [0], [0], [1], [0, 0, 1, 1], [], []>} : vector<4x4xbf16>, vector<4x288xbf16>, vector<4x288xf32> -> vector<4x288xf32>
    %46 = arith.addf %40, %45 : vector<4x288xf32>
    %c8 = arith.constant 8 : index
    %c0_42 = arith.constant 0 : index
    %c0_43 = arith.constant 0 : index
    %47 = vector.load %arg3[%c8, %c0_42, %c0_43] : memref<9x4x4xbf16, #tpu.memory_space<vmem>>, vector<1x4x4xbf16>
    %48 = vector.shape_cast %47 : vector<1x4x4xbf16> to vector<4x4xbf16>
    %c0_44 = arith.constant 0 : index
    %c0_45 = arith.constant 0 : index
    %c38 = arith.constant 38 : index
    %49 = vector.load %arg1[%c0_44, %c0_45, %c38] : memref<1x4x326xbf16, #tpu.memory_space<vmem>>, vector<1x4x288xbf16>
    %50 = vector.shape_cast %49 : vector<1x4x288xbf16> to vector<4x288xbf16>
    %cst_46 = arith.constant dense<0.000000e+00> : vector<4x288xf32>
    %51 = tpu.matmul %48, %50, %cst_46 {dimension_numbers = #tpu.dot_dimension_numbers<[1], [0], [0], [1], [0, 0, 1, 1], [], []>} : vector<4x4xbf16>, vector<4x288xbf16>, vector<4x288xf32> -> vector<4x288xf32>
    %52 = arith.addf %46, %51 : vector<4x288xf32>
    %c0_47 = arith.constant 0 : index
    %c0_48 = arith.constant 0 : index
    %c0_49 = arith.constant 0 : index
    %53 = vector.load %arg4[%c0_47, %c0_48, %c0_49] : memref<9x4x4xbf16, #tpu.memory_space<vmem>>, vector<1x4x4xbf16>
    %54 = vector.shape_cast %53 : vector<1x4x4xbf16> to vector<4x4xbf16>
    %c0_50 = arith.constant 0 : index
    %c0_51 = arith.constant 0 : index
    %c0_52 = arith.constant 0 : index
    %55 = vector.load %arg2[%c0_50, %c0_51, %c0_52] : memref<1x4x326xbf16, #tpu.memory_space<vmem>>, vector<1x4x288xbf16>
    %56 = vector.shape_cast %55 : vector<1x4x288xbf16> to vector<4x288xbf16>
    %cst_53 = arith.constant dense<0.000000e+00> : vector<4x288xf32>
    %57 = tpu.matmul %54, %56, %cst_53 {dimension_numbers = #tpu.dot_dimension_numbers<[1], [0], [0], [1], [0, 0, 1, 1], [], []>} : vector<4x4xbf16>, vector<4x288xbf16>, vector<4x288xf32> -> vector<4x288xf32>
    %58 = arith.addf %52, %57 : vector<4x288xf32>
    %c1_54 = arith.constant 1 : index
    %c0_55 = arith.constant 0 : index
    %c0_56 = arith.constant 0 : index
    %59 = vector.load %arg4[%c1_54, %c0_55, %c0_56] : memref<9x4x4xbf16, #tpu.memory_space<vmem>>, vector<1x4x4xbf16>
    %60 = vector.shape_cast %59 : vector<1x4x4xbf16> to vector<4x4xbf16>
    %c0_57 = arith.constant 0 : index
    %c0_58 = arith.constant 0 : index
    %c1_59 = arith.constant 1 : index
    %61 = vector.load %arg2[%c0_57, %c0_58, %c1_59] : memref<1x4x326xbf16, #tpu.memory_space<vmem>>, vector<1x4x288xbf16>
    %62 = vector.shape_cast %61 : vector<1x4x288xbf16> to vector<4x288xbf16>
    %cst_60 = arith.constant dense<0.000000e+00> : vector<4x288xf32>
    %63 = tpu.matmul %60, %62, %cst_60 {dimension_numbers = #tpu.dot_dimension_numbers<[1], [0], [0], [1], [0, 0, 1, 1], [], []>} : vector<4x4xbf16>, vector<4x288xbf16>, vector<4x288xf32> -> vector<4x288xf32>
    %64 = arith.addf %58, %63 : vector<4x288xf32>
    %c2_61 = arith.constant 2 : index
    %c0_62 = arith.constant 0 : index
    %c0_63 = arith.constant 0 : index
    %65 = vector.load %arg4[%c2_61, %c0_62, %c0_63] : memref<9x4x4xbf16, #tpu.memory_space<vmem>>, vector<1x4x4xbf16>
    %66 = vector.shape_cast %65 : vector<1x4x4xbf16> to vector<4x4xbf16>
    %c0_64 = arith.constant 0 : index
    %c0_65 = arith.constant 0 : index
    %c2_66 = arith.constant 2 : index
    %67 = vector.load %arg2[%c0_64, %c0_65, %c2_66] : memref<1x4x326xbf16, #tpu.memory_space<vmem>>, vector<1x4x288xbf16>
    %68 = vector.shape_cast %67 : vector<1x4x288xbf16> to vector<4x288xbf16>
    %cst_67 = arith.constant dense<0.000000e+00> : vector<4x288xf32>
    %69 = tpu.matmul %66, %68, %cst_67 {dimension_numbers = #tpu.dot_dimension_numbers<[1], [0], [0], [1], [0, 0, 1, 1], [], []>} : vector<4x4xbf16>, vector<4x288xbf16>, vector<4x288xf32> -> vector<4x288xf32>
    %70 = arith.addf %64, %69 : vector<4x288xf32>
    %c3_68 = arith.constant 3 : index
    %c0_69 = arith.constant 0 : index
    %c0_70 = arith.constant 0 : index
    %71 = vector.load %arg4[%c3_68, %c0_69, %c0_70] : memref<9x4x4xbf16, #tpu.memory_space<vmem>>, vector<1x4x4xbf16>
    %72 = vector.shape_cast %71 : vector<1x4x4xbf16> to vector<4x4xbf16>
    %c0_71 = arith.constant 0 : index
    %c0_72 = arith.constant 0 : index
    %c18_73 = arith.constant 18 : index
    %73 = vector.load %arg2[%c0_71, %c0_72, %c18_73] : memref<1x4x326xbf16, #tpu.memory_space<vmem>>, vector<1x4x288xbf16>
    %74 = vector.shape_cast %73 : vector<1x4x288xbf16> to vector<4x288xbf16>
    %cst_74 = arith.constant dense<0.000000e+00> : vector<4x288xf32>
    %75 = tpu.matmul %72, %74, %cst_74 {dimension_numbers = #tpu.dot_dimension_numbers<[1], [0], [0], [1], [0, 0, 1, 1], [], []>} : vector<4x4xbf16>, vector<4x288xbf16>, vector<4x288xf32> -> vector<4x288xf32>
    %76 = arith.addf %70, %75 : vector<4x288xf32>
    %c4_75 = arith.constant 4 : index
    %c0_76 = arith.constant 0 : index
    %c0_77 = arith.constant 0 : index
    %77 = vector.load %arg4[%c4_75, %c0_76, %c0_77] : memref<9x4x4xbf16, #tpu.memory_space<vmem>>, vector<1x4x4xbf16>
    %78 = vector.shape_cast %77 : vector<1x4x4xbf16> to vector<4x4xbf16>
    %c0_78 = arith.constant 0 : index
    %c0_79 = arith.constant 0 : index
    %c19_80 = arith.constant 19 : index
    %79 = vector.load %arg2[%c0_78, %c0_79, %c19_80] : memref<1x4x326xbf16, #tpu.memory_space<vmem>>, vector<1x4x288xbf16>
    %80 = vector.shape_cast %79 : vector<1x4x288xbf16> to vector<4x288xbf16>
    %cst_81 = arith.constant dense<0.000000e+00> : vector<4x288xf32>
    %81 = tpu.matmul %78, %80, %cst_81 {dimension_numbers = #tpu.dot_dimension_numbers<[1], [0], [0], [1], [0, 0, 1, 1], [], []>} : vector<4x4xbf16>, vector<4x288xbf16>, vector<4x288xf32> -> vector<4x288xf32>
    %82 = arith.addf %76, %81 : vector<4x288xf32>
    %c5_82 = arith.constant 5 : index
    %c0_83 = arith.constant 0 : index
    %c0_84 = arith.constant 0 : index
    %83 = vector.load %arg4[%c5_82, %c0_83, %c0_84] : memref<9x4x4xbf16, #tpu.memory_space<vmem>>, vector<1x4x4xbf16>
    %84 = vector.shape_cast %83 : vector<1x4x4xbf16> to vector<4x4xbf16>
    %c0_85 = arith.constant 0 : index
    %c0_86 = arith.constant 0 : index
    %c20_87 = arith.constant 20 : index
    %85 = vector.load %arg2[%c0_85, %c0_86, %c20_87] : memref<1x4x326xbf16, #tpu.memory_space<vmem>>, vector<1x4x288xbf16>
    %86 = vector.shape_cast %85 : vector<1x4x288xbf16> to vector<4x288xbf16>
    %cst_88 = arith.constant dense<0.000000e+00> : vector<4x288xf32>
    %87 = tpu.matmul %84, %86, %cst_88 {dimension_numbers = #tpu.dot_dimension_numbers<[1], [0], [0], [1], [0, 0, 1, 1], [], []>} : vector<4x4xbf16>, vector<4x288xbf16>, vector<4x288xf32> -> vector<4x288xf32>
    %88 = arith.addf %82, %87 : vector<4x288xf32>
    %c6_89 = arith.constant 6 : index
    %c0_90 = arith.constant 0 : index
    %c0_91 = arith.constant 0 : index
    %89 = vector.load %arg4[%c6_89, %c0_90, %c0_91] : memref<9x4x4xbf16, #tpu.memory_space<vmem>>, vector<1x4x4xbf16>
    %90 = vector.shape_cast %89 : vector<1x4x4xbf16> to vector<4x4xbf16>
    %c0_92 = arith.constant 0 : index
    %c0_93 = arith.constant 0 : index
    %c36_94 = arith.constant 36 : index
    %91 = vector.load %arg2[%c0_92, %c0_93, %c36_94] : memref<1x4x326xbf16, #tpu.memory_space<vmem>>, vector<1x4x288xbf16>
    %92 = vector.shape_cast %91 : vector<1x4x288xbf16> to vector<4x288xbf16>
    %cst_95 = arith.constant dense<0.000000e+00> : vector<4x288xf32>
    %93 = tpu.matmul %90, %92, %cst_95 {dimension_numbers = #tpu.dot_dimension_numbers<[1], [0], [0], [1], [0, 0, 1, 1], [], []>} : vector<4x4xbf16>, vector<4x288xbf16>, vector<4x288xf32> -> vector<4x288xf32>
    %94 = arith.addf %88, %93 : vector<4x288xf32>
    %c7_96 = arith.constant 7 : index
    %c0_97 = arith.constant 0 : index
    %c0_98 = arith.constant 0 : index
    %95 = vector.load %arg4[%c7_96, %c0_97, %c0_98] : memref<9x4x4xbf16, #tpu.memory_space<vmem>>, vector<1x4x4xbf16>
    %96 = vector.shape_cast %95 : vector<1x4x4xbf16> to vector<4x4xbf16>
    %c0_99 = arith.constant 0 : index
    %c0_100 = arith.constant 0 : index
    %c37_101 = arith.constant 37 : index
    %97 = vector.load %arg2[%c0_99, %c0_100, %c37_101] : memref<1x4x326xbf16, #tpu.memory_space<vmem>>, vector<1x4x288xbf16>
    %98 = vector.shape_cast %97 : vector<1x4x288xbf16> to vector<4x288xbf16>
    %cst_102 = arith.constant dense<0.000000e+00> : vector<4x288xf32>
    %99 = tpu.matmul %96, %98, %cst_102 {dimension_numbers = #tpu.dot_dimension_numbers<[1], [0], [0], [1], [0, 0, 1, 1], [], []>} : vector<4x4xbf16>, vector<4x288xbf16>, vector<4x288xf32> -> vector<4x288xf32>
    %100 = arith.addf %94, %99 : vector<4x288xf32>
    %c8_103 = arith.constant 8 : index
    %c0_104 = arith.constant 0 : index
    %c0_105 = arith.constant 0 : index
    %101 = vector.load %arg4[%c8_103, %c0_104, %c0_105] : memref<9x4x4xbf16, #tpu.memory_space<vmem>>, vector<1x4x4xbf16>
    %102 = vector.shape_cast %101 : vector<1x4x4xbf16> to vector<4x4xbf16>
    %c0_106 = arith.constant 0 : index
    %c0_107 = arith.constant 0 : index
    %c38_108 = arith.constant 38 : index
    %103 = vector.load %arg2[%c0_106, %c0_107, %c38_108] : memref<1x4x326xbf16, #tpu.memory_space<vmem>>, vector<1x4x288xbf16>
    %104 = vector.shape_cast %103 : vector<1x4x288xbf16> to vector<4x288xbf16>
    %cst_109 = arith.constant dense<0.000000e+00> : vector<4x288xf32>
    %105 = tpu.matmul %102, %104, %cst_109 {dimension_numbers = #tpu.dot_dimension_numbers<[1], [0], [0], [1], [0, 0, 1, 1], [], []>} : vector<4x4xbf16>, vector<4x288xbf16>, vector<4x288xf32> -> vector<4x288xf32>
    %106 = arith.addf %100, %105 : vector<4x288xf32>
    %c0_110 = arith.constant 0 : index
    %c0_111 = arith.constant 0 : index
    %107 = vector.load %arg5[%c0_110, %c0_111] : memref<4x1xf32, #tpu.memory_space<vmem>>, vector<4x1xf32>
    %108 = vector.broadcast %107 : vector<4x1xf32> to vector<4x288xf32>
    %109 = arith.addf %106, %108 : vector<4x288xf32>
    %cst_112 = arith.constant 0.000000e+00 : f32
    %110 = vector.broadcast %cst_112 : f32 to vector<4x288xf32>
    %111 = arith.maximumf %109, %110 : vector<4x288xf32>
    %112 = arith.truncf %111 : vector<4x288xf32> to vector<4x288xbf16>
    %c0_113 = arith.constant 0 : index
    %c0_114 = arith.constant 0 : index
    %c0_115 = arith.constant 0 : index
    %113 = vector.load %arg6[%c0_113, %c0_114, %c0_115] : memref<1x4x288xbf16, #tpu.memory_space<vmem>>, vector<1x4x288xbf16>
    %114 = vector.shape_cast %113 : vector<1x4x288xbf16> to vector<4x288xbf16>
    %115 = vector.shape_cast %112 : vector<4x288xbf16> to vector<1x4x288xbf16>
    tpu.vector_store %arg6[%c0_113, %c0_114, %c0_115], %115 {strides = array<i32>} : memref<1x4x288xbf16, #tpu.memory_space<vmem>>, vector<1x4x288xbf16>,
    return
  }
  func.func @transform_0(%arg0: i32) -> (i32, i32, i32) {
    %c0_i32 = arith.constant 0 : i32
    %c0_i32_0 = arith.constant 0 : i32
    %c0_i32_1 = arith.constant 0 : i32
    return %arg0, %c0_i32, %c0_i32_0 : i32, i32, i32
  }
  func.func @transform_1(%arg0: i32) -> (i32, i32, i32) {
    %c0_i32 = arith.constant 0 : i32
    %c0_i32_0 = arith.constant 0 : i32
    %c0_i32_1 = arith.constant 0 : i32
    return %arg0, %c0_i32, %c0_i32_0 : i32, i32, i32
  }
  func.func @transform_2(%arg0: i32) -> (i32, i32, i32) {
    %c0_i32 = arith.constant 0 : i32
    %c0_i32_0 = arith.constant 0 : i32
    %c0_i32_1 = arith.constant 0 : i32
    %c0_i32_2 = arith.constant 0 : i32
    return %c0_i32, %c0_i32_0, %c0_i32_1 : i32, i32, i32
  }
  func.func @transform_3(%arg0: i32) -> (i32, i32, i32) {
    %c0_i32 = arith.constant 0 : i32
    %c0_i32_0 = arith.constant 0 : i32
    %c0_i32_1 = arith.constant 0 : i32
    %c0_i32_2 = arith.constant 0 : i32
    return %c0_i32, %c0_i32_0, %c0_i32_1 : i32, i32, i32
  }
  func.func @transform_4(%arg0: i32) -> (i32, i32) {
    %c0_i32 = arith.constant 0 : i32
    %c0_i32_0 = arith.constant 0 : i32
    %c0_i32_1 = arith.constant 0 : i32
    return %c0_i32, %c0_i32_0 : i32, i32
  }
  func.func @transform_5(%arg0: i32) -> (i32, i32, i32) {
    %c0_i32 = arith.constant 0 : i32
    %c0_i32_0 = arith.constant 0 : i32
    %c0_i32_1 = arith.constant 0 : i32
    return %arg0, %c0_i32, %c0_i32_0 : i32, i32, i32
  }
}

module attributes {stable_mosaic.version = 11 : i64} {
  func.func @_gemm_conv_kernel(%arg0: i32, %arg1: memref<1x4x256xbf16, #tpu.memory_space<vmem>>, %arg2: memref<1x2x4xbf16, #tpu.memory_space<vmem>>, %arg3: memref<2x1xf32, #tpu.memory_space<vmem>>, %arg4: memref<1x2x256xf32, #tpu.memory_space<vmem>>) attributes {dimension_semantics = [#tpu.dimension_semantics<parallel>], iteration_bounds = array<i64: 2>, scalar_prefetch = 0 : i64, scratch_operands = 0 : i64, tpu.core_type = #tpu.core_type<tc>, window_params = [{transform_indices = @transform_0, window_bounds = array<i64: 1, 4, 256>}, {pipeline_mode = #tpu.pipeline_mode<synchronous>, transform_indices = @transform_1, window_bounds = array<i64: 1, 2, 4>}, {pipeline_mode = #tpu.pipeline_mode<synchronous>, transform_indices = @transform_2, window_bounds = array<i64: 2, 1>}, {transform_indices = @transform_3, window_bounds = array<i64: 1, 2, 256>}]} {
    %c0 = arith.constant 0 : index
    %c0_0 = arith.constant 0 : index
    %c0_1 = arith.constant 0 : index
    %0 = vector.load %arg2[%c0, %c0_0, %c0_1] : memref<1x2x4xbf16, #tpu.memory_space<vmem>>, vector<1x2x4xbf16>
    %1 = vector.shape_cast %0 : vector<1x2x4xbf16> to vector<2x4xbf16>
    %c0_2 = arith.constant 0 : index
    %c0_3 = arith.constant 0 : index
    %c0_4 = arith.constant 0 : index
    %2 = vector.load %arg1[%c0_2, %c0_3, %c0_4] : memref<1x4x256xbf16, #tpu.memory_space<vmem>>, vector<1x4x256xbf16>
    %3 = vector.shape_cast %2 : vector<1x4x256xbf16> to vector<4x256xbf16>
    %cst = arith.constant dense<0.000000e+00> : vector<2x256xf32>
    %4 = tpu.matmul %1, %3, %cst {dimension_numbers = #tpu.dot_dimension_numbers<[1], [0], [0], [1], [0, 0, 1, 1], [], []>} : vector<2x4xbf16>, vector<4x256xbf16>, vector<2x256xf32> -> vector<2x256xf32>
    %c0_5 = arith.constant 0 : index
    %c0_6 = arith.constant 0 : index
    %5 = vector.load %arg3[%c0_5, %c0_6] : memref<2x1xf32, #tpu.memory_space<vmem>>, vector<2x1xf32>
    %6 = vector.broadcast %5 : vector<2x1xf32> to vector<2x256xf32>
    %7 = arith.addf %4, %6 : vector<2x256xf32>
    %c0_7 = arith.constant 0 : index
    %c0_8 = arith.constant 0 : index
    %c0_9 = arith.constant 0 : index
    %8 = vector.load %arg4[%c0_7, %c0_8, %c0_9] : memref<1x2x256xf32, #tpu.memory_space<vmem>>, vector<1x2x256xf32>
    %9 = vector.shape_cast %8 : vector<1x2x256xf32> to vector<2x256xf32>
    %10 = vector.shape_cast %7 : vector<2x256xf32> to vector<1x2x256xf32>
    tpu.vector_store %arg4[%c0_7, %c0_8, %c0_9], %10 {strides = array<i32>} : memref<1x2x256xf32, #tpu.memory_space<vmem>>, vector<1x2x256xf32>,
    return
  }
  func.func @transform_0(%arg0: i32) -> (i32, i32, i32) {
    %c0_i32 = arith.constant 0 : i32
    %c0_i32_0 = arith.constant 0 : i32
    %c0_i32_1 = arith.constant 0 : i32
    return %arg0, %c0_i32, %c0_i32_0 : i32, i32, i32
  }
  func.func @transform_1(%arg0: i32) -> (i32, i32, i32) {
    %c0_i32 = arith.constant 0 : i32
    %c0_i32_0 = arith.constant 0 : i32
    %c0_i32_1 = arith.constant 0 : i32
    %c0_i32_2 = arith.constant 0 : i32
    return %c0_i32, %c0_i32_0, %c0_i32_1 : i32, i32, i32
  }
  func.func @transform_2(%arg0: i32) -> (i32, i32) {
    %c0_i32 = arith.constant 0 : i32
    %c0_i32_0 = arith.constant 0 : i32
    %c0_i32_1 = arith.constant 0 : i32
    return %c0_i32, %c0_i32_0 : i32, i32
  }
  func.func @transform_3(%arg0: i32) -> (i32, i32, i32) {
    %c0_i32 = arith.constant 0 : i32
    %c0_i32_0 = arith.constant 0 : i32
    %c0_i32_1 = arith.constant 0 : i32
    return %arg0, %c0_i32, %c0_i32_0 : i32, i32, i32
  }
}

</mosaic_0001>

<bundles_post_ra>
// kernel: unet_forward.13
= control target key start
LH: loop header
LB: loop body
LE: loop exit
PB: predicated region body
PF: predicated region fallthrough
CT: control target
= control target key end

     0   :  { %s654_s12 = smov 0   ;;  %s756_s0 = inlined_call_operand.vmem [shape: bf16[2,1,326], index: 0, kind: input, shape index: {}]   ;;  %s757_s1 = inlined_call_operand.vmem [shape: bf16[9,4,1], index: 1, kind: input, shape index: {}]   ;;  %s758_s2 = inlined_call_operand.vmem [shape: f32[4,1], index: 2, kind: input, shape index: {}]   ;;  %s759_s3 = inlined_call_operand.vmem [shape: bf16[2,4,288], index: 3, kind: output, shape index: {}]  }
   0x1 LB: > { %s518_s13 = sadd.s32 4294967295, %s622_s12   ;;  %p522_p0 = scmp.ge.s32.totalorder %s622_s12, 1  ;;  %s622_s12 = sphi %s654_s12, %s13_s12  }
   0x2   : > { %p136_p1 = scmp.lt.s32.totalorder %s622_s12, 3 }
   0x4   : > { %p137_p2 = pnand %p522_p0, %p136_p1 }
   0x5   : > { %p159_p3 = scmp.lt.s32.totalorder (!%p137_p2), %s518_s13, 1  ;;  %s625_s7 = smov (!%p137_p2), 126  }
   0x6   : > { %140 = sbr.rel (%p137_p2) target bundleno = 191 (0xbf), region = 32  ;;  %s626_s8 = smov (!%p137_p2), 110  }
   0x7   : > { %s627_s9 = smov (!%p137_p2), 127   ;;  %s628_s10 = smov (!%p137_p2), 108  }
   0x8   : > { %s629_s11 = smov (!%p137_p2), 109   ;;  %s630_s16 = smov (!%p137_p2), 91  }
   0x9   : > { %s631_s17 = smov (!%p137_p2), 92   ;;  %s632_s20 = smov (!%p137_p2), 90  }
   0xb   : > { %v168_v0 = vld [vmem:[%s757_s1] sm:$0x3]  ;;  %v524_v1 = vld [vmem:[%s757_s1 + $0x2] sm:$0x3]  ;;  %v624_v2 = vmov 0   ;;  %s761_s13 = smov (!%p159_p3, %s518_s13), 1 }
   0xc   : > { %554 = vset.pattern.permute.xlu0 %v624_v2  ;;  %v170_v3 = vunpack.c.l.bf16 %v168_v0  ;;  %v201_v4 = vunpack.c.l.bf16 %v524_v1  ;;  %560 = vset.pattern.permute.xlu1 %v624_v2  ;;  %v525_v5 = vld [vmem:[%s757_s1 + $0x4] sm:$0x3]  ;;  %v526_v6 = vld [vmem:[%s757_s1 + $0x6] sm:$0x3]  ;;  %v527_v9 = vld [vmem:[%s757_s1 + $0x8] sm:$0x3] }
   0xd   : > { %v229_v7 = vunpack.c.l.bf16 %v525_v5  ;;  %v256_v8 = vunpack.c.l.bf16 %v526_v6  ;;  %v528_v10 = vld [vmem:[%s757_s1 + $0xa] sm:$0x3]  ;;  %s534_s26 = smul.u32 3, %s761_s13  ;;  %v283_v13 = vunpack.c.l.bf16 %v527_v9  ;;  %vm194_vm0 = vcmask 1043456   ;;  %v529_v27 = vld [vmem:[%s757_s1 + $0xc] sm:$0x3] }
   0xe   : > { %v555_v11 = vpack.i.bf16 %v201_v4, %v170_v3  ;;  %v310_v14 = vunpack.c.l.bf16 %v528_v10  ;;  %v530_v28 = vld [vmem:[%s757_s1 + $0xe] sm:$0x3]  ;;  %v337_v29 = vunpack.c.l.bf16 %v529_v27  ;;  %v531_v32 = vld [vmem:[%s757_s1 + $0x10] sm:$0x3]  ;;  %v416_v34 = vld [vmem:[%s758_s2] sm:$0xf] }
   0xf   : > { %v561_v12 = vpack.i.bf16 %v256_v8, %v229_v7  ;;  %s162_s29 = scalar_lea.vmem %s756_s0, %s534_s26  ;;  %v364_v30 = vunpack.c.l.bf16 %v530_v28  ;;  %v391_v33 = vunpack.c.l.bf16 %v531_v32  ;;  %v633_v41 = vmov 839922192   ;;  %s535_s21 = smul.u32 6, %s761_s13 }
  0x10   : > { %556 = vperm.xlu0 %554, %v555_v11   ;;  %v169_v15 = vld [vmem:[%s162_s29] sm:$0x7]  ;;  %v566_v17 = vpack.i.bf16 %v310_v14, %v283_v13  ;;  %v178_v42 = vunpack.c.l.s4 %v633_v41  ;;  %vm273_vm1 = vcmask 900096   ;;  %vm300_vm2 = vcmask 891904  }
  0x11   : > { %562 = vperm.xlu1 %560, %v561_v12   ;;  %v171_v16 = vunpack.c.l.bf16 %v169_v15  ;;  %v576_v31 = vpack.i.bf16 %v364_v30, %v337_v29  ;;  %vm246_vm3 = vcmask 1031168   ;;  %vm219_vm4 = vcmask 1039360   ;;  %s167_s24 = scalar_lea.vmem %s759_s3, %s535_s21 }
  0x12   : > { %v709_v48 = vunpack.c.0.s8 %v178_v42  ;;  %vm327_vm5 = vcmask 883712   ;;  %vm354_vm6 = vcmask 752640   ;;  %vm408_vm7 = vcmask 736256  }
  0x13   : > { %v182_v18 = vperm.slane %v171_v16, 0  ;;  %v183_v19 = vperm.slane %v171_v16, 2  ;;  %v184_v20 = vperm.slane %v171_v16, 4  ;;  %vm381_vm8 = vcmask 744448  }
  0x14   : > { %vm448_vm9 = vcmask 1041408   ;;  %vm458_vm10 = vcmask 1043458   ;;  %vm460_vm12 = vcmask 259076   ;;  %vm452_vm13 = vcmask 1045508  }
  0x15   : > { %v188_v21 = vperm.slane %v182_v18, 0  ;;  %v189_v22 = vperm.slane %v183_v19, 0  ;;  %v686_v23 = vperm.slane %v184_v20, 0  ;;  %vm459_vm11 = vmor %vm458_vm10, %vm448_vm9 }
  0x16   : > { %vm461_vm14 = vmor %vm460_vm12, %vm459_vm11 }
  0x17   : > { %v193_v24 = vrot.slane %v189_v22, 4 }
  0x18   : > { %567 = vperm.xlu0 %554, %v566_v17  }
  0x19   : > { %v689_v25 = vsel %vm194_vm0, %v188_v21, %v193_v24 }
  0x1a   : > { %v581_v26 = vpack.i.bf16 %v686_v23, %v689_v25 }
  0x1c   : > { %582 = vrot.lane.b32.xlu1 %v581_v26, %s625_s7  ;;  %587 = vrot.lane.b32.xlu2 %v581_v26, %s626_s8 }
  0x20   : > { %572 = vrot.lane.b32.xlu0 %v581_v26, %s627_s9 }
  0x24   : > { %597 = vrot.lane.b32.xlu1 %v581_v26, %s628_s10  ;;  %592 = vrot.lane.b32.xlu2 %v581_v26, %s629_s11 }
  0x28   : > { %577 = vperm.xlu0 %554, %v576_v31  }
  0x2c   : > { %607 = vrot.lane.b32.xlu1 %v581_v26, %s630_s16  ;;  %602 = vrot.lane.b32.xlu2 %v581_v26, %s631_s17 }
  0x30   : > { %394 = vperm.xlu0 %554, %v391_v33  }
  0x34   : > { %419 = vperm.xlu1 %560, %v416_v34   ;;  %612 = vrot.lane.b32.xlu2 %v581_v26, %s632_s20 }
  0x76   : > { %v588_v35 = vpop.permute.xlu2 %587 }
  0x77   : > { %v590_v39 = vunpack.i.h.bf16 %v588_v35  ;;  %v589_v40 = vunpack.i.l.bf16 %v588_v35 }
  0x79   : > { %v271_v46 = vrot.slane %v590_v39, 4  ;;  %v270_v47 = vrot.slane %v589_v40, 4 }
  0x7b   : > { %v272_v56 = vsel %vm194_vm0, %v270_v47, %v271_v46 }
  0x7c   : > { %v274_v62 = vsel %vm273_vm1, %v589_v40, %v272_v56 }
  0x7e   : > { %v705_v37 = vpop.permute.xlu2 %592 }
  0x7f   : > { %v595_v43 = vunpack.i.h.bf16 %v705_v37  ;;  %v594_v44 = vunpack.i.l.bf16 %v705_v37 }
  0x81   : > { %v298_v50 = vrot.slane %v595_v43, 4  ;;  %v297_v51 = vrot.slane %v594_v44, 4 }
  0x82   : > { %v557_v36 = vpop.permute.xlu0 %556 }
  0x83   : > { %v563_v38 = vpop.permute.xlu1 %562  ;;  %v558_v49 = vunpack.i.l.bf16 %v557_v36  ;;  %v559_v53 = vunpack.i.h.bf16 %v557_v36  ;;  %v299_v59 = vsel %vm194_vm0, %v297_v51, %v298_v50 }
  0x84   : > { %v565_v54 = vunpack.i.h.bf16 %v563_v38  ;;  %v564_v55 = vunpack.i.l.bf16 %v563_v38  ;;  %v301_v7 = vsel %vm300_vm2, %v594_v44, %v299_v59 }
  0x85   : > { %v180_v58 = vperm.slane %v558_v49, %v709_v48  ;;  %v210_v63 = vperm.slane %v559_v53, %v709_v48 }
  0x86   : > { %v713_v52 = vpop.permute.xlu2 %602  ;;  %v265_v0 = vperm.slane %v565_v54, %v709_v48  ;;  %v238_v1 = vperm.slane %v564_v55, %v709_v48 }
  0x87   : > { %v605_v9 = vunpack.i.h.bf16 %v713_v52  ;;  %v604_v10 = vunpack.i.l.bf16 %v713_v52  ;;  %v198_v11 = vmul.f32 %v686_v23, %v180_v58  ;;  %v197_v15 = vmul.f32 %v689_v25, %v180_v58 }
  0x88   : > { %v277_v16 = vmul.f32 %v274_v62, %v265_v0  ;;  %v278_v19 = vmul.f32 %v590_v39, %v265_v0 }
  0x89   : > { %v352_v27 = vrot.slane %v605_v9, 4  ;;  %v351_v28 = vrot.slane %v604_v10, 4 }
  0x8a   : > { %v568_v45 = vpop.permute.xlu0 %567 }
  0x8b   : > { %v569_v3 = vunpack.i.l.bf16 %v568_v45  ;;  %v570_v17 = vunpack.i.h.bf16 %v568_v45  ;;  %v353_v46 = vsel %vm194_vm0, %v351_v28, %v352_v27 }
  0x8d   : > { %v292_v20 = vperm.slane %v569_v3, %v709_v48  ;;  %v319_v33 = vperm.slane %v570_v17, %v709_v48 }
  0x8e   : > { %v583_v57 = vpop.permute.xlu1 %582  ;;  %v613_v24 = vpop.permute.xlu2 %612 }
  0x8f   : > { %v585_v60 = vunpack.i.h.bf16 %v583_v57  ;;  %v584_v61 = vunpack.i.l.bf16 %v583_v57  ;;  %v615_v36 = vunpack.i.h.bf16 %v613_v24  ;;  %v614_v38 = vunpack.i.l.bf16 %v613_v24 }
  0x90   : > { %v305_v39 = vmul.f32 %v595_v43, %v292_v20  ;;  %v304_v57 = vmul.f32 %v301_v7, %v292_v20 }
  0x91   : > { %v244_v4 = vrot.slane %v585_v60, 4  ;;  %v243_v5 = vrot.slane %v584_v61, 4  ;;  %v251_v21 = vmul.f32 %v585_v60, %v238_v1  ;;  %v406_v55 = vrot.slane %v615_v36, 4 }
  0x92   : > { %v573_v2 = vpop.permute.xlu0 %572  ;;  %v405_v56 = vrot.slane %v614_v38, 4 }
  0x93   : > { %v575_v6 = vunpack.i.h.bf16 %v573_v2  ;;  %v574_v8 = vunpack.i.l.bf16 %v573_v2  ;;  %v245_v12 = vsel %vm194_vm0, %v243_v5, %v244_v4 }
  0x94   : > { %v247_v26 = vsel %vm246_vm3, %v584_v61, %v245_v12  ;;  %v355_v61 = vsel %vm354_vm6, %v604_v10, %v353_v46  ;;  %v407_v4 = vsel %vm194_vm0, %v405_v56, %v406_v55 }
  0x95   : > { %v217_v13 = vrot.slane %v575_v6, 4  ;;  %v224_v14 = vmul.f32 %v575_v6, %v210_v63  ;;  %v216_v18 = vrot.slane %v574_v8, 4  ;;  %v250_v44 = vmul.f32 %v247_v26, %v238_v1 }
  0x96   : > { %v598_v29 = vpop.permute.xlu1 %597 }
  0x97   : > { %v226_v22 = vadd.f32 %v224_v14, %v198_v11  ;;  %v218_v23 = vsel %vm194_vm0, %v216_v18, %v217_v13  ;;  %v600_v31 = vunpack.i.h.bf16 %v598_v29  ;;  %v599_v32 = vunpack.i.l.bf16 %v598_v29 }
  0x98   : > { %v220_v25 = vsel %vm219_vm4, %v574_v8, %v218_v23 }
  0x99   : > { %v253_v30 = vadd.f32 %v251_v21, %v226_v22  ;;  %v223_v34 = vmul.f32 %v220_v25, %v210_v63  ;;  %v325_v40 = vrot.slane %v600_v31, 4  ;;  %v324_v42 = vrot.slane %v599_v32, 4 }
  0x9a   : > { %v578_v35 = vpop.permute.xlu0 %577  ;;  %v332_v49 = vmul.f32 %v600_v31, %v319_v33 }
  0x9b   : > { %v280_v41 = vadd.f32 %v278_v19, %v253_v30  ;;  %v225_v45 = vadd.f32 %v223_v34, %v197_v15  ;;  %v579_v47 = vunpack.i.l.bf16 %v578_v35  ;;  %v326_v51 = vsel %vm194_vm0, %v324_v42, %v325_v40 }
  0x9c   : > { %v580_v52 = vunpack.i.h.bf16 %v578_v35  ;;  %v328_v37 = vsel %vm327_vm5, %v599_v32, %v326_v51 }
  0x9d   : > { %v307_v50 = vadd.f32 %v305_v39, %v280_v41  ;;  %v252_v53 = vadd.f32 %v250_v44, %v225_v45  ;;  %v346_v54 = vperm.slane %v579_v47, %v709_v48  ;;  %v331_v2 = vmul.f32 %v328_v37, %v319_v33 }
  0x9e   : > { %v608_v60 = vpop.permute.xlu1 %607  ;;  %v373_v62 = vperm.slane %v580_v52, %v709_v48 }
  0x9f   : > { %v334_v43 = vadd.f32 %v332_v49, %v307_v50  ;;  %v279_v58 = vadd.f32 %v277_v16, %v252_v53  ;;  %v359_v59 = vmul.f32 %v605_v9, %v346_v54  ;;  %v610_v63 = vunpack.i.h.bf16 %v608_v60 }
  0xa0   : > { %v609_v0 = vunpack.i.l.bf16 %v608_v60  ;;  %v358_v12 = vmul.f32 %v355_v61, %v346_v54  ;;  %v409_v16 = vsel %vm408_vm7, %v614_v38, %v407_v4 }
  0xa1   : > { %v306_v1 = vadd.f32 %v304_v57, %v279_v58  ;;  %v361_v3 = vadd.f32 %v359_v59, %v334_v43  ;;  %v379_v6 = vrot.slane %v610_v63, 4  ;;  %v386_v11 = vmul.f32 %v610_v63, %v373_v62 }
  0xa2   : > { %v395_v5 = vpop.permute.xlu0 %394  ;;  %v378_v8 = vrot.slane %v609_v0, 4 }
  0xa3   : > { %v400_v7 = vperm.slane %v395_v5, %v709_v48  ;;  %v333_v9 = vadd.f32 %v331_v2, %v306_v1  ;;  %v388_v10 = vadd.f32 %v386_v11, %v361_v3 }
  0xa4   : > { %v380_v13 = vsel %vm194_vm0, %v378_v8, %v379_v6 }
  0xa5   : > { %v413_v14 = vmul.f32 %v615_v36, %v400_v7  ;;  %v382_v15 = vsel %vm381_vm8, %v609_v0, %v380_v13  ;;  %v360_v17 = vadd.f32 %v358_v12, %v333_v9  ;;  %v412_v20 = vmul.f32 %v409_v16, %v400_v7 }
  0xa6   : > { %v385_v18 = vmul.f32 %v382_v15, %v373_v62  ;;  %v420_v19 = vpop.permute.xlu1 %419 }
  0xa7   : > { %v415_v22 = vadd.f32 %v413_v14, %v388_v10  ;;  %v424_v24 = vperm.slane %v420_v19, %v709_v48 }
  0xa8   : > { %v387_v21 = vadd.f32 %v385_v18, %v360_v17 }
  0xa9   : > { %v427_v23 = vadd.f32 %v424_v24, %v415_v22 }
  0xaa   : > { %v414_v26 = vadd.f32 %v412_v20, %v387_v21 }
  0xab   : > { %v429_v28 = vmax.f32 %v427_v23, 0.0 }
  0xac   : > { %v426_v27 = vadd.f32 %v424_v24, %v414_v26 }
  0xad   : > { %434 = vst [vmem:[#allocation1 + $0x10] ss:$2 sm:$0xff] %v429_v28 }
  0xae   : > { %v428_v29 = vmax.f32 %v426_v27, 0.0 }
  0xb0   : > { %432 = vst [vmem:[#allocation1] ss:$2 sm:$0xff] %v428_v29 }
  0xb4   : > { %v437_v30 = vld.sshfl [vmem:[#allocation1 + $0x10] sm:$0xff pattern:$0x75316420] }
  0xb5   : > { %v442_v25 = vpack.c.bf16 %v437_v30, %v437_v30 }
  0xb7   : > { %v435_v31 = vld.sshfl [vmem:[#allocation1] sm:$0xff pattern:$0x75316420]  ;;  %v436_v32 = vld.sshfl [vmem:[#allocation1 + $0x8] sm:$0xff pattern:$0x75316420] }
  0xb8   : > { %v441_v33 = vpack.c.bf16 %v436_v32, %v435_v31  ;;  %v446_v34 = vrot.slane %v442_v25, 4  ;;  %v447_v48 = vrot.slane %v442_v25, 6 }
  0xba   : > { %v445_v35 = vrot.slane %v441_v33, 2  ;;  %v455_v38 = vsel %vm452_vm13, %v446_v34, %v447_v48 }
  0xbc   : > { %v451_v36 = vsel %vm448_vm9, %v441_v33, %v445_v35 }
  0xbd   : > { %v456_v39 = vsel %vm194_vm0, %v451_v36, %v455_v38 }
  0xbe   : > { %462 = vst.msk [vmem:[%s167_s24] sm:$0x3f] %vm461_vm14, %v456_v39 }
  0xbf PF: > { %s13_s12 = sadd.s32 1, %s622_s12  }
  0xc0   : > { %p10_p4 = scmp.ge.s32.totalorder %s13_s12, 4  }
  0xc2   :  { %12 = sbr.rel (!%p10_p4) target bundleno = 1 (0x1), region = 71 }

// kernel: unet_forward.14
= control target key start
LH: loop header
LB: loop body
LE: loop exit
PB: predicated region body
PF: predicated region fallthrough
CT: control target
= control target key end

     0   :  { %s1005_s12 = smov 0   ;;  %s1138_s0 = inlined_call_operand.vmem [shape: bf16[2,4,326], index: 0, kind: input, shape index: {}]   ;;  %s1139_s1 = inlined_call_operand.vmem [shape: bf16[9,4,4], index: 1, kind: input, shape index: {}]   ;;  %s1140_s2 = inlined_call_operand.vmem [shape: f32[4,1], index: 2, kind: input, shape index: {}]   ;;  %s1141_s3 = inlined_call_operand.vmem [shape: bf16[2,4,288], index: 3, kind: output, shape index: {}]  }
   0x1 LB: > { %s905_s13 = sadd.s32 4294967295, %s974_s12   ;;  %p909_p0 = scmp.ge.s32.totalorder %s974_s12, 1  ;;  %s974_s12 = sphi %s1005_s12, %s13_s12  }
   0x2   : > { %p137_p1 = scmp.lt.s32.totalorder %s974_s12, 3 }
   0x4   : > { %p138_p2 = pnand %p909_p0, %p137_p1 }
   0x5   : > { %p161_p3 = scmp.lt.s32.totalorder (!%p138_p2), %s905_s13, 1  ;;  %s976_s18 = smov (!%p138_p2), 127  }
   0x6   : > { %141 = sbr.rel (%p138_p2) target bundleno = 387 (0x183), region = 32  ;;  %s977_s19 = smov (!%p138_p2), 126  }
   0x7   : > { %s978_s20 = smov (!%p138_p2), 110   ;;  %s979_s21 = smov (!%p138_p2), 109  }
   0x8   : > { %s980_s22 = smov (!%p138_p2), 108   ;;  %s981_s23 = smov (!%p138_p2), 92  }
   0x9   : > { %s982_s24 = smov (!%p138_p2), 91   ;;  %s983_s25 = smov (!%p138_p2), 90  }
   0xb   : > { %s1143_s13 = smov (!%p161_p3, %s905_s13), 1  ;;  %vm197_vm0 = vcmask 1041408   ;;  %v172_v36 = vld [vmem:[%s1139_s1] sm:$0x3]  ;;  %vm193_vm1 = vcmask 31744   ;;  %vm190_vm2 = vcmask 1039360  }
   0xc   : > { %s949_s14 = smul.u32 6, %s1143_s13  ;;  %v912_v44 = vld [vmem:[%s1139_s1 + $0x2] sm:$0x3]  ;;  %vm315_vm3 = vcmask 1031168   ;;  %v919_v48 = vld [vmem:[%s1139_s1 + $0x4] sm:$0x3] }
   0xd   : > { %vm389_vm4 = vcmask 900096   ;;  %vm463_vm5 = vcmask 891904   ;;  %vm537_vm6 = vcmask 883712   ;;  %vm611_vm7 = vcmask 752640  }
   0xe   : > { %s1021_s17 = scalar_lea.vmem %s1138_s0, %s949_s14  ;;  %vm685_vm8 = vcmask 744448   ;;  %vm759_vm9 = vcmask 736256   ;;  %vm845_vm10 = vcmask 1043458   ;;  %vm847_vm12 = vcmask 259076  }
   0xf   : > { %v173_v0 = vld [vmem:[%s1021_s17] sm:$0x3f]  ;;  %vm846_vm11 = vmor %vm845_vm10, %vm197_vm0  ;;  %vm838_vm13 = vcmask 1045508   ;;  %vm842_vm14 = vcmask 1043456  }
  0x10   : > { %177 = vst [vmem:[#allocation1] ss:$4 sm:$0xff] %v173_v0  ;;  %v300_v4 = vld [vmem:[%s1021_s17] sm:$0x3f]  ;;  %vm848_vm15 = vmor %vm847_vm12, %vm846_vm11 }
  0x11   : > { %v374_v8 = vld [vmem:[%s1021_s17] sm:$0x3f] }
  0x12   : > { %v448_v12 = vld [vmem:[%s1021_s17] sm:$0x3f] }
  0x13   : > { %v522_v16 = vld [vmem:[%s1021_s17] sm:$0x3f] }
  0x14   : > { %v596_v20 = vld [vmem:[%s1021_s17] sm:$0x3f] }
  0x15   : > { %v670_v24 = vld [vmem:[%s1021_s17] sm:$0x3f] }
  0x16   : > { %v744_v28 = vld [vmem:[%s1021_s17] sm:$0x3f] }
  0x17   : > { %v182_v1 = vld.sshfl [vmem:[#allocation1 + $0x10] sm:$0xff pattern:$0x73625140]  ;;  %v180_v2 = vld.sshfl [vmem:[#allocation1 + $0x8] sm:$0xff pattern:$0x73625140] }
  0x18   : > { %188 = vrot.lane.b32.xlu0 %v182_v1, %s976_s18  ;;  %186 = vrot.lane.b32.xlu1 %v180_v2, %s976_s18  ;;  %v178_v3 = vld.sshfl [vmem:[#allocation1] sm:$0xff pattern:$0x73625140] }
  0x19   : > { %246 = vst [vmem:[#allocation1] ss:$4 sm:$0xff] %v173_v0  ;;  %v923_v1 = vld [vmem:[%s1139_s1 + $0x6] sm:$0x3] }
  0x20   : > { %184 = vrot.lane.b32.xlu0 %v178_v3, %s976_s18  ;;  %v1025_v5 = vld.sshfl [vmem:[#allocation1] sm:$0xff pattern:$0x73625140]  ;;  %v1027_v6 = vld.sshfl [vmem:[#allocation1 + $0x8] sm:$0xff pattern:$0x73625140] }
  0x21   : > { %v1029_v7 = vld.sshfl [vmem:[#allocation1 + $0x10] sm:$0xff pattern:$0x73625140]  ;;  %v253_v35 = vsel %vm197_vm0, %v1025_v5, 0  ;;  %v255_v51 = vsel %vm197_vm0, %v1027_v6, 0 }
  0x22   : > { %302 = vst [vmem:[#allocation1] ss:$4 sm:$0xff] %v300_v4  ;;  %266 = vmatpush.bf16.msra.mxu3 %v253_v35  ;;  %v257_v42 = vsel %vm197_vm0, %v1029_v7, 0 }
  0x25   : > { %916 = vmatmul.msk.bf16.vlgmr.msra.gmra.mxu3 %vm193_vm1, %v172_v36 }
  0x29   : > { %v303_v9 = vld.sshfl [vmem:[#allocation1] sm:$0xff pattern:$0x73625140]  ;;  %v305_v10 = vld.sshfl [vmem:[#allocation1 + $0x8] sm:$0xff pattern:$0x73625140] }
  0x2a   : > { %309 = vrot.lane.b32.xlu1 %v303_v9, %s977_s19  ;;  %311 = vrot.lane.b32.xlu2 %v305_v10, %s977_s19  ;;  %v307_v11 = vld.sshfl [vmem:[#allocation1 + $0x10] sm:$0xff pattern:$0x73625140] }
  0x2b   : > { %376 = vst [vmem:[#allocation1] ss:$4 sm:$0xff] %v374_v8 }
  0x32   : > { %v381_v13 = vld.sshfl [vmem:[#allocation1 + $0x10] sm:$0xff pattern:$0x73625140]  ;;  %v377_v14 = vld.sshfl [vmem:[#allocation1] sm:$0xff pattern:$0x73625140]  ;;  %313 = vrot.lane.b32.xlu2 %v307_v11, %s977_s19 }
  0x33   : > { %387 = vrot.lane.b32.xlu1 %v381_v13, %s978_s20  ;;  %v379_v15 = vld.sshfl [vmem:[#allocation1 + $0x8] sm:$0xff pattern:$0x73625140] }
  0x34   : > { %385 = vrot.lane.b32.xlu0 %v379_v15, %s978_s20  ;;  %450 = vst [vmem:[#allocation1] ss:$4 sm:$0xff] %v448_v12  ;;  %v931_v15 = vld [vmem:[%s1139_s1 + $0xa] sm:$0x3] }
  0x3a   : > { %383 = vrot.lane.b32.xlu2 %v377_v14, %s978_s20 }
  0x3b   : > { %v455_v17 = vld.sshfl [vmem:[#allocation1 + $0x10] sm:$0xff pattern:$0x73625140]  ;;  %v453_v18 = vld.sshfl [vmem:[#allocation1 + $0x8] sm:$0xff pattern:$0x73625140] }
  0x3c   : > { %461 = vrot.lane.b32.xlu0 %v455_v17, %s979_s21  ;;  %v451_v19 = vld.sshfl [vmem:[#allocation1] sm:$0xff pattern:$0x73625140] }
  0x3d   : > { %457 = vrot.lane.b32.xlu1 %v451_v19, %s979_s21  ;;  %524 = vst [vmem:[#allocation1] ss:$4 sm:$0xff] %v522_v16  ;;  %v927_v16 = vld [vmem:[%s1139_s1 + $0x8] sm:$0x3] }
  0x42   : > { %459 = vrot.lane.b32.xlu2 %v453_v18, %s979_s21 }
  0x44   : > { %v527_v21 = vld.sshfl [vmem:[#allocation1 + $0x8] sm:$0xff pattern:$0x73625140]  ;;  %v525_v22 = vld.sshfl [vmem:[#allocation1] sm:$0xff pattern:$0x73625140] }
  0x45   : > { %533 = vrot.lane.b32.xlu1 %v527_v21, %s980_s22  ;;  %531 = vrot.lane.b32.xlu0 %v525_v22, %s980_s22  ;;  %v529_v23 = vld.sshfl [vmem:[#allocation1 + $0x10] sm:$0xff pattern:$0x73625140] }
  0x46   : > { %598 = vst [vmem:[#allocation1] ss:$4 sm:$0xff] %v596_v20 }
  0x4d   : > { %535 = vrot.lane.b32.xlu1 %v529_v23, %s980_s22  ;;  %v603_v25 = vld.sshfl [vmem:[#allocation1 + $0x10] sm:$0xff pattern:$0x73625140]  ;;  %v601_v26 = vld.sshfl [vmem:[#allocation1 + $0x8] sm:$0xff pattern:$0x73625140] }
  0x4e   : > { %607 = vrot.lane.b32.xlu0 %v601_v26, %s981_s23  ;;  %v599_v27 = vld.sshfl [vmem:[#allocation1] sm:$0xff pattern:$0x73625140] }
  0x4f   : > { %605 = vrot.lane.b32.xlu2 %v599_v27, %s981_s23  ;;  %672 = vst [vmem:[#allocation1] ss:$4 sm:$0xff] %v670_v24 }
  0x56   : > { %v673_v29 = vld.sshfl [vmem:[#allocation1] sm:$0xff pattern:$0x73625140]  ;;  %v677_v30 = vld.sshfl [vmem:[#allocation1 + $0x10] sm:$0xff pattern:$0x73625140] }
  0x57   : > { %683 = vrot.lane.b32.xlu1 %v677_v30, %s982_s24  ;;  %v675_v31 = vld.sshfl [vmem:[#allocation1 + $0x8] sm:$0xff pattern:$0x73625140]  ;;  %609 = vrot.lane.b32.xlu2 %v603_v25, %s981_s23 }
  0x58   : > { %681 = vrot.lane.b32.xlu0 %v675_v31, %s982_s24  ;;  %746 = vst [vmem:[#allocation1] ss:$4 sm:$0xff] %v744_v28 }
  0x5f   : > { %v751_v32 = vld.sshfl [vmem:[#allocation1 + $0x10] sm:$0xff pattern:$0x73625140]  ;;  %v747_v33 = vld.sshfl [vmem:[#allocation1] sm:$0xff pattern:$0x73625140]  ;;  %679 = vrot.lane.b32.xlu2 %v673_v29, %s982_s24  ;;  %s170_s24 = scalar_lea.vmem %s1141_s3, %s949_s14 }
  0x60   : > { %757 = vrot.lane.b32.xlu0 %v751_v32, %s983_s25  ;;  %753 = vrot.lane.b32.xlu1 %v747_v33, %s983_s25  ;;  %v749_v34 = vld.sshfl [vmem:[#allocation1 + $0x8] sm:$0xff pattern:$0x73625140] }
  0x67   : > { %755 = vrot.lane.b32.xlu2 %v749_v34, %s983_s25  ;;  %v935_v34 = vld [vmem:[%s1139_s1 + $0xc] sm:$0x3] }
  0x84   : > { %v312_v37 = vpop.permute.xlu2 %311 }
  0x8a   : > { %v189_v38 = vpop.permute.xlu0 %188  ;;  %v187_v39 = vpop.permute.xlu1 %186 }
  0x8b   : > { %v192_v40 = vsel %vm190_vm2, %v187_v39, %v189_v38  ;;  %v205_v41 = vsel %vm197_vm0, %v189_v38, 0 }
  0x8c   : > { %v202_v43 = vsel %vm197_vm0, %v192_v40, 0  ;;  %240 = vmatpush.bf16.msra.mxu2 %v205_v41  ;;  %v314_v45 = vpop.permute.xlu2 %313 }
  0x8d   : > { %227 = vmatpush.bf16.msra.mxu1 %v202_v43  ;;  %v317_v46 = vsel %vm315_vm3, %v312_v37, %v314_v45  ;;  %v328_v53 = vsel %vm197_vm0, %v314_v45, 0  ;;  %v816_v45 = vld [vmem:[%s1140_s2] sm:$0xf] }
  0x8e   : > { %v325_v47 = vsel %vm197_vm0, %v317_v46, 0  ;;  %v984_v46 = vmov 0  }
  0x8f   : > { %915 = vmatmul.msk.bf16.vlgmr.msra.gmra.mxu2 %vm193_vm1, %v912_v44  ;;  %350 = vmatpush.bf16.msrb.mxu3 %v325_v47  ;;  %v939_v47 = vld [vmem:[%s1139_s1 + $0xe] sm:$0x3] }
  0x90   : > { %914 = vmatmul.msk.bf16.vlgmr.msra.gmra.mxu1 %vm193_vm1, %v912_v44  ;;  %967 = vset.pattern.permute.xlu0 %v984_v46 }
  0x91   : > { %292 = vmatpush.bf16.msrb.mxu1 %v257_v42  ;;  %819 = vperm.xlu0 %967, %v816_v45  }
  0x92   : > { %v185_v49 = vpop.permute.xlu0 %184  ;;  %921 = vmatmul.msk.bf16.vlgmr.msrb.gmra.mxu3 %vm193_vm1, %v919_v48 }
  0x93   : > { %v191_v50 = vsel %vm190_vm2, %v185_v49, %v187_v39 }
  0x94   : > { %v199_v52 = vsel %vm197_vm0, %v191_v50, 0  ;;  %v384_v57 = vpop.permute.xlu2 %383 }
  0x95   : > { %214 = vmatpush.bf16.msra.mxu0 %v199_v52 }
  0x98   : > { %913 = vmatmul.msk.bf16.vlgmr.msra.gmra.mxu0 %vm193_vm1, %v912_v44 }
  0x99   : > { %279 = vmatpush.bf16.msrb.mxu0 %v255_v51 }
  0x9c   : > { %v310_v54 = vpop.permute.xlu1 %309  ;;  %v460_v2 = vpop.permute.xlu2 %459 }
  0x9d   : > { %363 = vmatpush.bf16.msra.mxu0 %v328_v53  ;;  %v316_v55 = vsel %vm315_vm3, %v310_v54, %v312_v37 }
  0x9e   : > { %v322_v56 = vsel %vm197_vm0, %v316_v55, 0 }
  0x9f   : > { %337 = vmatpush.bf16.msrb.mxu2 %v322_v56 }
  0xa0   : > { %918 = vmatmul.msk.bf16.vlgmr.msrb.gmra.mxu1 %vm193_vm1, %v172_v36 }
  0xa2   : > { %920 = vmatmul.msk.bf16.vlgmr.msrb.gmra.mxu2 %vm193_vm1, %v919_v48 }
  0xa5   : > { %v388_v58 = vpop.permute.xlu1 %387 }
  0xa6   : > { %v402_v59 = vsel %vm197_vm0, %v388_v58, 0  ;;  %v386_v60 = vpop.permute.xlu0 %385 }
  0xa7   : > { %v391_v61 = vsel %vm389_vm4, %v386_v60, %v388_v58  ;;  %v390_v62 = vsel %vm389_vm4, %v384_v57, %v386_v60  ;;  %437 = vmatpush.bf16.msra.mxu3 %v402_v59 }
  0xa8   : > { %917 = vmatmul.msk.bf16.vlgmr.msrb.gmra.mxu0 %vm193_vm1, %v172_v36  ;;  %v399_v63 = vsel %vm197_vm0, %v391_v61, 0  ;;  %v396_v0 = vsel %vm197_vm0, %v390_v62, 0  ;;  %v268_v49 = vpop.f32.mrf.mxu3 }
  0xa9   : > { %411 = vmatpush.bf16.msra.mxu1 %v396_v0  ;;  %424 = vmatpush.bf16.msra.mxu2 %v399_v63  ;;  %v606_v10 = vpop.permute.xlu2 %605 }
  0xaa   : > { %926 = vmatmul.msk.bf16.vlgmr.msra.gmra.mxu3 %vm193_vm1, %v923_v1 }
  0xae   : > { %v462_v3 = vpop.permute.xlu0 %461 }
  0xaf   : > { %v476_v4 = vsel %vm197_vm0, %v462_v3, 0  ;;  %v458_v5 = vpop.permute.xlu1 %457  ;;  %v465_v6 = vsel %vm463_vm5, %v460_v2, %v462_v3 }
  0xb0   : > { %924 = vmatmul.msk.bf16.vlgmr.msra.gmra.mxu1 %vm193_vm1, %v923_v1  ;;  %v464_v7 = vsel %vm463_vm5, %v458_v5, %v460_v2  ;;  %v473_v8 = vsel %vm197_vm0, %v465_v6, 0  ;;  %511 = vmatpush.bf16.msrb.mxu2 %v476_v4  ;;  %v270_v50 = vpop.f32.mrf.mxu3 }
  0xb1   : > { %v470_v9 = vsel %vm197_vm0, %v464_v7, 0  ;;  %498 = vmatpush.bf16.msrb.mxu1 %v473_v8  ;;  %v610_v17 = vpop.permute.xlu2 %609 }
  0xb2   : > { %925 = vmatmul.msk.bf16.vlgmr.msra.gmra.mxu2 %vm193_vm1, %v923_v1  ;;  %485 = vmatpush.bf16.msrb.mxu0 %v470_v9  ;;  %v624_v27 = vsel %vm197_vm0, %v610_v17, 0 }
  0xb7   : > { %v534_v11 = vpop.permute.xlu1 %533  ;;  %v532_v12 = vpop.permute.xlu0 %531 }
  0xb8   : > { %922 = vmatmul.msk.bf16.vlgmr.msra.gmra.mxu0 %vm193_vm1, %v919_v48  ;;  %v538_v13 = vsel %vm537_vm6, %v532_v12, %v534_v11  ;;  %v943_v48 = vld [vmem:[%s1139_s1 + $0x10] sm:$0x3] }
  0xb9   : > { %v544_v14 = vsel %vm197_vm0, %v538_v13, 0  ;;  %v680_v28 = vpop.permute.xlu2 %679 }
  0xba   : > { %559 = vmatpush.bf16.msrb.mxu3 %v544_v14 }
  0xbd   : > { %932 = vmatmul.msk.bf16.vlgmr.msrb.gmra.mxu3 %vm193_vm1, %v931_v15 }
  0xbf   : > { %v536_v18 = vpop.permute.xlu1 %535 }
  0xc0   : > { %929 = vmatmul.msk.bf16.vlgmr.msrb.gmra.mxu1 %vm193_vm1, %v927_v16  ;;  %v539_v19 = vsel %vm537_vm6, %v534_v11, %v536_v18  ;;  %v550_v20 = vsel %vm197_vm0, %v536_v18, 0  ;;  %v608_v21 = vpop.permute.xlu0 %607 }
  0xc1   : > { %v547_v22 = vsel %vm197_vm0, %v539_v19, 0  ;;  %v612_v23 = vsel %vm611_vm7, %v606_v10, %v608_v21  ;;  %v613_v24 = vsel %vm611_vm7, %v608_v21, %v610_v17  ;;  %585 = vmatpush.bf16.msra.mxu1 %v550_v20  ;;  %v756_v37 = vpop.permute.xlu2 %755 }
  0xc2   : > { %930 = vmatmul.msk.bf16.vlgmr.msrb.gmra.mxu2 %vm193_vm1, %v927_v16  ;;  %v618_v25 = vsel %vm197_vm0, %v612_v23, 0  ;;  %v621_v26 = vsel %vm197_vm0, %v613_v24, 0  ;;  %572 = vmatpush.bf16.msra.mxu0 %v547_v22 }
  0xc3   : > { %633 = vmatpush.bf16.msra.mxu2 %v618_v25  ;;  %646 = vmatpush.bf16.msra.mxu3 %v621_v26 }
  0xc8   : > { %928 = vmatmul.msk.bf16.vlgmr.msrb.gmra.mxu0 %vm193_vm1, %v927_v16 }
  0xc9   : > { %659 = vmatpush.bf16.msrb.mxu0 %v624_v27  ;;  %v684_v29 = vpop.permute.xlu1 %683 }
  0xca   : > { %v698_v30 = vsel %vm197_vm0, %v684_v29, 0  ;;  %v682_v31 = vpop.permute.xlu0 %681 }
  0xcb   : > { %v687_v32 = vsel %vm685_vm8, %v682_v31, %v684_v29  ;;  %v686_v33 = vsel %vm685_vm8, %v680_v28, %v682_v31  ;;  %733 = vmatpush.bf16.msrb.mxu3 %v698_v30 }
  0xcc   : > { %v695_v35 = vsel %vm197_vm0, %v687_v32, 0  ;;  %v692_v36 = vsel %vm197_vm0, %v686_v33, 0 }
  0xcd   : > { %937 = vmatmul.msk.bf16.vlgmr.msra.gmra.mxu3 %vm193_vm1, %v935_v34  ;;  %707 = vmatpush.bf16.msrb.mxu1 %v692_v36 }
  0xce   : > { %720 = vmatpush.bf16.msrb.mxu2 %v695_v35 }
  0xd0   : > { %934 = vmatmul.msk.bf16.vlgmr.msra.gmra.mxu1 %vm193_vm1, %v931_v15 }
  0xd2   : > { %936 = vmatmul.msk.bf16.vlgmr.msra.gmra.mxu2 %vm193_vm1, %v935_v34  ;;  %v758_v38 = vpop.permute.xlu0 %757  ;;  %v754_v39 = vpop.permute.xlu1 %753 }
  0xd3   : > { %v772_v40 = vsel %vm197_vm0, %v758_v38, 0  ;;  %v761_v41 = vsel %vm759_vm9, %v756_v37, %v758_v38  ;;  %v760_v42 = vsel %vm759_vm9, %v754_v39, %v756_v37 }
  0xd4   : > { %v769_v43 = vsel %vm197_vm0, %v761_v41, 0  ;;  %807 = vmatpush.bf16.msra.mxu2 %v772_v40  ;;  %v766_v44 = vsel %vm197_vm0, %v760_v42, 0 }
  0xd5   : > { %794 = vmatpush.bf16.msra.mxu1 %v769_v43 }
  0xd8   : > { %933 = vmatmul.msk.bf16.vlgmr.msra.gmra.mxu0 %vm193_vm1, %v931_v15 }
  0xd9   : > { %781 = vmatpush.bf16.msra.mxu0 %v766_v44 }
  0xdd   : > { %942 = vmatmul.msk.bf16.vlgmr.msrb.gmra.mxu3 %vm193_vm1, %v939_v47 }
  0xe0   : > { %940 = vmatmul.msk.bf16.vlgmr.msrb.gmra.mxu1 %vm193_vm1, %v939_v47 }
  0xe2   : > { %941 = vmatmul.msk.bf16.vlgmr.msrb.gmra.mxu2 %vm193_vm1, %v939_v47 }
  0xe8   : > { %938 = vmatmul.msk.bf16.vlgmr.msrb.gmra.mxu0 %vm193_vm1, %v935_v34 }
  0xf0   : > { %945 = vmatmul.msk.bf16.vlgmr.msra.gmra.mxu1 %vm193_vm1, %v943_v48 }
  0xf2   : > { %946 = vmatmul.msk.bf16.vlgmr.msra.gmra.mxu2 %vm193_vm1, %v943_v48 }
  0xf8   : > { %944 = vmatmul.msk.bf16.vlgmr.msra.gmra.mxu0 %vm193_vm1, %v943_v48 }
 0x10d   : > { %v229_v51 = vpop.f32.mrf.mxu1 }
 0x112   : > { %v242_v52 = vpop.f32.mrf.mxu2 }
 0x115   : > { %v216_v53 = vpop.f32.mrf.mxu0  ;;  %v231_v54 = vpop.f32.mrf.mxu1 }
 0x116   : > { %v269_v55 = vadd.f32 %v268_v49, %v216_v53  ;;  %v352_v56 = vpop.f32.mrf.mxu3  ;;  %v820_v54 = vpop.permute.xlu0 %819 }
 0x11a   : > { %v244_v57 = vpop.f32.mrf.mxu2 }
 0x11d   : > { %v218_v58 = vpop.f32.mrf.mxu0  ;;  %v294_v59 = vpop.f32.mrf.mxu1 }
 0x11e   : > { %v295_v60 = vadd.f32 %v294_v59, %v242_v52  ;;  %v354_v61 = vpop.f32.mrf.mxu3 }
 0x125   : > { %v339_v62 = vpop.f32.mrf.mxu2  ;;  %v281_v63 = vpop.f32.mrf.mxu0 }
 0x126   : > { %v369_v0 = vadd.f32 %v339_v62, %v269_v55  ;;  %v282_v1 = vadd.f32 %v281_v63, %v229_v51  ;;  %v296_v2 = vpop.f32.mrf.mxu1 }
 0x128   : > { %v370_v3 = vadd.f32 %v352_v56, %v282_v1 }
 0x12d   : > { %v341_v4 = vpop.f32.mrf.mxu2  ;;  %v283_v5 = vpop.f32.mrf.mxu0 }
 0x12e   : > { %v413_v6 = vpop.f32.mrf.mxu1  ;;  %v439_v7 = vpop.f32.mrf.mxu3 }
 0x12f   : > { %v443_v39 = vadd.f32 %v413_v6, %v369_v0 }
 0x135   : > { %v426_v8 = vpop.f32.mrf.mxu2  ;;  %v365_v9 = vpop.f32.mrf.mxu0 }
 0x136   : > { %v415_v10 = vpop.f32.mrf.mxu1  ;;  %v441_v11 = vpop.f32.mrf.mxu3  ;;  %v444_v34 = vadd.f32 %v426_v8, %v370_v3  ;;  %v371_v35 = vadd.f32 %v365_v9, %v295_v60 }
 0x138   : > { %v445_v40 = vadd.f32 %v439_v7, %v371_v35 }
 0x13d   : > { %v428_v12 = vpop.f32.mrf.mxu2  ;;  %v367_v13 = vpop.f32.mrf.mxu0 }
 0x13e   : > { %v500_v14 = vpop.f32.mrf.mxu1 }
 0x13f   : > { %v518_v37 = vadd.f32 %v500_v14, %v444_v34 }
 0x140   : > { %v561_v15 = vpop.f32.mrf.mxu3 }
 0x145   : > { %v513_v16 = vpop.f32.mrf.mxu2  ;;  %v487_v17 = vpop.f32.mrf.mxu0 }
 0x146   : > { %v502_v18 = vpop.f32.mrf.mxu1  ;;  %v519_v42 = vadd.f32 %v513_v16, %v445_v40  ;;  %v517_v43 = vadd.f32 %v487_v17, %v443_v39 }
 0x148   : > { %v563_v19 = vpop.f32.mrf.mxu3  ;;  %v591_v49 = vadd.f32 %v561_v15, %v517_v43 }
 0x14d   : > { %v515_v20 = vpop.f32.mrf.mxu2  ;;  %v489_v21 = vpop.f32.mrf.mxu0 }
 0x14e   : > { %v587_v22 = vpop.f32.mrf.mxu1 }
 0x14f   : > { %v593_v46 = vadd.f32 %v587_v22, %v519_v42 }
 0x150   : > { %v648_v23 = vpop.f32.mrf.mxu3 }
 0x155   : > { %v635_v24 = vpop.f32.mrf.mxu2  ;;  %v574_v25 = vpop.f32.mrf.mxu0 }
 0x156   : > { %v589_v26 = vpop.f32.mrf.mxu1  ;;  %v592_v41 = vadd.f32 %v574_v25, %v518_v37  ;;  %v665_v52 = vadd.f32 %v635_v24, %v591_v49 }
 0x158   : > { %v650_v27 = vpop.f32.mrf.mxu3  ;;  %v666_v47 = vadd.f32 %v648_v23, %v592_v41 }
 0x15d   : > { %v637_v28 = vpop.f32.mrf.mxu2  ;;  %v576_v29 = vpop.f32.mrf.mxu0 }
 0x15e   : > { %v709_v30 = vpop.f32.mrf.mxu1 }
 0x15f   : > { %v739_v55 = vadd.f32 %v709_v30, %v665_v52 }
 0x160   : > { %v735_v31 = vpop.f32.mrf.mxu3 }
 0x165   : > { %v722_v32 = vpop.f32.mrf.mxu2  ;;  %v661_v33 = vpop.f32.mrf.mxu0 }
 0x166   : > { %v711_v36 = vpop.f32.mrf.mxu1  ;;  %v740_v50 = vadd.f32 %v722_v32, %v666_v47  ;;  %v667_v51 = vadd.f32 %v661_v33, %v593_v46 }
 0x168   : > { %v737_v38 = vpop.f32.mrf.mxu3  ;;  %v741_v56 = vadd.f32 %v735_v31, %v667_v51 }
 0x16d   : > { %v724_v44 = vpop.f32.mrf.mxu2  ;;  %v663_v45 = vpop.f32.mrf.mxu0 }
 0x16e   : > { %v796_v48 = vpop.f32.mrf.mxu1 }
 0x16f   : > { %v814_v53 = vadd.f32 %v796_v48, %v740_v50 }
 0x171   : > { %v823_v59 = vadd.f32 %v820_v54, %v814_v53 }
 0x173   : > { %v826_v1 = vmax.f32 %v823_v59, 0.0 }
 0x175   : > { %v809_v57 = vpop.f32.mrf.mxu2  ;;  %v783_v58 = vpop.f32.mrf.mxu0 }
 0x176   : > { %v815_v60 = vadd.f32 %v809_v57, %v741_v56  ;;  %v813_v61 = vadd.f32 %v783_v58, %v739_v55  ;;  %v798_v62 = vpop.f32.mrf.mxu1 }
 0x178   : > { %v824_v63 = vadd.f32 %v820_v54, %v815_v60  ;;  %v822_v0 = vadd.f32 %v820_v54, %v813_v61 }
 0x17a   : > { %v827_v2 = vmax.f32 %v824_v63, 0.0  ;;  %v825_v3 = vmax.f32 %v822_v0, 0.0 }
 0x17c   : > { %v829_v4 = vpack.c.bf16 %v827_v2, %v827_v2  ;;  %v828_v5 = vpack.c.bf16 %v826_v1, %v825_v3 }
 0x17d   : > { %v785_v6 = vpop.f32.mrf.mxu0  ;;  %v811_v7 = vpop.f32.mrf.mxu2 }
 0x17e   : > { %v833_v8 = vrot.slane %v829_v4, 4  ;;  %v834_v9 = vrot.slane %v829_v4, 6  ;;  %v832_v10 = vrot.slane %v828_v5, 2 }
 0x180   : > { %v841_v11 = vsel %vm838_vm13, %v833_v8, %v834_v9  ;;  %v837_v12 = vsel %vm197_vm0, %v828_v5, %v832_v10 }
 0x181   : > { %v843_v13 = vsel %vm842_vm14, %v837_v12, %v841_v11 }
 0x182   : > { %849 = vst.msk [vmem:[%s170_s24] sm:$0x3f] %vm848_vm15, %v843_v13 }
 0x183 PF: > { %s13_s12 = sadd.s32 1, %s974_s12  }
 0x184   : > { %p10_p4 = scmp.ge.s32.totalorder %s13_s12, 4  }
 0x186   :  { %12 = sbr.rel (!%p10_p4) target bundleno = 1 (0x1), region = 70 }

// kernel: unet_forward.15
= control target key start
LH: loop header
LB: loop body
LE: loop exit
PB: predicated region body
PF: predicated region fallthrough
CT: control target
= control target key end

     0   :  { %s565_s12 = smov 0   ;;  %s644_s0 = inlined_call_operand.vmem [shape: bf16[2,4,102], index: 0, kind: input, shape index: {}]   ;;  %s645_s1 = inlined_call_operand.vmem [shape: bf16[9,8,4], index: 1, kind: input, shape index: {}]   ;;  %s646_s2 = inlined_call_operand.vmem [shape: f32[8,1], index: 2, kind: input, shape index: {}]   ;;  %s647_s3 = inlined_call_operand.vmem [shape: bf16[2,8,80], index: 3, kind: output, shape index: {}]  }
   0x1 LB: > { %s483_s13 = sadd.s32 4294967295, %s534_s12   ;;  %p487_p0 = scmp.ge.s32.totalorder %s534_s12, 1  ;;  %s534_s12 = sphi %s565_s12, %s13_s12  }
   0x2   : > { %p136_p1 = scmp.lt.s32.totalorder %s534_s12, 3 }
   0x4   : > { %p137_p2 = pnand %p487_p0, %p136_p1 }
   0x5   : > { %p158_p3 = scmp.lt.s32.totalorder (!%p137_p2), %s483_s13, 1  ;;  %s536_s18 = smov (!%p137_p2), 127  }
   0x6   : > { %140 = sbr.rel (%p137_p2) target bundleno = 333 (0x14d), region = 32  ;;  %s537_s19 = smov (!%p137_p2), 126  }
   0x7   : > { %s538_s20 = smov (!%p137_p2), 118   ;;  %s539_s21 = smov (!%p137_p2), 117  }
   0x8   : > { %s540_s22 = smov (!%p137_p2), 116   ;;  %s541_s23 = smov (!%p137_p2), 108  }
   0x9   : > { %s542_s24 = smov (!%p137_p2), 107   ;;  %s543_s25 = smov (!%p137_p2), 106  }
   0xb   : > { %s649_s13 = smov (!%p158_p3, %s483_s13), 1  ;;  %vm181_vm0 = vcmask 1041408   ;;  %vm177_vm1 = vcmask 31744   ;;  %v167_v17 = vld [vmem:[%s645_s1] sm:$0xf]  ;;  %v544_v36 = vmov 0  }
   0xc   : > { %s488_s14 = sshll.u32 %s649_s13, 1  ;;  %v490_v20 = vld [vmem:[%s645_s1 + $0x4] sm:$0xf]  ;;  %v493_v23 = vld [vmem:[%s645_s1 + $0x8] sm:$0xf]  ;;  %526 = vset.pattern.permute.xlu2 %v544_v36  ;;  %527 = vset.pattern.permute.xlu0 %v544_v36  ;;  %vm428_vm2 = vcmask 650240  }
   0xd   : > { %s579_s17 = scalar_lea.vmem %s644_s0, %s488_s14  ;;  %v495_v28 = vld [vmem:[%s645_s1 + $0xc] sm:$0xf]  ;;  %v497_v33 = vld [vmem:[%s645_s1 + $0x10] sm:$0xf]  ;;  %v501_v34 = vld [vmem:[%s645_s1 + $0x18] sm:$0xf] }
   0xe   : > { %v168_v0 = vld [vmem:[%s579_s17] sm:$0x3]  ;;  %v503_v39 = vld [vmem:[%s645_s1 + $0x1c] sm:$0xf]  ;;  %v499_v40 = vld [vmem:[%s645_s1 + $0x14] sm:$0xf] }
   0xf   : > { %172 = vst [vmem:[#allocation1] ss:$4 sm:$0xff] %v168_v0  ;;  %v218_v1 = vld [vmem:[%s579_s17] sm:$0x3]  ;;  %v201_v16 = vsel %vm181_vm0, %v168_v0, 0 }
  0x10   : > { %v247_v3 = vld [vmem:[%s579_s17] sm:$0x3]  ;;  %210 = vmatpush.bf16.msra.mxu1 %v201_v16 }
  0x11   : > { %v276_v5 = vld [vmem:[%s579_s17] sm:$0x3] }
  0x12   : > { %v305_v7 = vld [vmem:[%s579_s17] sm:$0x3] }
  0x13   : > { %v334_v9 = vld [vmem:[%s579_s17] sm:$0x3]  ;;  %492 = vmatmul.msk.bf16.vlgmr.msra.gmra.mxu1 %vm177_vm1, %v167_v17 }
  0x14   : > { %v363_v11 = vld [vmem:[%s579_s17] sm:$0x3] }
  0x15   : > { %v392_v13 = vld [vmem:[%s579_s17] sm:$0x3] }
  0x16   : > { %v173_v2 = vld.sshfl [vmem:[#allocation1] sm:$0xff pattern:$0x73625140] }
  0x17   : > { %175 = vrot.lane.b32.xlu0 %v173_v2, %s536_s18  ;;  %220 = vst [vmem:[#allocation1] ss:$4 sm:$0xff] %v218_v1  ;;  %v419_v35 = vld [vmem:[%s646_s2] sm:$0xff] }
  0x18   : > { %v505_v43 = vld [vmem:[%s645_s1 + $0x20] sm:$0xf] }
  0x1e   : > { %v221_v4 = vld.sshfl [vmem:[#allocation1] sm:$0xff pattern:$0x73625140] }
  0x1f   : > { %223 = vrot.lane.b32.xlu0 %v221_v4, %s537_s19  ;;  %249 = vst [vmem:[#allocation1] ss:$4 sm:$0xff] %v247_v3 }
  0x26   : > { %v250_v6 = vld.sshfl [vmem:[#allocation1] sm:$0xff pattern:$0x73625140] }
  0x27   : > { %252 = vrot.lane.b32.xlu1 %v250_v6, %s538_s20  ;;  %278 = vst [vmem:[#allocation1] ss:$4 sm:$0xff] %v276_v5 }
  0x2e   : > { %v279_v8 = vld.sshfl [vmem:[#allocation1] sm:$0xff pattern:$0x73625140] }
  0x2f   : > { %281 = vrot.lane.b32.xlu1 %v279_v8, %s539_s21  ;;  %307 = vst [vmem:[#allocation1] ss:$4 sm:$0xff] %v305_v7  ;;  %s489_s21 = sshll.u32 %s649_s13, 2 }
  0x36   : > { %v308_v10 = vld.sshfl [vmem:[#allocation1] sm:$0xff pattern:$0x73625140] }
  0x37   : > { %310 = vrot.lane.b32.xlu0 %v308_v10, %s540_s22  ;;  %336 = vst [vmem:[#allocation1] ss:$4 sm:$0xff] %v334_v9 }
  0x3e   : > { %v337_v12 = vld.sshfl [vmem:[#allocation1] sm:$0xff pattern:$0x73625140] }
  0x3f   : > { %365 = vst [vmem:[#allocation1] ss:$4 sm:$0xff] %v363_v11  ;;  %339 = vrot.lane.b32.xlu2 %v337_v12, %s541_s23 }
  0x46   : > { %v366_v14 = vld.sshfl [vmem:[#allocation1] sm:$0xff pattern:$0x73625140] }
  0x47   : > { %394 = vst [vmem:[#allocation1] ss:$4 sm:$0xff] %v392_v13  ;;  %368 = vrot.lane.b32.xlu2 %v366_v14, %s542_s24  ;;  %s165_s24 = scalar_lea.vmem %s647_s3, %s489_s21 }
  0x4e   : > { %v395_v15 = vld.sshfl [vmem:[#allocation1] sm:$0xff pattern:$0x73625140] }
  0x4f   : > { %397 = vrot.lane.b32.xlu1 %v395_v15, %s543_s25  ;;  %422 = vperm.xlu2 %526, %v419_v35  }
  0x89   : > { %v176_v18 = vpop.permute.xlu0 %175 }
  0x8a   : > { %v183_v19 = vsel %vm181_vm0, %v176_v18, 0 }
  0x8b   : > { %192 = vmatpush.bf16.msra.mxu0 %v183_v19 }
  0x8e   : > { %491 = vmatmul.msk.bf16.vlgmr.msra.gmra.mxu0 %vm177_vm1, %v490_v20 }
  0x90   : > { %v212_v44 = vpop.f32.mrf.mxu1 }
  0x91   : > { %v224_v21 = vpop.permute.xlu0 %223 }
  0x92   : > { %v229_v22 = vsel %vm181_vm0, %v224_v21, 0 }
  0x93   : > { %238 = vmatpush.bf16.msra.mxu2 %v229_v22 }
  0x96   : > { %494 = vmatmul.msk.bf16.vlgmr.msra.gmra.mxu2 %vm177_vm1, %v493_v23 }
  0x98   : > { %v214_v45 = vpop.f32.mrf.mxu1 }
  0x99   : > { %v253_v24 = vpop.permute.xlu1 %252  ;;  %v340_v25 = vpop.permute.xlu2 %339 }
  0x9a   : > { %v258_v26 = vsel %vm181_vm0, %v253_v24, 0  ;;  %v345_v27 = vsel %vm181_vm0, %v340_v25, 0 }
  0x9b   : > { %267 = vmatpush.bf16.msra.mxu3 %v258_v26  ;;  %354 = vmatpush.bf16.msrb.mxu2 %v345_v27 }
  0x9e   : > { %496 = vmatmul.msk.bf16.vlgmr.msra.gmra.mxu3 %vm177_vm1, %v495_v28 }
  0xa1   : > { %v282_v29 = vpop.permute.xlu1 %281  ;;  %v369_v30 = vpop.permute.xlu2 %368 }
  0xa2   : > { %v287_v31 = vsel %vm181_vm0, %v282_v29, 0  ;;  %v374_v32 = vsel %vm181_vm0, %v369_v30, 0 }
  0xa3   : > { %296 = vmatpush.bf16.msrb.mxu0 %v287_v31  ;;  %383 = vmatpush.bf16.msrb.mxu3 %v374_v32 }
  0xa6   : > { %498 = vmatmul.msk.bf16.vlgmr.msrb.gmra.mxu0 %vm177_vm1, %v497_v33  ;;  %502 = vmatmul.msk.bf16.vlgmr.msrb.gmra.mxu2 %vm177_vm1, %v501_v34 }
  0xa9   : > { %v311_v37 = vpop.permute.xlu0 %310  ;;  %v423_v4 = vpop.permute.xlu2 %422 }
  0xaa   : > { %v316_v38 = vsel %vm181_vm0, %v311_v37, 0 }
  0xab   : > { %325 = vmatpush.bf16.msrb.mxu1 %v316_v38 }
  0xae   : > { %504 = vmatmul.msk.bf16.vlgmr.msrb.gmra.mxu3 %vm177_vm1, %v503_v39  ;;  %500 = vmatmul.msk.bf16.vlgmr.msrb.gmra.mxu1 %vm177_vm1, %v499_v40 }
  0xc1   : > { %v398_v41 = vpop.permute.xlu1 %397 }
  0xc2   : > { %v403_v42 = vsel %vm181_vm0, %v398_v41, 0 }
  0xc3   : > { %412 = vmatpush.bf16.msra.mxu0 %v403_v42 }
  0xc6   : > { %506 = vmatmul.msk.bf16.vlgmr.msra.gmra.mxu0 %vm177_vm1, %v505_v43 }
 0x10b   : > { %v194_v46 = vpop.f32.mrf.mxu0 }
 0x10c   : > { %v213_v56 = vadd.f32 %v212_v44, %v194_v46 }
 0x113   : > { %v196_v47 = vpop.f32.mrf.mxu0 }
 0x119   : > { %v240_v48 = vpop.f32.mrf.mxu2 }
 0x11a   : > { %v244_v57 = vadd.f32 %v240_v48, %v213_v56 }
 0x121   : > { %v269_v49 = vpop.f32.mrf.mxu3  ;;  %v242_v50 = vpop.f32.mrf.mxu2 }
 0x122   : > { %v273_v61 = vadd.f32 %v269_v49, %v244_v57 }
 0x123   : > { %v298_v51 = vpop.f32.mrf.mxu0 }
 0x124   : > { %v302_v62 = vadd.f32 %v298_v51, %v273_v61 }
 0x129   : > { %v271_v52 = vpop.f32.mrf.mxu3  ;;  %v356_v53 = vpop.f32.mrf.mxu2 }
 0x12b   : > { %v327_v54 = vpop.f32.mrf.mxu1  ;;  %v300_v55 = vpop.f32.mrf.mxu0 }
 0x12c   : > { %v331_v0 = vadd.f32 %v327_v54, %v302_v62 }
 0x12e   : > { %v360_v1 = vadd.f32 %v356_v53, %v331_v0 }
 0x131   : > { %v385_v58 = vpop.f32.mrf.mxu3  ;;  %v358_v59 = vpop.f32.mrf.mxu2 }
 0x132   : > { %v389_v2 = vadd.f32 %v385_v58, %v360_v1 }
 0x133   : > { %v329_v60 = vpop.f32.mrf.mxu1 }
 0x139   : > { %v387_v63 = vpop.f32.mrf.mxu3 }
 0x143   : > { %v414_v3 = vpop.f32.mrf.mxu0 }
 0x144   : > { %v418_v5 = vadd.f32 %v414_v3, %v389_v2 }
 0x146   : > { %v425_v6 = vadd.f32 %v423_v4, %v418_v5 }
 0x148   : > { %v426_v7 = vmax.f32 %v425_v6, 0.0 }
 0x14a   : > { %v427_v8 = vpack.c.bf16 %v426_v7, %v426_v7 }
 0x14b   : > { %v416_v9 = vpop.f32.mrf.mxu0 }
 0x14c   : > { %429 = vst.msk [vmem:[%s165_s24] sm:$0xf] %vm428_vm2, %v427_v8 }
 0x14d PF: > { %s13_s12 = sadd.s32 1, %s534_s12  }
 0x14e   : > { %p10_p4 = scmp.ge.s32.totalorder %s13_s12, 4  }
 0x150   :  { %12 = sbr.rel (!%p10_p4) target bundleno = 1 (0x1), region = 70 }

// kernel: unet_forward.16
= control target key start
LH: loop header
LB: loop body
LE: loop exit
PB: predicated region body
PF: predicated region fallthrough
CT: control target
= control target key end

     0   :  { %s530_s12 = smov 0   ;;  %s602_s0 = inlined_call_operand.vmem [shape: bf16[2,8,102], index: 0, kind: input, shape index: {}]   ;;  %s603_s1 = inlined_call_operand.vmem [shape: bf16[9,8,8], index: 1, kind: input, shape index: {}]   ;;  %s604_s2 = inlined_call_operand.vmem [shape: f32[8,1], index: 2, kind: input, shape index: {}]   ;;  %s605_s3 = inlined_call_operand.vmem [shape: bf16[2,8,80], index: 3, kind: output, shape index: {}]  }
   0x1 LB: > { %s448_s13 = sadd.s32 4294967295, %s499_s12   ;;  %p452_p0 = scmp.ge.s32.totalorder %s499_s12, 1  ;;  %s499_s12 = sphi %s530_s12, %s13_s12  }
   0x2   : > { %p136_p1 = scmp.lt.s32.totalorder %s499_s12, 3 }
   0x4   : > { %p137_p2 = pnand %p452_p0, %p136_p1 }
   0x5   : > { %p158_p3 = scmp.lt.s32.totalorder (!%p137_p2), %s448_s13, 1  ;;  %s501_s18 = smov (!%p137_p2), 118  }
   0x6   : > { %140 = sbr.rel (%p137_p2) target bundleno = 307 (0x133), region = 32  ;;  %s502_s19 = smov (!%p137_p2), 127  }
   0x7   : > { %s503_s20 = smov (!%p137_p2), 108   ;;  %s504_s21 = smov (!%p137_p2), 117  }
   0x8   : > { %s505_s22 = smov (!%p137_p2), 126   ;;  %s506_s23 = smov (!%p137_p2), 107  }
   0x9   : > { %s507_s24 = smov (!%p137_p2), 116   ;;  %s508_s25 = smov (!%p137_p2), 106  }
   0xb   : > { %s607_s13 = smov (!%p158_p3, %s448_s13), 1  ;;  %vm180_vm0 = vcmask 1043456   ;;  %vm176_vm1 = vcmask 64512   ;;  %v167_v4 = vld [vmem:[%s603_s1] sm:$0xf]  ;;  %v509_v15 = vmov 0  }
   0xc   : > { %s453_s14 = sshll.u32 %s607_s13, 2  ;;  %v455_v12 = vld [vmem:[%s603_s1 + $0x4] sm:$0xf]  ;;  %v460_v13 = vld [vmem:[%s603_s1 + $0xc] sm:$0xf]  ;;  %491 = vset.pattern.permute.xlu2 %v509_v15  ;;  %492 = vset.pattern.permute.xlu0 %v509_v15  ;;  %vm393_vm2 = vcmask 650240  }
   0xd   : > { %s161_s17 = scalar_lea.vmem %s602_s0, %s453_s14  ;;  %v384_v14 = vld [vmem:[%s604_s2] sm:$0xff]  ;;  %v458_v21 = vld [vmem:[%s603_s1 + $0x8] sm:$0xf]  ;;  %v462_v26 = vld [vmem:[%s603_s1 + $0x10] sm:$0xf] }
   0xe   : > { %v168_v0 = vld [vmem:[%s161_s17] sm:$0xf]  ;;  %v464_v27 = vld [vmem:[%s603_s1 + $0x14] sm:$0xf]  ;;  %v468_v28 = vld [vmem:[%s603_s1 + $0x1c] sm:$0xf] }
   0xf   : > { %v172_v1 = vunpack.c.l.b16 %v168_v0  ;;  %v201_v3 = vsel %vm180_vm0, %v168_v0, 0  ;;  %v466_v29 = vld [vmem:[%s603_s1 + $0x18] sm:$0xf]  ;;  %v470_v30 = vld [vmem:[%s603_s1 + $0x20] sm:$0xf] }
  0x10   : > { %210 = vmatpush.bf16.msra.mxu1 %v201_v3 }
  0x11   : > { %v173_v2 = vpack.c.b16 %v172_v1, %v172_v1 }
  0x13   : > { %242 = vrot.lane.b32.xlu1 %v173_v2, %s501_s18  ;;  %174 = vrot.lane.b32.xlu0 %v173_v2, %s502_s19 }
  0x14   : > { %314 = vrot.lane.b32.xlu2 %v173_v2, %s503_s20  ;;  %457 = vmatmul.msk.bf16.vlgmr.msra.gmra.mxu1 %vm176_vm1, %v167_v4 }
  0x1b   : > { %266 = vrot.lane.b32.xlu1 %v173_v2, %s504_s21  ;;  %218 = vrot.lane.b32.xlu0 %v173_v2, %s505_s22 }
  0x1c   : > { %338 = vrot.lane.b32.xlu2 %v173_v2, %s506_s23 }
  0x23   : > { %290 = vrot.lane.b32.xlu0 %v173_v2, %s507_s24  ;;  %362 = vrot.lane.b32.xlu1 %v173_v2, %s508_s25  ;;  %s165_s24 = scalar_lea.vmem %s605_s3, %s453_s14 }
  0x24   : > { %387 = vperm.xlu2 %491, %v384_v14  }
  0x6e   : > { %v315_v5 = vpop.permute.xlu2 %314 }
  0x6f   : > { %v320_v18 = vsel %vm180_vm0, %v315_v5, 0 }
  0x76   : > { %v339_v6 = vpop.permute.xlu2 %338 }
  0x77   : > { %v344_v9 = vsel %vm180_vm0, %v339_v6, 0 }
  0x7e   : > { %v388_v54 = vpop.permute.xlu2 %387 }
  0x85   : > { %v243_v7 = vpop.permute.xlu1 %242  ;;  %v175_v8 = vpop.permute.xlu0 %174 }
  0x86   : > { %v182_v10 = vsel %vm180_vm0, %v175_v8, 0  ;;  %v248_v11 = vsel %vm180_vm0, %v243_v7, 0 }
  0x87   : > { %191 = vmatpush.bf16.msra.mxu0 %v182_v10  ;;  %257 = vmatpush.bf16.msra.mxu3 %v248_v11 }
  0x8a   : > { %456 = vmatmul.msk.bf16.vlgmr.msra.gmra.mxu0 %vm176_vm1, %v455_v12  ;;  %461 = vmatmul.msk.bf16.vlgmr.msra.gmra.mxu3 %vm176_vm1, %v460_v13 }
  0x8b   : > { %353 = vmatpush.bf16.msrb.mxu3 %v344_v9 }
  0x8d   : > { %v267_v16 = vpop.permute.xlu1 %266  ;;  %v219_v17 = vpop.permute.xlu0 %218 }
  0x8e   : > { %v224_v19 = vsel %vm180_vm0, %v219_v17, 0  ;;  %v272_v20 = vsel %vm180_vm0, %v267_v16, 0 }
  0x8f   : > { %233 = vmatpush.bf16.msra.mxu2 %v224_v19  ;;  %281 = vmatpush.bf16.msrb.mxu0 %v272_v20 }
  0x91   : > { %v212_v31 = vpop.f32.mrf.mxu1 }
  0x92   : > { %459 = vmatmul.msk.bf16.vlgmr.msra.gmra.mxu2 %vm176_vm1, %v458_v21 }
  0x93   : > { %329 = vmatpush.bf16.msrb.mxu2 %v320_v18 }
  0x95   : > { %v291_v22 = vpop.permute.xlu0 %290  ;;  %v363_v23 = vpop.permute.xlu1 %362 }
  0x96   : > { %v296_v24 = vsel %vm180_vm0, %v291_v22, 0  ;;  %v368_v25 = vsel %vm180_vm0, %v363_v23, 0 }
  0x97   : > { %305 = vmatpush.bf16.msrb.mxu1 %v296_v24  ;;  %377 = vmatpush.bf16.msra.mxu0 %v368_v25 }
  0x99   : > { %v214_v32 = vpop.f32.mrf.mxu1 }
  0x9a   : > { %463 = vmatmul.msk.bf16.vlgmr.msrb.gmra.mxu0 %vm176_vm1, %v462_v26  ;;  %465 = vmatmul.msk.bf16.vlgmr.msrb.gmra.mxu1 %vm176_vm1, %v464_v27 }
  0x9b   : > { %469 = vmatmul.msk.bf16.vlgmr.msrb.gmra.mxu3 %vm176_vm1, %v468_v28 }
  0xa2   : > { %467 = vmatmul.msk.bf16.vlgmr.msrb.gmra.mxu2 %vm176_vm1, %v466_v29 }
  0xaa   : > { %471 = vmatmul.msk.bf16.vlgmr.msra.gmra.mxu0 %vm176_vm1, %v470_v30 }
 0x107   : > { %v193_v33 = vpop.f32.mrf.mxu0 }
 0x108   : > { %v213_v38 = vadd.f32 %v212_v31, %v193_v33 }
 0x10d   : > { %v259_v34 = vpop.f32.mrf.mxu3 }
 0x10f   : > { %v195_v35 = vpop.f32.mrf.mxu0 }
 0x115   : > { %v235_v36 = vpop.f32.mrf.mxu2  ;;  %v261_v37 = vpop.f32.mrf.mxu3 }
 0x116   : > { %v239_v41 = vadd.f32 %v235_v36, %v213_v38 }
 0x117   : > { %v283_v39 = vpop.f32.mrf.mxu0  ;;  %v307_v40 = vpop.f32.mrf.mxu1 }
 0x118   : > { %v263_v42 = vadd.f32 %v259_v34, %v239_v41 }
 0x11a   : > { %v287_v47 = vadd.f32 %v283_v39, %v263_v42 }
 0x11c   : > { %v311_v48 = vadd.f32 %v307_v40, %v287_v47 }
 0x11d   : > { %v237_v43 = vpop.f32.mrf.mxu2 }
 0x11e   : > { %v355_v44 = vpop.f32.mrf.mxu3 }
 0x11f   : > { %v285_v45 = vpop.f32.mrf.mxu0  ;;  %v309_v46 = vpop.f32.mrf.mxu1 }
 0x125   : > { %v331_v49 = vpop.f32.mrf.mxu2 }
 0x126   : > { %v335_v50 = vadd.f32 %v331_v49, %v311_v48  ;;  %v357_v51 = vpop.f32.mrf.mxu3 }
 0x127   : > { %v379_v52 = vpop.f32.mrf.mxu0 }
 0x128   : > { %v359_v53 = vadd.f32 %v355_v44, %v335_v50 }
 0x12a   : > { %v383_v55 = vadd.f32 %v379_v52, %v359_v53 }
 0x12c   : > { %v390_v56 = vadd.f32 %v388_v54, %v383_v55 }
 0x12d   : > { %v333_v57 = vpop.f32.mrf.mxu2 }
 0x12e   : > { %v391_v58 = vmax.f32 %v390_v56, 0.0 }
 0x12f   : > { %v381_v59 = vpop.f32.mrf.mxu0 }
 0x130   : > { %v392_v60 = vpack.c.bf16 %v391_v58, %v391_v58 }
 0x132   : > { %394 = vst.msk [vmem:[%s165_s24] sm:$0xf] %vm393_vm2, %v392_v60 }
 0x133 PF: > { %s13_s12 = sadd.s32 1, %s499_s12  }
 0x134   : > { %p10_p4 = scmp.ge.s32.totalorder %s13_s12, 4  }
 0x136   :  { %12 = sbr.rel (!%p10_p4) target bundleno = 1 (0x1), region = 70 }

// kernel: tile.13
= control target key start
LH: loop header
LB: loop body
LE: loop exit
PB: predicated region body
PF: predicated region fallthrough
CT: control target
= control target key end

     0   :  { %s22_s0 = inlined_call_operand.vmem [shape: f32[8], index: 0, kind: input, shape index: {}]   ;;  %s23_s1 = inlined_call_operand.vmem [shape: f32[4,8], index: 1, kind: output, shape index: {}]  }
   0x1   :  { %v4_v0 = vld [vmem:[%s22_s0] ss:$0 sm:$0xff] }
   0x2   :  { %5 = vst [vmem:[%s23_s1] sm:$0xf] %v4_v0 }

// kernel: tile.0
= control target key start
LH: loop header
LB: loop body
LE: loop exit
PB: predicated region body
PF: predicated region fallthrough
CT: control target
= control target key end

     0   :  { %s66_s8 = smov 125   ;;  %s67_s9 = smov 123   ;;  %vm7_vm0 = vcmask 7168   ;;  %s117_s0 = inlined_call_operand.vmem [shape: f32[4,8], index: 0, kind: input, shape index: {}]   ;;  %s118_s1 = inlined_call_operand.vmem [shape: f32[32,1], index: 1, kind: output, shape index: {}]  }
   0x1   :  { %v4_v0 = vld [vmem:[%s117_s0] sm:$0xf]  ;;  %s65_s0 = smov 127   ;;  %s68_s10 = smov 126  }
   0x2   :  { %5 = vst [vmem:[#allocation0] sm:$0xf] %v4_v0  ;;  %s69_s11 = smov 124   ;;  %s70_s12 = smov 122  }
   0x3   :  { %s71_s13 = smov 121  }
   0x9   :  { %v9_v1 = vld [vmem:[#allocation0] sm:$0xf]  }
   0xa   :  { %v21_v2 = vld [vmem:[#allocation0] sm:$0xf]   ;;  %10 = vrot.lane.b32.xlu0 %v9_v1, %s65_s0 }
   0xb   :  { %22 = vrot.lane.b32.xlu1 %v21_v2, %s66_s8  ;;  %v33_v3 = vld [vmem:[#allocation0] sm:$0xf]  }
   0xc   :  { %34 = vrot.lane.b32.xlu2 %v33_v3, %s67_s9  ;;  %v15_v4 = vld [vmem:[#allocation0] sm:$0xf]  }
   0xd   :  { %v27_v5 = vld [vmem:[#allocation0] sm:$0xf]  }
   0xe   :  { %v39_v6 = vld [vmem:[#allocation0] sm:$0xf]  }
   0xf   :  { %v45_v7 = vld [vmem:[#allocation0] sm:$0xf]  }
  0x10   :  { %v6_v8 = vld [vmem:[#allocation0] sm:$0xf]  }
  0x11   :  { %8 = vst.msk [vmem:[%s118_s1] ss:$8 sm:$0xf] %vm7_vm0, %v6_v8  }
  0x12   :  { %16 = vrot.lane.b32.xlu0 %v15_v4, %s68_s10 }
  0x13   :  { %28 = vrot.lane.b32.xlu1 %v27_v5, %s69_s11 }
  0x14   :  { %40 = vrot.lane.b32.xlu2 %v39_v6, %s70_s12 }
  0x1a   :  { %46 = vrot.lane.b32.xlu0 %v45_v7, %s71_s13 }
  0x66   :  { %v35_v9 = vpop.permute.xlu2 %34  }
  0x67   :  { %55 = vst.msk [vmem:[%s118_s1 + $0x5] ss:$8 sm:$0xf] %vm7_vm0, %v35_v9  }
  0x6e   :  { %v41_v10 = vpop.permute.xlu2 %40  }
  0x6f   :  { %56 = vst.msk [vmem:[%s118_s1 + $0x6] ss:$8 sm:$0xf] %vm7_vm0, %v41_v10  }
  0x7c   :  { %v11_v11 = vpop.permute.xlu0 %10  }
  0x7d   :  { %v23_v12 = vpop.permute.xlu1 %22   ;;  %51 = vst.msk [vmem:[%s118_s1 + $0x1] ss:$8 sm:$0xf] %vm7_vm0, %v11_v11  }
  0x7e   :  { %53 = vst.msk [vmem:[%s118_s1 + $0x3] ss:$8 sm:$0xf] %vm7_vm0, %v23_v12  }
  0x84   :  { %v17_v13 = vpop.permute.xlu0 %16  }
  0x85   :  { %v29_v14 = vpop.permute.xlu1 %28   ;;  %52 = vst.msk [vmem:[%s118_s1 + $0x2] ss:$8 sm:$0xf] %vm7_vm0, %v17_v13  }
  0x86   :  { %54 = vst.msk [vmem:[%s118_s1 + $0x4] ss:$8 sm:$0xf] %vm7_vm0, %v29_v14  }
  0x8c   :  { %v47_v15 = vpop.permute.xlu0 %46  }
  0x8d   :  { %57 = vst.msk [vmem:[%s118_s1 + $0x7] ss:$8 sm:$0xf] %vm7_vm0, %v47_v15  }

// kernel: unet_forward.19
= control target key start
LH: loop header
LB: loop body
LE: loop exit
PB: predicated region body
PF: predicated region fallthrough
CT: control target
= control target key end

     0   :  { %s379_s12 = smov 0   ;;  %s414_s0 = inlined_call_operand.vmem [shape: bf16[2,16,16], index: 0, kind: input, shape index: {}]   ;;  %s415_s1 = inlined_call_operand.vmem [shape: bf16[1,32,16], index: 1, kind: input, shape index: {}]   ;;  %s416_s2 = inlined_call_operand.vmem [shape: f32[32,1], index: 2, kind: input, shape index: {}]   ;;  %s417_s3 = inlined_call_operand.vmem [shape: bf16[2,32,16], index: 3, kind: output, shape index: {}]  }
   0x1 LB: > { %s308_s13 = sadd.s32 4294967295, %s356_s12   ;;  %p312_p0 = scmp.ge.s32.totalorder %s356_s12, 1  ;;  %s356_s12 = sphi %s379_s12, %s13_s12  }
   0x2   : > { %p137_p1 = scmp.lt.s32.totalorder %s356_s12, 3 }
   0x4   : > { %p138_p2 = pnand %p312_p0, %p137_p1 }
   0x5   : > { %p161_p3 = scmp.lt.s32.totalorder (!%p138_p2), %s308_s13, 1 }
   0x6   : > { %141 = sbr.rel (%p138_p2) target bundleno = 158 (0x9e), region = 32 }
   0xb   : > { %v180_v0 = vld [vmem:[%s416_s2 + $0x10] sm:$0xff]  ;;  %v358_v1 = vmov 0   ;;  %v178_v2 = vld [vmem:[%s416_s2] sm:$0xff]  ;;  %s419_s13 = smov (!%p161_p3, %s308_s13), 1  ;;  %v336_v5 = vld [vmem:[%s415_s1 + $0x8] sm:$0xff]  ;;  %vm218_vm0 = vcmask 130048  }
   0xc   : > { %349 = vset.pattern.permute.xlu1 %v358_v1  ;;  %348 = vset.pattern.permute.xlu0 %v358_v1  ;;  %s333_s18 = sshll.u32 %s419_s13, 3  ;;  %v335_v4 = vld [vmem:[%s415_s1] sm:$0xff]  ;;  %v181_v6 = vld [vmem:[%s416_s2 + $0x18] sm:$0xff]  ;;  %v179_v7 = vld [vmem:[%s416_s2 + $0x8] sm:$0xff]  ;;  %s334_s30 = sshll.u32 %s419_s13, 4  ;;  %vm248_vm1 = vcmask 125952  }
   0xd   : > { %194 = vperm.xlu1 %349, %v180_v0   ;;  %184 = vperm.xlu0 %348, %v178_v2   ;;  %s165_s21 = scalar_lea.vmem %s414_s0, %s333_s18  ;;  %s170_s6 = scalar_lea.vmem %s417_s3, %s334_s30 }
   0xe   : > { %v337_v3 = vld [vmem:[%s165_s21] sm:$0xff] }
   0xf   : > { %232 = vmatpush.bf16.msra.mxu0 %v337_v3  ;;  %338 = vmatpush.bf16.msra.mxu1 %v337_v3 }
  0x12   : > { %329 = vmatmul.msk.bf16.vlgmr.msra.gmra.mxu0 %vm218_vm0, %v335_v4  ;;  %330 = vmatmul.msk.bf16.vlgmr.msra.gmra.mxu1 %vm218_vm0, %v336_v5 }
  0x15   : > { %199 = vperm.xlu1 %349, %v181_v6   ;;  %189 = vperm.xlu0 %348, %v179_v7  }
  0x7f   : > { %v195_v8 = vpop.permute.xlu1 %194  ;;  %v185_v9 = vpop.permute.xlu0 %184 }
  0x87   : > { %v200_v16 = vpop.permute.xlu1 %199  ;;  %v190_v17 = vpop.permute.xlu0 %189 }
  0x8f   : > { %v234_v10 = vpop.f32.mrf.mxu0  ;;  %v239_v11 = vpop.f32.mrf.mxu1 }
  0x90   : > { %v235_v12 = vadd.f32 %v234_v10, %v185_v9  ;;  %v240_v13 = vadd.f32 %v239_v11, %v195_v8 }
  0x92   : > { %v244_v14 = vpack.c.bf16 %v235_v12, %v235_v12  ;;  %v246_v15 = vpack.c.bf16 %v240_v13, %v240_v13 }
  0x94   : > { %249 = vst.msk [vmem:[%s170_s6] sm:$0xf] %vm248_vm1, %v244_v14 }
  0x95   : > { %251 = vst.msk [vmem:[%s170_s6 + $0x8] sm:$0xf] %vm248_vm1, %v246_v15 }
  0x97   : > { %v236_v18 = vpop.f32.mrf.mxu0  ;;  %v241_v19 = vpop.f32.mrf.mxu1 }
  0x98   : > { %v237_v20 = vadd.f32 %v236_v18, %v190_v17  ;;  %v242_v21 = vadd.f32 %v241_v19, %v200_v16 }
  0x9a   : > { %v245_v22 = vpack.c.bf16 %v237_v20, %v237_v20  ;;  %v247_v23 = vpack.c.bf16 %v242_v21, %v242_v21 }
  0x9c   : > { %250 = vst.msk [vmem:[%s170_s6 + $0x4] sm:$0xf] %vm248_vm1, %v245_v22 }
  0x9d   : > { %252 = vst.msk [vmem:[%s170_s6 + $0xc] sm:$0xf] %vm248_vm1, %v247_v23 }
  0x9e PF: > { %s13_s12 = sadd.s32 1, %s356_s12  }
  0x9f   : > { %p10_p4 = scmp.ge.s32.totalorder %s13_s12, 4  }
  0xa1   :  { %12 = sbr.rel (!%p10_p4) target bundleno = 1 (0x1), region = 62 }

// kernel: unet_forward.17
= control target key start
LH: loop header
LB: loop body
LE: loop exit
PB: predicated region body
PF: predicated region fallthrough
CT: control target
= control target key end

     0   :  { %s669_s12 = smov 0   ;;  %s741_s0 = inlined_call_operand.vmem [shape: bf16[2,8,38], index: 0, kind: input, shape index: {}]   ;;  %s742_s1 = inlined_call_operand.vmem [shape: bf16[9,16,8], index: 1, kind: input, shape index: {}]   ;;  %s743_s2 = inlined_call_operand.vmem [shape: f32[16,1], index: 2, kind: input, shape index: {}]   ;;  %s744_s3 = inlined_call_operand.vmem [shape: bf16[2,16,24], index: 3, kind: output, shape index: {}]  }
   0x1 LB: > { %s532_s13 = sadd.s32 4294967295, %s638_s12   ;;  %p536_p0 = scmp.ge.s32.totalorder %s638_s12, 1  ;;  %s638_s12 = sphi %s669_s12, %s13_s12  }
   0x2   : > { %p136_p1 = scmp.lt.s32.totalorder %s638_s12, 3 }
   0x4   : > { %p137_p2 = pnand %p536_p0, %p136_p1 }
   0x5   : > { %p159_p3 = scmp.lt.s32.totalorder (!%p137_p2), %s532_s13, 1  ;;  %s640_s18 = smov (!%p137_p2), 122  }
   0x6   : > { %140 = sbr.rel (%p137_p2) target bundleno = 315 (0x13b), region = 32  ;;  %s641_s19 = smov (!%p137_p2), 127  }
   0x7   : > { %s642_s20 = smov (!%p137_p2), 116   ;;  %s643_s21 = smov (!%p137_p2), 121  }
   0x8   : > { %s644_s22 = smov (!%p137_p2), 126   ;;  %s645_s23 = smov (!%p137_p2), 115  }
   0x9   : > { %s646_s24 = smov (!%p137_p2), 120   ;;  %s647_s25 = smov (!%p137_p2), 114  }
   0xb   : > { %s746_s13 = smov (!%p159_p3, %s532_s13), 1  ;;  %vm189_vm0 = vcmask 1043456   ;;  %vm185_vm1 = vcmask 64512   ;;  %v604_v4 = vld [vmem:[%s742_s1] sm:$0xff]  ;;  %v605_v12 = vld [vmem:[%s742_s1 + $0x8] sm:$0xff]  ;;  %v607_v13 = vld [vmem:[%s742_s1 + $0x18] sm:$0xff] }
   0xc   : > { %s537_s14 = sshll.u32 %s746_s13, 2  ;;  %v457_v14 = vld [vmem:[%s743_s2 + $0x8] sm:$0xff]  ;;  %v456_v15 = vld [vmem:[%s743_s2] sm:$0xff]  ;;  %v648_v16 = vmov 0   ;;  %v606_v22 = vld [vmem:[%s742_s1 + $0x10] sm:$0xff]  ;;  %vm474_vm2 = vcmask 191488  }
   0xd   : > { %s162_s17 = scalar_lea.vmem %s741_s0, %s537_s14  ;;  %631 = vset.pattern.permute.xlu0 %v648_v16  ;;  %630 = vset.pattern.permute.xlu2 %v648_v16  ;;  %v608_v26 = vld [vmem:[%s742_s1 + $0x20] sm:$0xff]  ;;  %v609_v28 = vld [vmem:[%s742_s1 + $0x28] sm:$0xff]  ;;  %v611_v29 = vld [vmem:[%s742_s1 + $0x38] sm:$0xff] }
   0xe   : > { %v171_v0 = vld [vmem:[%s162_s17] sm:$0xf]  ;;  %v610_v30 = vld [vmem:[%s742_s1 + $0x30] sm:$0xff] }
   0xf   : > { %v181_v1 = vunpack.c.l.b16 %v171_v0  ;;  %v216_v3 = vsel %vm189_vm0, %v171_v0, 0  ;;  %v612_v31 = vld [vmem:[%s742_s1 + $0x40] sm:$0xff] }
  0x10   : > { %225 = vmatpush.bf16.msra.mxu1 %v216_v3 }
  0x11   : > { %v182_v2 = vpack.c.b16 %v181_v1, %v181_v1 }
  0x13   : > { %272 = vrot.lane.b32.xlu1 %v182_v2, %s640_s18  ;;  %183 = vrot.lane.b32.xlu0 %v182_v2, %s641_s19 }
  0x14   : > { %368 = vrot.lane.b32.xlu2 %v182_v2, %s642_s20  ;;  %551 = vmatmul.msk.bf16.vlgmr.msra.gmra.mxu1 %vm185_vm1, %v604_v4 }
  0x1b   : > { %304 = vrot.lane.b32.xlu1 %v182_v2, %s643_s21  ;;  %240 = vrot.lane.b32.xlu0 %v182_v2, %s644_s22 }
  0x1c   : > { %400 = vrot.lane.b32.xlu2 %v182_v2, %s645_s23  ;;  %s603_s23 = sshll.u32 %s746_s13, 3 }
  0x1d   : > { %s167_s26 = scalar_lea.vmem %s744_s3, %s603_s23 }
  0x23   : > { %336 = vrot.lane.b32.xlu0 %v182_v2, %s646_s24  ;;  %432 = vrot.lane.b32.xlu1 %v182_v2, %s647_s25 }
  0x24   : > { %460 = vperm.xlu2 %630, %v456_v15  }
  0x2b   : > { %465 = vperm.xlu0 %631, %v457_v14  }
  0x6e   : > { %v369_v5 = vpop.permute.xlu2 %368 }
  0x6f   : > { %v374_v19 = vsel %vm189_vm0, %v369_v5, 0 }
  0x76   : > { %v401_v6 = vpop.permute.xlu2 %400 }
  0x77   : > { %v406_v9 = vsel %vm189_vm0, %v401_v6, 0 }
  0x7e   : > { %v461_v58 = vpop.permute.xlu2 %460 }
  0x85   : > { %v273_v7 = vpop.permute.xlu1 %272  ;;  %v184_v8 = vpop.permute.xlu0 %183 }
  0x86   : > { %v191_v10 = vsel %vm189_vm0, %v184_v8, 0  ;;  %v278_v11 = vsel %vm189_vm0, %v273_v7, 0 }
  0x87   : > { %200 = vmatpush.bf16.msra.mxu0 %v191_v10  ;;  %287 = vmatpush.bf16.msra.mxu3 %v278_v11 }
  0x8a   : > { %546 = vmatmul.msk.bf16.vlgmr.msra.gmra.mxu0 %vm185_vm1, %v605_v12  ;;  %565 = vmatmul.msk.bf16.vlgmr.msra.gmra.mxu3 %vm185_vm1, %v607_v13 }
  0x8b   : > { %415 = vmatpush.bf16.msrb.mxu3 %v406_v9 }
  0x8d   : > { %v305_v17 = vpop.permute.xlu1 %304  ;;  %v241_v18 = vpop.permute.xlu0 %240 }
  0x8e   : > { %v246_v20 = vsel %vm189_vm0, %v241_v18, 0  ;;  %v310_v21 = vsel %vm189_vm0, %v305_v17, 0 }
  0x8f   : > { %255 = vmatpush.bf16.msra.mxu2 %v246_v20  ;;  %319 = vmatpush.bf16.msrb.mxu0 %v310_v21 }
  0x91   : > { %v227_v33 = vpop.f32.mrf.mxu1 }
  0x92   : > { %558 = vmatmul.msk.bf16.vlgmr.msra.gmra.mxu2 %vm185_vm1, %v606_v22 }
  0x93   : > { %383 = vmatpush.bf16.msrb.mxu2 %v374_v19 }
  0x95   : > { %v337_v23 = vpop.permute.xlu0 %336  ;;  %v433_v24 = vpop.permute.xlu1 %432 }
  0x96   : > { %v342_v25 = vsel %vm189_vm0, %v337_v23, 0  ;;  %v438_v27 = vsel %vm189_vm0, %v433_v24, 0 }
  0x97   : > { %351 = vmatpush.bf16.msrb.mxu1 %v342_v25  ;;  %447 = vmatpush.bf16.msra.mxu0 %v438_v27 }
  0x99   : > { %v229_v38 = vpop.f32.mrf.mxu1 }
  0x9a   : > { %572 = vmatmul.msk.bf16.vlgmr.msrb.gmra.mxu0 %vm185_vm1, %v608_v26  ;;  %579 = vmatmul.msk.bf16.vlgmr.msrb.gmra.mxu1 %vm185_vm1, %v609_v28 }
  0x9b   : > { %593 = vmatmul.msk.bf16.vlgmr.msrb.gmra.mxu3 %vm185_vm1, %v611_v29 }
  0x9d   : > { %v466_v5 = vpop.permute.xlu0 %465 }
  0xa2   : > { %586 = vmatmul.msk.bf16.vlgmr.msrb.gmra.mxu2 %vm185_vm1, %v610_v30 }
  0xaa   : > { %600 = vmatmul.msk.bf16.vlgmr.msra.gmra.mxu0 %vm185_vm1, %v612_v31 }
 0x107   : > { %v202_v32 = vpop.f32.mrf.mxu0 }
 0x108   : > { %v228_v37 = vadd.f32 %v227_v33, %v202_v32 }
 0x10d   : > { %v289_v35 = vpop.f32.mrf.mxu3 }
 0x10f   : > { %v204_v34 = vpop.f32.mrf.mxu0 }
 0x110   : > { %v230_v44 = vadd.f32 %v229_v38, %v204_v34 }
 0x115   : > { %v257_v36 = vpop.f32.mrf.mxu2  ;;  %v291_v41 = vpop.f32.mrf.mxu3 }
 0x116   : > { %v262_v40 = vadd.f32 %v257_v36, %v228_v37 }
 0x117   : > { %v321_v39 = vpop.f32.mrf.mxu0  ;;  %v353_v45 = vpop.f32.mrf.mxu1 }
 0x118   : > { %v294_v42 = vadd.f32 %v289_v35, %v262_v40 }
 0x11a   : > { %v326_v47 = vadd.f32 %v321_v39, %v294_v42 }
 0x11c   : > { %v358_v49 = vadd.f32 %v353_v45, %v326_v47 }
 0x11d   : > { %v259_v43 = vpop.f32.mrf.mxu2 }
 0x11e   : > { %v263_v48 = vadd.f32 %v259_v43, %v230_v44  ;;  %v417_v51 = vpop.f32.mrf.mxu3 }
 0x11f   : > { %v323_v46 = vpop.f32.mrf.mxu0  ;;  %v355_v57 = vpop.f32.mrf.mxu1 }
 0x120   : > { %v295_v50 = vadd.f32 %v291_v41, %v263_v48 }
 0x122   : > { %v327_v55 = vadd.f32 %v323_v46, %v295_v50 }
 0x124   : > { %v359_v60 = vadd.f32 %v355_v57, %v327_v55 }
 0x125   : > { %v385_v52 = vpop.f32.mrf.mxu2 }
 0x126   : > { %v390_v53 = vadd.f32 %v385_v52, %v358_v49  ;;  %v419_v1 = vpop.f32.mrf.mxu3 }
 0x127   : > { %v449_v54 = vpop.f32.mrf.mxu0 }
 0x128   : > { %v422_v56 = vadd.f32 %v417_v51, %v390_v53 }
 0x12a   : > { %v454_v59 = vadd.f32 %v449_v54, %v422_v56 }
 0x12c   : > { %v468_v61 = vadd.f32 %v461_v58, %v454_v59 }
 0x12d   : > { %v387_v62 = vpop.f32.mrf.mxu2 }
 0x12e   : > { %v470_v63 = vmax.f32 %v468_v61, 0.0  ;;  %v391_v0 = vadd.f32 %v387_v62, %v359_v60 }
 0x12f   : > { %v451_v4 = vpop.f32.mrf.mxu0 }
 0x130   : > { %v472_v2 = vpack.c.bf16 %v470_v63, %v470_v63  ;;  %v423_v3 = vadd.f32 %v419_v1, %v391_v0 }
 0x132   : > { %475 = vst.msk [vmem:[%s167_s26] sm:$0xf] %vm474_vm2, %v472_v2  ;;  %v455_v6 = vadd.f32 %v451_v4, %v423_v3 }
 0x134   : > { %v469_v7 = vadd.f32 %v466_v5, %v455_v6 }
 0x136   : > { %v471_v8 = vmax.f32 %v469_v7, 0.0 }
 0x138   : > { %v473_v9 = vpack.c.bf16 %v471_v8, %v471_v8 }
 0x13a   : > { %476 = vst.msk [vmem:[%s167_s26 + $0x4] sm:$0xf] %vm474_vm2, %v473_v9 }
 0x13b PF: > { %s13_s12 = sadd.s32 1, %s638_s12  }
 0x13c   : > { %p10_p4 = scmp.ge.s32.totalorder %s13_s12, 4  }
 0x13e   :  { %12 = sbr.rel (!%p10_p4) target bundleno = 1 (0x1), region = 70 }

// kernel: unet_forward.18
= control target key start
LH: loop header
LB: loop body
LE: loop exit
PB: predicated region body
PF: predicated region fallthrough
CT: control target
= control target key end

     0   :  { %s663_s12 = smov 0   ;;  %s729_s0 = inlined_call_operand.vmem [shape: bf16[2,16,38], index: 0, kind: input, shape index: {}]   ;;  %s730_s1 = inlined_call_operand.vmem [shape: bf16[9,16,16], index: 1, kind: input, shape index: {}]   ;;  %s731_s2 = inlined_call_operand.vmem [shape: f32[16,1], index: 2, kind: input, shape index: {}]   ;;  %s732_s3 = inlined_call_operand.vmem [shape: bf16[2,16,24], index: 3, kind: output, shape index: {}]  }
   0x1 LB: > { %s519_s13 = sadd.s32 4294967295, %s632_s12   ;;  %p523_p0 = scmp.ge.s32.totalorder %s632_s12, 1  ;;  %s632_s12 = sphi %s663_s12, %s13_s12  }
   0x2   : > { %p137_p1 = scmp.lt.s32.totalorder %s632_s12, 3 }
   0x4   : > { %p138_p2 = pnand %p523_p0, %p137_p1 }
   0x5   : > { %p161_p3 = scmp.lt.s32.totalorder (!%p138_p2), %s519_s13, 1  ;;  %s634_s18 = smov (!%p138_p2), 122  }
   0x6   : > { %141 = sbr.rel (%p138_p2) target bundleno = 310 (0x136), region = 32  ;;  %s635_s19 = smov (!%p138_p2), 127  }
   0x7   : > { %s636_s20 = smov (!%p138_p2), 116   ;;  %s637_s21 = smov (!%p138_p2), 121  }
   0x8   : > { %s638_s22 = smov (!%p138_p2), 126   ;;  %s639_s23 = smov (!%p138_p2), 115  }
   0x9   : > { %s640_s24 = smov (!%p138_p2), 120   ;;  %s641_s25 = smov (!%p138_p2), 114  }
   0xb   : > { %s734_s13 = smov (!%p161_p3, %s519_s13), 1  ;;  %vm192_vm0 = vcmask 130048   ;;  %v597_v1 = vld [vmem:[%s730_s1] sm:$0xff]  ;;  %v599_v6 = vld [vmem:[%s730_s1 + $0x8] sm:$0xff]  ;;  %v601_v7 = vld [vmem:[%s730_s1 + $0x18] sm:$0xff]  ;;  %v642_v10 = vmov 0  }
   0xc   : > { %s595_s14 = sshll.u32 %s734_s13, 3  ;;  %v444_v8 = vld [vmem:[%s731_s2 + $0x8] sm:$0xff]  ;;  %v443_v9 = vld [vmem:[%s731_s2] sm:$0xff]  ;;  %625 = vset.pattern.permute.xlu0 %v642_v10  ;;  %624 = vset.pattern.permute.xlu2 %v642_v10  ;;  %v600_v13 = vld [vmem:[%s730_s1 + $0x10] sm:$0xff]  ;;  %vm461_vm1 = vcmask 191488  }
   0xd   : > { %s165_s17 = scalar_lea.vmem %s729_s0, %s595_s14  ;;  %v602_v15 = vld [vmem:[%s730_s1 + $0x20] sm:$0xff]  ;;  %v603_v17 = vld [vmem:[%s730_s1 + $0x28] sm:$0xff]  ;;  %v605_v18 = vld [vmem:[%s730_s1 + $0x38] sm:$0xff]  ;;  %s170_s26 = scalar_lea.vmem %s732_s3, %s595_s14 }
   0xe   : > { %v598_v0 = vld [vmem:[%s165_s17] sm:$0xff]  ;;  %v604_v19 = vld [vmem:[%s730_s1 + $0x30] sm:$0xff] }
   0xf   : > { %271 = vrot.lane.b32.xlu1 %v598_v0, %s634_s18  ;;  %189 = vrot.lane.b32.xlu0 %v598_v0, %s635_s19  ;;  %v606_v20 = vld [vmem:[%s730_s1 + $0x40] sm:$0xff] }
  0x10   : > { %361 = vrot.lane.b32.xlu2 %v598_v0, %s636_s20  ;;  %226 = vmatpush.bf16.msra.mxu1 %v598_v0 }
  0x13   : > { %543 = vmatmul.msk.bf16.vlgmr.msra.gmra.mxu1 %vm192_vm0, %v597_v1 }
  0x17   : > { %301 = vrot.lane.b32.xlu1 %v598_v0, %s637_s21  ;;  %241 = vrot.lane.b32.xlu0 %v598_v0, %s638_s22 }
  0x18   : > { %391 = vrot.lane.b32.xlu2 %v598_v0, %s639_s23 }
  0x1f   : > { %331 = vrot.lane.b32.xlu0 %v598_v0, %s640_s24  ;;  %421 = vrot.lane.b32.xlu1 %v598_v0, %s641_s25 }
  0x20   : > { %447 = vperm.xlu2 %624, %v443_v9  }
  0x27   : > { %452 = vperm.xlu0 %625, %v444_v8  }
  0x6a   : > { %v362_v2 = vpop.permute.xlu2 %361 }
  0x72   : > { %v392_v3 = vpop.permute.xlu2 %391 }
  0x7a   : > { %v448_v47 = vpop.permute.xlu2 %447 }
  0x81   : > { %v272_v4 = vpop.permute.xlu1 %271  ;;  %v190_v5 = vpop.permute.xlu0 %189 }
  0x82   : > { %203 = vmatpush.bf16.msra.mxu0 %v190_v5  ;;  %284 = vmatpush.bf16.msra.mxu3 %v272_v4 }
  0x85   : > { %538 = vmatmul.msk.bf16.vlgmr.msra.gmra.mxu0 %vm192_vm0, %v599_v6  ;;  %557 = vmatmul.msk.bf16.vlgmr.msra.gmra.mxu3 %vm192_vm0, %v601_v7 }
  0x86   : > { %404 = vmatpush.bf16.msrb.mxu3 %v392_v3 }
  0x89   : > { %v302_v11 = vpop.permute.xlu1 %301  ;;  %v242_v12 = vpop.permute.xlu0 %241 }
  0x8a   : > { %254 = vmatpush.bf16.msra.mxu2 %v242_v12  ;;  %314 = vmatpush.bf16.msrb.mxu0 %v302_v11 }
  0x8d   : > { %550 = vmatmul.msk.bf16.vlgmr.msra.gmra.mxu2 %vm192_vm0, %v600_v13 }
  0x8e   : > { %374 = vmatpush.bf16.msrb.mxu2 %v362_v2 }
  0x90   : > { %v228_v22 = vpop.f32.mrf.mxu1 }
  0x91   : > { %v332_v14 = vpop.permute.xlu0 %331  ;;  %v422_v16 = vpop.permute.xlu1 %421 }
  0x92   : > { %344 = vmatpush.bf16.msrb.mxu1 %v332_v14  ;;  %434 = vmatpush.bf16.msra.mxu0 %v422_v16 }
  0x95   : > { %564 = vmatmul.msk.bf16.vlgmr.msrb.gmra.mxu0 %vm192_vm0, %v602_v15  ;;  %571 = vmatmul.msk.bf16.vlgmr.msrb.gmra.mxu1 %vm192_vm0, %v603_v17 }
  0x96   : > { %585 = vmatmul.msk.bf16.vlgmr.msrb.gmra.mxu3 %vm192_vm0, %v605_v18 }
  0x98   : > { %v230_v27 = vpop.f32.mrf.mxu1 }
  0x99   : > { %v453_v58 = vpop.permute.xlu0 %452 }
  0x9d   : > { %578 = vmatmul.msk.bf16.vlgmr.msrb.gmra.mxu2 %vm192_vm0, %v604_v19 }
  0xa5   : > { %592 = vmatmul.msk.bf16.vlgmr.msra.gmra.mxu0 %vm192_vm0, %v606_v20 }
 0x102   : > { %v205_v21 = vpop.f32.mrf.mxu0 }
 0x103   : > { %v229_v26 = vadd.f32 %v228_v22, %v205_v21 }
 0x108   : > { %v286_v24 = vpop.f32.mrf.mxu3 }
 0x10a   : > { %v207_v23 = vpop.f32.mrf.mxu0 }
 0x10b   : > { %v231_v33 = vadd.f32 %v230_v27, %v207_v23 }
 0x110   : > { %v256_v25 = vpop.f32.mrf.mxu2  ;;  %v288_v30 = vpop.f32.mrf.mxu3 }
 0x111   : > { %v261_v29 = vadd.f32 %v256_v25, %v229_v26 }
 0x112   : > { %v316_v28 = vpop.f32.mrf.mxu0  ;;  %v346_v34 = vpop.f32.mrf.mxu1 }
 0x113   : > { %v291_v31 = vadd.f32 %v286_v24, %v261_v29 }
 0x115   : > { %v321_v36 = vadd.f32 %v316_v28, %v291_v31 }
 0x117   : > { %v351_v38 = vadd.f32 %v346_v34, %v321_v36 }
 0x118   : > { %v258_v32 = vpop.f32.mrf.mxu2 }
 0x119   : > { %v262_v37 = vadd.f32 %v258_v32, %v231_v33  ;;  %v406_v40 = vpop.f32.mrf.mxu3 }
 0x11a   : > { %v318_v35 = vpop.f32.mrf.mxu0  ;;  %v348_v46 = vpop.f32.mrf.mxu1 }
 0x11b   : > { %v292_v39 = vadd.f32 %v288_v30, %v262_v37 }
 0x11d   : > { %v322_v44 = vadd.f32 %v318_v35, %v292_v39 }
 0x11f   : > { %v352_v49 = vadd.f32 %v348_v46, %v322_v44 }
 0x120   : > { %v376_v41 = vpop.f32.mrf.mxu2 }
 0x121   : > { %v381_v42 = vadd.f32 %v376_v41, %v351_v38  ;;  %v408_v54 = vpop.f32.mrf.mxu3 }
 0x122   : > { %v436_v43 = vpop.f32.mrf.mxu0 }
 0x123   : > { %v411_v45 = vadd.f32 %v406_v40, %v381_v42 }
 0x125   : > { %v441_v48 = vadd.f32 %v436_v43, %v411_v45 }
 0x127   : > { %v455_v50 = vadd.f32 %v448_v47, %v441_v48 }
 0x128   : > { %v378_v51 = vpop.f32.mrf.mxu2 }
 0x129   : > { %v457_v52 = vmax.f32 %v455_v50, 0.0  ;;  %v382_v53 = vadd.f32 %v378_v51, %v352_v49 }
 0x12a   : > { %v438_v57 = vpop.f32.mrf.mxu0 }
 0x12b   : > { %v459_v55 = vpack.c.bf16 %v457_v52, %v457_v52  ;;  %v412_v56 = vadd.f32 %v408_v54, %v382_v53 }
 0x12d   : > { %462 = vst.msk [vmem:[%s170_s26] sm:$0xf] %vm461_vm1, %v459_v55  ;;  %v442_v59 = vadd.f32 %v438_v57, %v412_v56 }
 0x12f   : > { %v456_v60 = vadd.f32 %v453_v58, %v442_v59 }
 0x131   : > { %v458_v61 = vmax.f32 %v456_v60, 0.0 }
 0x133   : > { %v460_v62 = vpack.c.bf16 %v458_v61, %v458_v61 }
 0x135   : > { %463 = vst.msk [vmem:[%s170_s26 + $0x4] sm:$0xf] %vm461_vm1, %v460_v62 }
 0x136 PF: > { %s13_s12 = sadd.s32 1, %s632_s12  }
 0x137   : > { %p10_p4 = scmp.ge.s32.totalorder %s13_s12, 4  }
 0x139   :  { %12 = sbr.rel (!%p10_p4) target bundleno = 1 (0x1), region = 70 }

// kernel: tile.18
= control target key start
LH: loop header
LB: loop body
LE: loop exit
PB: predicated region body
PF: predicated region fallthrough
CT: control target
= control target key end

     0   :  { %s22_s0 = inlined_call_operand.vmem [shape: f32[4], index: 0, kind: input, shape index: {}]   ;;  %s23_s1 = inlined_call_operand.vmem [shape: f32[4,4], index: 1, kind: output, shape index: {}]  }
   0x1   :  { %v4_v0 = vld [vmem:[%s22_s0] ss:$0 sm:$0xff] }
   0x2   :  { %5 = vst [vmem:[%s23_s1] sm:$0xf] %v4_v0 }

// kernel: tile.1
= control target key start
LH: loop header
LB: loop body
LE: loop exit
PB: predicated region body
PF: predicated region fallthrough
CT: control target
= control target key end

     0   :  { %s34_s8 = smov 125   ;;  %s35_s9 = smov 126   ;;  %vm7_vm0 = vcmask 7168   ;;  %s61_s0 = inlined_call_operand.vmem [shape: f32[4,4], index: 0, kind: input, shape index: {}]   ;;  %s62_s1 = inlined_call_operand.vmem [shape: f32[16,1], index: 1, kind: output, shape index: {}]  }
   0x1   :  { %v4_v0 = vld [vmem:[%s61_s0] sm:$0xf]  ;;  %s33_s0 = smov 127  }
   0x2   :  { %5 = vst [vmem:[#allocation0] sm:$0xf] %v4_v0 }
   0x9   :  { %v9_v1 = vld [vmem:[#allocation0] sm:$0xf]  }
   0xa   :  { %v21_v2 = vld [vmem:[#allocation0] sm:$0xf]   ;;  %10 = vrot.lane.b32.xlu0 %v9_v1, %s33_s0 }
   0xb   :  { %22 = vrot.lane.b32.xlu1 %v21_v2, %s34_s8  ;;  %v15_v3 = vld [vmem:[#allocation0] sm:$0xf]  }
   0xc   :  { %v6_v4 = vld [vmem:[#allocation0] sm:$0xf]  }
   0xd   :  { %8 = vst.msk [vmem:[%s62_s1] ss:$4 sm:$0xf] %vm7_vm0, %v6_v4  }
  0x12   :  { %16 = vrot.lane.b32.xlu0 %v15_v3, %s35_s9 }
  0x7c   :  { %v11_v5 = vpop.permute.xlu0 %10  }
  0x7d   :  { %v23_v6 = vpop.permute.xlu1 %22   ;;  %27 = vst.msk [vmem:[%s62_s1 + $0x1] ss:$4 sm:$0xf] %vm7_vm0, %v11_v5  }
  0x7e   :  { %29 = vst.msk [vmem:[%s62_s1 + $0x3] ss:$4 sm:$0xf] %vm7_vm0, %v23_v6  }
  0x84   :  { %v17_v7 = vpop.permute.xlu0 %16  }
  0x85   :  { %28 = vst.msk [vmem:[%s62_s1 + $0x2] ss:$4 sm:$0xf] %vm7_vm0, %v17_v7  }

// kernel: unet_forward.22
= control target key start
LH: loop header
LB: loop body
LE: loop exit
PB: predicated region body
PF: predicated region fallthrough
CT: control target
= control target key end

     0   :  { %s327_s12 = smov 0   ;;  %s353_s0 = inlined_call_operand.vmem [shape: bf16[2,8,64], index: 0, kind: input, shape index: {}]   ;;  %s354_s1 = inlined_call_operand.vmem [shape: bf16[1,16,8], index: 1, kind: input, shape index: {}]   ;;  %s355_s2 = inlined_call_operand.vmem [shape: f32[16,1], index: 2, kind: input, shape index: {}]   ;;  %s356_s3 = inlined_call_operand.vmem [shape: bf16[2,16,64], index: 3, kind: output, shape index: {}]  }
   0x1 LB: > { %s271_s13 = sadd.s32 4294967295, %s304_s12   ;;  %p275_p0 = scmp.ge.s32.totalorder %s304_s12, 1  ;;  %s304_s12 = sphi %s327_s12, %s13_s12  }
   0x2   : > { %p136_p1 = scmp.lt.s32.totalorder %s304_s12, 3 }
   0x4   : > { %p137_p2 = pnand %p275_p0, %p136_p1 }
   0x5   : > { %p159_p3 = scmp.lt.s32.totalorder (!%p137_p2), %s271_s13, 1 }
   0x6   : > { %140 = sbr.rel (%p137_p2) target bundleno = 158 (0x9e), region = 32 }
   0xb   : > { %v172_v0 = vld [vmem:[%s355_s2] sm:$0xff]  ;;  %v306_v1 = vmov 0   ;;  %s358_s13 = smov (!%p159_p3, %s271_s13), 1  ;;  %vm193_vm0 = vcmask 1043456   ;;  %v173_v5 = vld [vmem:[%s355_s2 + $0x8] sm:$0xff]  ;;  %vm189_vm1 = vcmask 64512  }
   0xc   : > { %297 = vset.pattern.permute.xlu0 %v306_v1  ;;  %s276_s16 = sshll.u32 %s358_s13, 2  ;;  %v287_v4 = vld [vmem:[%s354_s1] sm:$0xff]  ;;  %s286_s24 = sshll.u32 %s358_s13, 3  ;;  %vm213_vm2 = vcmask 519168  }
   0xd   : > { %176 = vperm.xlu0 %297, %v172_v0   ;;  %s162_s19 = scalar_lea.vmem %s353_s0, %s276_s16  ;;  %s167_s27 = scalar_lea.vmem %s356_s3, %s286_s24 }
   0xe   : > { %v171_v2 = vld [vmem:[%s162_s19] sm:$0xf] }
   0xf   : > { %v195_v3 = vsel %vm193_vm0, %v171_v2, 0 }
  0x10   : > { %204 = vmatpush.bf16.msra.mxu0 %v195_v3 }
  0x13   : > { %283 = vmatmul.msk.bf16.vlgmr.msra.gmra.mxu0 %vm189_vm1, %v287_v4 }
  0x15   : > { %181 = vperm.xlu0 %297, %v173_v5  }
  0x7f   : > { %v177_v6 = vpop.permute.xlu0 %176 }
  0x87   : > { %v182_v10 = vpop.permute.xlu0 %181 }
  0x90   : > { %v206_v7 = vpop.f32.mrf.mxu0 }
  0x91   : > { %v207_v8 = vadd.f32 %v206_v7, %v177_v6 }
  0x93   : > { %v211_v9 = vpack.c.bf16 %v207_v8, %v207_v8 }
  0x95   : > { %214 = vst.msk [vmem:[%s167_s27] sm:$0xf] %vm213_vm2, %v211_v9 }
  0x98   : > { %v208_v11 = vpop.f32.mrf.mxu0 }
  0x99   : > { %v209_v12 = vadd.f32 %v208_v11, %v182_v10 }
  0x9b   : > { %v212_v13 = vpack.c.bf16 %v209_v12, %v209_v12 }
  0x9d   : > { %215 = vst.msk [vmem:[%s167_s27 + $0x4] sm:$0xf] %vm213_vm2, %v212_v13 }
  0x9e PF: > { %s13_s12 = sadd.s32 1, %s304_s12  }
  0x9f   : > { %p10_p4 = scmp.ge.s32.totalorder %s13_s12, 4  }
  0xa1   :  { %12 = sbr.rel (!%p10_p4) target bundleno = 1 (0x1), region = 62 }

// kernel: unet_forward.20
= control target key start
LH: loop header
LB: loop body
LE: loop exit
PB: predicated region body
PF: predicated region fallthrough
CT: control target
= control target key end

     0   :  { %s858_s18 = smov 0   ;;  %s976_s0 = inlined_call_operand.vmem [shape: bf16[2,8,102], index: 0, kind: input, shape index: {}]   ;;  %s977_s1 = inlined_call_operand.vmem [shape: bf16[2,8,102], index: 1, kind: input, shape index: {}]   ;;  %s978_s2 = inlined_call_operand.vmem [shape: bf16[9,8,8], index: 2, kind: input, shape index: {}]   ;;  %s979_s3 = inlined_call_operand.vmem [shape: bf16[9,8,8], index: 3, kind: input, shape index: {}]   ;;  %s980_s4 = inlined_call_operand.vmem [shape: f32[8,1], index: 4, kind: input, shape index: {}]   ;;  %s981_s5 = inlined_call_operand.vmem [shape: bf16[2,8,80], index: 5, kind: output, shape index: {}]  }
   0x1 LB: > { %s748_s19 = sadd.s32 4294967295, %s817_s18   ;;  %p752_p0 = scmp.ge.s32.totalorder %s817_s18, 1  ;;  %s817_s18 = sphi %s858_s18, %s15_s18  }
   0x2   : > { %p195_p1 = scmp.lt.s32.totalorder %s817_s18, 3 }
   0x4   : > { %p196_p2 = pnand %p752_p0, %p195_p1 }
   0x5   : > { %p225_p3 = scmp.lt.s32.totalorder (!%p196_p2), %s748_s19, 1  ;;  %s819_s24 = smov (!%p196_p2), 118  }
   0x6   : > { %199 = sbr.rel (%p196_p2) target bundleno = 341 (0x155), region = 40  ;;  %s820_s25 = smov (!%p196_p2), 127  }
   0x7   : > { %s821_s26 = smov (!%p196_p2), 116   ;;  %s822_s30 = smov (!%p196_p2), 117  }
   0x8   : > { %s823_s6 = smov (!%p196_p2), 126   ;;  %s824_s7 = smov (!%p196_p2), 108  }
   0x9   : > { %s825_s8 = smov (!%p196_p2), 107   ;;  %s826_s9 = smov (!%p196_p2), 106  }
   0xb   : > { %s983_s19 = smov (!%p225_p3, %s748_s19), 1  ;;  %vm251_vm0 = vcmask 1043456   ;;  %v238_v7 = vld [vmem:[%s978_s2] sm:$0xf]  ;;  %vm247_vm1 = vcmask 64512   ;;  %v827_v51 = vmov 0  }
   0xc   : > { %s866_s20 = sshll.u32 %s983_s19, 2  ;;  %v765_v10 = vld [vmem:[%s978_s2 + $0x14] sm:$0xf]  ;;  %v455_v14 = vld [vmem:[%s979_s3] sm:$0xf]  ;;  %809 = vset.pattern.permute.xlu1 %v827_v51  ;;  %810 = vset.pattern.permute.xlu0 %v827_v51  ;;  %vm681_vm2 = vcmask 650240  }
   0xd   : > { %s228_s23 = scalar_lea.vmem %s976_s0, %s866_s20  ;;  %s232_s29 = scalar_lea.vmem %s977_s1, %s866_s20  ;;  %v756_v19 = vld [vmem:[%s978_s2 + $0x4] sm:$0xf]  ;;  %v761_v20 = vld [vmem:[%s978_s2 + $0xc] sm:$0xf]  ;;  %v759_v28 = vld [vmem:[%s978_s2 + $0x8] sm:$0xf] }
   0xe   : > { %v239_v0 = vld [vmem:[%s228_s23] sm:$0xf]  ;;  %v780_v30 = vld [vmem:[%s979_s3 + $0x10] sm:$0xf]  ;;  %v769_v36 = vld [vmem:[%s978_s2 + $0x1c] sm:$0xf] }
   0xf   : > { %v243_v1 = vunpack.c.l.b16 %v239_v0  ;;  %v456_v3 = vld [vmem:[%s232_s29] sm:$0xf]  ;;  %v272_v6 = vsel %vm251_vm0, %v239_v0, 0  ;;  %v763_v35 = vld [vmem:[%s978_s2 + $0x10] sm:$0xf]  ;;  %s236_s29 = scalar_lea.vmem %s981_s5, %s866_s20 }
  0x10   : > { %v480_v4 = vunpack.c.l.b16 %v456_v3  ;;  %281 = vmatpush.bf16.msra.mxu1 %v272_v6  ;;  %v461_v12 = vsel %vm251_vm0, %v456_v3, 0  ;;  %v767_v41 = vld [vmem:[%s978_s2 + $0x18] sm:$0xf]  ;;  %v771_v47 = vld [vmem:[%s978_s2 + $0x20] sm:$0xf] }
  0x11   : > { %v244_v2 = vpack.c.b16 %v243_v1, %v243_v1  ;;  %v776_v48 = vld [vmem:[%s979_s3 + $0x8] sm:$0xf]  ;;  %v672_v50 = vld [vmem:[%s980_s4] sm:$0xff]  ;;  %v778_v56 = vld [vmem:[%s979_s3 + $0xc] sm:$0xf] }
  0x12   : > { %v481_v5 = vpack.c.b16 %v480_v4, %v480_v4  ;;  %v774_v54 = vld [vmem:[%s979_s3 + $0x4] sm:$0xf]  ;;  %v788_v55 = vld [vmem:[%s979_s3 + $0x20] sm:$0xf]  ;;  %v784_v57 = vld [vmem:[%s979_s3 + $0x18] sm:$0xf] }
  0x13   : > { %313 = vrot.lane.b32.xlu1 %v244_v2, %s819_s24  ;;  %245 = vrot.lane.b32.xlu0 %v244_v2, %s820_s25  ;;  %v782_v58 = vld [vmem:[%s979_s3 + $0x14] sm:$0xf]  ;;  %v786_v59 = vld [vmem:[%s979_s3 + $0x1c] sm:$0xf] }
  0x14   : > { %361 = vrot.lane.b32.xlu2 %v244_v2, %s821_s26  ;;  %758 = vmatmul.msk.bf16.vlgmr.msra.gmra.mxu1 %vm247_vm1, %v238_v7 }
  0x1b   : > { %337 = vrot.lane.b32.xlu1 %v244_v2, %s822_s30  ;;  %289 = vrot.lane.b32.xlu0 %v244_v2, %s823_s6 }
  0x1c   : > { %385 = vrot.lane.b32.xlu2 %v244_v2, %s824_s7 }
  0x23   : > { %409 = vrot.lane.b32.xlu0 %v244_v2, %s825_s8  ;;  %433 = vrot.lane.b32.xlu1 %v244_v2, %s826_s9 }
  0x24   : > { %482 = vrot.lane.b32.xlu2 %v481_v5, %s820_s25 }
  0x2b   : > { %506 = vrot.lane.b32.xlu0 %v481_v5, %s823_s6  ;;  %530 = vrot.lane.b32.xlu1 %v481_v5, %s819_s24 }
  0x2c   : > { %554 = vrot.lane.b32.xlu2 %v481_v5, %s822_s30 }
  0x33   : > { %578 = vrot.lane.b32.xlu0 %v481_v5, %s821_s26  ;;  %602 = vrot.lane.b32.xlu1 %v481_v5, %s824_s7 }
  0x34   : > { %626 = vrot.lane.b32.xlu2 %v481_v5, %s825_s8 }
  0x3b   : > { %650 = vrot.lane.b32.xlu0 %v481_v5, %s826_s9  ;;  %675 = vperm.xlu1 %809, %v672_v50  }
  0x6e   : > { %v362_v8 = vpop.permute.xlu2 %361 }
  0x6f   : > { %v367_v9 = vsel %vm251_vm0, %v362_v8, 0 }
  0x70   : > { %376 = vmatpush.bf16.msrb.mxu1 %v367_v9 }
  0x73   : > { %766 = vmatmul.msk.bf16.vlgmr.msrb.gmra.mxu1 %vm247_vm1, %v765_v10 }
  0x74   : > { %470 = vmatpush.bf16.msra.mxu1 %v461_v12 }
  0x76   : > { %v386_v11 = vpop.permute.xlu2 %385 }
  0x77   : > { %v391_v25 = vsel %vm251_vm0, %v386_v11, 0 }
  0x7e   : > { %v483_v13 = vpop.permute.xlu2 %482 }
  0x7f   : > { %v488_v29 = vsel %vm251_vm0, %v483_v13, 0 }
  0x83   : > { %773 = vmatmul.msk.bf16.vlgmr.msra.gmra.mxu1 %vm247_vm1, %v455_v14 }
  0x85   : > { %v314_v15 = vpop.permute.xlu1 %313  ;;  %v246_v16 = vpop.permute.xlu0 %245 }
  0x86   : > { %v253_v17 = vsel %vm251_vm0, %v246_v16, 0  ;;  %v319_v18 = vsel %vm251_vm0, %v314_v15, 0  ;;  %v555_v21 = vpop.permute.xlu2 %554 }
  0x87   : > { %262 = vmatpush.bf16.msra.mxu0 %v253_v17  ;;  %328 = vmatpush.bf16.msra.mxu3 %v319_v18  ;;  %v560_v22 = vsel %vm251_vm0, %v555_v21, 0 }
  0x88   : > { %569 = vmatpush.bf16.msrb.mxu1 %v560_v22 }
  0x8a   : > { %757 = vmatmul.msk.bf16.vlgmr.msra.gmra.mxu0 %vm247_vm1, %v756_v19  ;;  %762 = vmatmul.msk.bf16.vlgmr.msra.gmra.mxu3 %vm247_vm1, %v761_v20 }
  0x8d   : > { %v338_v23 = vpop.permute.xlu1 %337  ;;  %v290_v24 = vpop.permute.xlu0 %289 }
  0x8e   : > { %v295_v26 = vsel %vm251_vm0, %v290_v24, 0  ;;  %v343_v27 = vsel %vm251_vm0, %v338_v23, 0  ;;  %v627_v42 = vpop.permute.xlu2 %626 }
  0x8f   : > { %304 = vmatpush.bf16.msra.mxu2 %v295_v26  ;;  %352 = vmatpush.bf16.msrb.mxu0 %v343_v27  ;;  %v632_v49 = vsel %vm251_vm0, %v627_v42, 0 }
  0x91   : > { %v283_v60 = vpop.f32.mrf.mxu1 }
  0x92   : > { %760 = vmatmul.msk.bf16.vlgmr.msra.gmra.mxu2 %vm247_vm1, %v759_v28 }
  0x93   : > { %400 = vmatpush.bf16.msrb.mxu2 %v391_v25  ;;  %781 = vmatmul.msk.bf16.vlgmr.msrb.gmra.mxu1 %vm247_vm1, %v780_v30 }
  0x95   : > { %v410_v31 = vpop.permute.xlu0 %409  ;;  %v434_v32 = vpop.permute.xlu1 %433 }
  0x96   : > { %v415_v33 = vsel %vm251_vm0, %v410_v31, 0  ;;  %v439_v34 = vsel %vm251_vm0, %v434_v32, 0 }
  0x97   : > { %497 = vmatpush.bf16.msra.mxu2 %v488_v29  ;;  %424 = vmatpush.bf16.msrb.mxu3 %v415_v33 }
  0x98   : > { %448 = vmatpush.bf16.msra.mxu0 %v439_v34 }
  0x99   : > { %v285_v61 = vpop.f32.mrf.mxu1 }
  0x9a   : > { %764 = vmatmul.msk.bf16.vlgmr.msrb.gmra.mxu0 %vm247_vm1, %v763_v35  ;;  %770 = vmatmul.msk.bf16.vlgmr.msrb.gmra.mxu3 %vm247_vm1, %v769_v36 }
  0x9d   : > { %v507_v37 = vpop.permute.xlu0 %506  ;;  %v531_v38 = vpop.permute.xlu1 %530 }
  0x9e   : > { %v512_v39 = vsel %vm251_vm0, %v507_v37, 0  ;;  %v536_v40 = vsel %vm251_vm0, %v531_v38, 0 }
  0x9f   : > { %521 = vmatpush.bf16.msra.mxu3 %v512_v39  ;;  %545 = vmatpush.bf16.msrb.mxu0 %v536_v40 }
  0xa2   : > { %768 = vmatmul.msk.bf16.vlgmr.msrb.gmra.mxu2 %vm247_vm1, %v767_v41 }
  0xa5   : > { %v579_v43 = vpop.permute.xlu0 %578  ;;  %v603_v44 = vpop.permute.xlu1 %602 }
  0xa6   : > { %v584_v45 = vsel %vm251_vm0, %v579_v43, 0  ;;  %v608_v46 = vsel %vm251_vm0, %v603_v44, 0 }
  0xa7   : > { %593 = vmatpush.bf16.msrb.mxu2 %v584_v45  ;;  %617 = vmatpush.bf16.msrb.mxu3 %v608_v46 }
  0xaa   : > { %772 = vmatmul.msk.bf16.vlgmr.msra.gmra.mxu0 %vm247_vm1, %v771_v47  ;;  %777 = vmatmul.msk.bf16.vlgmr.msra.gmra.mxu3 %vm247_vm1, %v776_v48 }
  0xab   : > { %641 = vmatpush.bf16.msra.mxu0 %v632_v49 }
  0xad   : > { %v651_v52 = vpop.permute.xlu0 %650  ;;  %v676_v46 = vpop.permute.xlu1 %675 }
  0xae   : > { %v656_v53 = vsel %vm251_vm0, %v651_v52, 0 }
  0xaf   : > { %665 = vmatpush.bf16.msra.mxu1 %v656_v53 }
  0xb2   : > { %775 = vmatmul.msk.bf16.vlgmr.msra.gmra.mxu2 %vm247_vm1, %v774_v54  ;;  %789 = vmatmul.msk.bf16.vlgmr.msra.gmra.mxu1 %vm247_vm1, %v788_v55 }
  0xba   : > { %779 = vmatmul.msk.bf16.vlgmr.msrb.gmra.mxu0 %vm247_vm1, %v778_v56  ;;  %785 = vmatmul.msk.bf16.vlgmr.msrb.gmra.mxu3 %vm247_vm1, %v784_v57 }
  0xc2   : > { %783 = vmatmul.msk.bf16.vlgmr.msrb.gmra.mxu2 %vm247_vm1, %v782_v58 }
  0xca   : > { %787 = vmatmul.msk.bf16.vlgmr.msra.gmra.mxu0 %vm247_vm1, %v786_v59 }
  0xf0   : > { %v378_v62 = vpop.f32.mrf.mxu1 }
  0xf8   : > { %v380_v63 = vpop.f32.mrf.mxu1 }
 0x100   : > { %v472_v0 = vpop.f32.mrf.mxu1 }
 0x107   : > { %v264_v1 = vpop.f32.mrf.mxu0 }
 0x108   : > { %v474_v2 = vpop.f32.mrf.mxu1  ;;  %v284_v6 = vadd.f32 %v283_v60, %v264_v1 }
 0x10d   : > { %v330_v3 = vpop.f32.mrf.mxu3 }
 0x10f   : > { %v266_v4 = vpop.f32.mrf.mxu0 }
 0x110   : > { %v571_v5 = vpop.f32.mrf.mxu1 }
 0x115   : > { %v306_v7 = vpop.f32.mrf.mxu2  ;;  %v332_v8 = vpop.f32.mrf.mxu3 }
 0x116   : > { %v310_v9 = vadd.f32 %v306_v7, %v284_v6 }
 0x117   : > { %v354_v10 = vpop.f32.mrf.mxu0 }
 0x118   : > { %v334_v11 = vadd.f32 %v330_v3, %v310_v9  ;;  %v573_v13 = vpop.f32.mrf.mxu1 }
 0x11a   : > { %v358_v12 = vadd.f32 %v354_v10, %v334_v11 }
 0x11c   : > { %v382_v14 = vadd.f32 %v378_v62, %v358_v12 }
 0x11d   : > { %v308_v15 = vpop.f32.mrf.mxu2  ;;  %v426_v16 = vpop.f32.mrf.mxu3 }
 0x11f   : > { %v356_v17 = vpop.f32.mrf.mxu0 }
 0x125   : > { %v402_v18 = vpop.f32.mrf.mxu2  ;;  %v428_v19 = vpop.f32.mrf.mxu3 }
 0x126   : > { %v406_v21 = vadd.f32 %v402_v18, %v382_v14 }
 0x127   : > { %v450_v20 = vpop.f32.mrf.mxu0 }
 0x128   : > { %v430_v24 = vadd.f32 %v426_v16, %v406_v21 }
 0x12a   : > { %v454_v27 = vadd.f32 %v450_v20, %v430_v24 }
 0x12c   : > { %v476_v30 = vadd.f32 %v472_v0, %v454_v27 }
 0x12d   : > { %v404_v22 = vpop.f32.mrf.mxu2  ;;  %v523_v23 = vpop.f32.mrf.mxu3 }
 0x12f   : > { %v452_v25 = vpop.f32.mrf.mxu0  ;;  %v667_v26 = vpop.f32.mrf.mxu1 }
 0x135   : > { %v499_v28 = vpop.f32.mrf.mxu2  ;;  %v525_v29 = vpop.f32.mrf.mxu3 }
 0x136   : > { %v503_v33 = vadd.f32 %v499_v28, %v476_v30 }
 0x137   : > { %v547_v31 = vpop.f32.mrf.mxu0  ;;  %v669_v32 = vpop.f32.mrf.mxu1 }
 0x138   : > { %v527_v34 = vadd.f32 %v523_v23, %v503_v33 }
 0x13a   : > { %v551_v38 = vadd.f32 %v547_v31, %v527_v34 }
 0x13c   : > { %v575_v39 = vadd.f32 %v571_v5, %v551_v38 }
 0x13d   : > { %v501_v35 = vpop.f32.mrf.mxu2  ;;  %v619_v36 = vpop.f32.mrf.mxu3 }
 0x13f   : > { %v549_v37 = vpop.f32.mrf.mxu0 }
 0x145   : > { %v595_v40 = vpop.f32.mrf.mxu2  ;;  %v621_v41 = vpop.f32.mrf.mxu3 }
 0x146   : > { %v599_v42 = vadd.f32 %v595_v40, %v575_v39 }
 0x147   : > { %v643_v43 = vpop.f32.mrf.mxu0 }
 0x148   : > { %v623_v44 = vadd.f32 %v619_v36, %v599_v42 }
 0x14a   : > { %v647_v45 = vadd.f32 %v643_v43, %v623_v44 }
 0x14c   : > { %v671_v47 = vadd.f32 %v667_v26, %v647_v45 }
 0x14d   : > { %v597_v48 = vpop.f32.mrf.mxu2 }
 0x14e   : > { %v678_v49 = vadd.f32 %v676_v46, %v671_v47 }
 0x14f   : > { %v645_v50 = vpop.f32.mrf.mxu0 }
 0x150   : > { %v679_v51 = vmax.f32 %v678_v49, 0.0 }
 0x152   : > { %v680_v52 = vpack.c.bf16 %v679_v51, %v679_v51 }
 0x154   : > { %682 = vst.msk [vmem:[%s236_s29] sm:$0xf] %vm681_vm2, %v680_v52 }
 0x155 PF: > { %s15_s18 = sadd.s32 1, %s817_s18  }
 0x156   : > { %p12_p4 = scmp.ge.s32.totalorder %s15_s18, 4  }
 0x158   :  { %14 = sbr.rel (!%p12_p4) target bundleno = 1 (0x1), region = 89 }

// kernel: unet_forward.25
= control target key start
LH: loop header
LB: loop body
LE: loop exit
PB: predicated region body
PF: predicated region fallthrough
CT: control target
= control target key end

     0   :  { %s334_s12 = smov 0   ;;  %s360_s0 = inlined_call_operand.vmem [shape: bf16[2,4,256], index: 0, kind: input, shape index: {}]   ;;  %s361_s1 = inlined_call_operand.vmem [shape: bf16[1,2,4], index: 1, kind: input, shape index: {}]   ;;  %s362_s2 = inlined_call_operand.vmem [shape: f32[2,1], index: 2, kind: input, shape index: {}]   ;;  %s363_s3 = inlined_call_operand.vmem [shape: f32[2,2,256], index: 3, kind: output, shape index: {}]  }
   0x1 LB: > { %s280_s13 = sadd.s32 4294967295, %s311_s12   ;;  %p284_p0 = scmp.ge.s32.totalorder %s311_s12, 1  ;;  %s311_s12 = sphi %s334_s12, %s13_s12  }
   0x2   : > { %p137_p1 = scmp.lt.s32.totalorder %s311_s12, 3 }
   0x4   : > { %p138_p2 = pnand %p284_p0, %p137_p1 }
   0x5   : > { %p161_p3 = scmp.lt.s32.totalorder (!%p138_p2), %s280_s13, 1 }
   0x6   : > { %141 = sbr.rel (%p138_p2) target bundleno = 161 (0xa1), region = 32 }
   0xb   : > { %v313_v0 = vmov 0   ;;  %v174_v1 = vld [vmem:[%s362_s2] sm:$0x3]  ;;  %s365_s13 = smov (!%p161_p3, %s280_s13), 1  ;;  %vm188_vm0 = vcmask 1041408   ;;  %vm184_vm1 = vcmask 31744  }
   0xc   : > { %304 = vset.pattern.permute.xlu0 %v313_v0  ;;  %s293_s16 = sshll.u32 %s365_s13, 2  ;;  %v172_v7 = vld [vmem:[%s361_s1] sm:$0x1] }
   0xd   : > { %177 = vperm.xlu0 %304, %v174_v1   ;;  %s165_s19 = scalar_lea.vmem %s360_s0, %s293_s16  ;;  %s170_s24 = scalar_lea.vmem %s363_s3, %s293_s16 }
   0xe   : > { %v173_v2 = vld [vmem:[%s165_s19] sm:$0xf] }
   0xf   : > { %181 = vst [vmem:[#allocation1] ss:$4 sm:$0xff] %v173_v2 }
  0x16   : > { %v182_v3 = vld.sshfl [vmem:[#allocation1] sm:$0xff pattern:$0x73625140]  ;;  %v183_v4 = vld.sshfl [vmem:[#allocation1 + $0x8] sm:$0xff pattern:$0x73625140] }
  0x17   : > { %v189_v5 = vsel %vm188_vm0, %v182_v3, 0  ;;  %v191_v6 = vsel %vm188_vm0, %v183_v4, 0 }
  0x18   : > { %200 = vmatpush.bf16.msra.mxu0 %v189_v5  ;;  %213 = vmatpush.bf16.msra.mxu1 %v191_v6 }
  0x1b   : > { %289 = vmatmul.msk.bf16.vlgmr.msra.gmra.mxu0 %vm184_vm1, %v172_v7  ;;  %290 = vmatmul.msk.bf16.vlgmr.msra.gmra.mxu1 %vm184_vm1, %v172_v7 }
  0x7f   : > { %v178_v8 = vpop.permute.xlu0 %177 }
  0x98   : > { %v202_v9 = vpop.f32.mrf.mxu0  ;;  %v215_v10 = vpop.f32.mrf.mxu1 }
  0x99   : > { %v216_v11 = vadd.f32 %v215_v10, %v178_v8  ;;  %v203_v12 = vadd.f32 %v202_v9, %v178_v8 }
  0x9b   : > { %v221_v13 = vrot.slane %v216_v11, 6 }
  0x9d   : > { %v222_v14 = vsel %vm188_vm0, %v203_v12, %v221_v13 }
  0x9e   : > { %224 = vst [vmem:[%s170_s24] sm:$0xf] %v222_v14 }
  0xa0   : > { %v204_v15 = vpop.f32.mrf.mxu0  ;;  %v217_v16 = vpop.f32.mrf.mxu1 }
  0xa1 PF: > { %s13_s12 = sadd.s32 1, %s311_s12  }
  0xa2   : > { %p10_p4 = scmp.ge.s32.totalorder %s13_s12, 4  }
  0xa4   :  { %12 = sbr.rel (!%p10_p4) target bundleno = 1 (0x1), region = 62 }

// kernel: unet_forward.23
= control target key start
LH: loop header
LB: loop body
LE: loop exit
PB: predicated region body
PF: predicated region fallthrough
CT: control target
= control target key end

     0   :  { %s1779_s18 = smov 0   ;;  %s2100_s0 = inlined_call_operand.vmem [shape: bf16[2,4,326], index: 0, kind: input, shape index: {}]   ;;  %s2101_s1 = inlined_call_operand.vmem [shape: bf16[2,4,326], index: 1, kind: input, shape index: {}]   ;;  %s2102_s2 = inlined_call_operand.vmem [shape: bf16[9,4,4], index: 2, kind: input, shape index: {}]   ;;  %s2103_s3 = inlined_call_operand.vmem [shape: bf16[9,4,4], index: 3, kind: input, shape index: {}]   ;;  %s2104_s4 = inlined_call_operand.vmem [shape: f32[4,1], index: 4, kind: input, shape index: {}]   ;;  %s2105_s5 = inlined_call_operand.vmem [shape: bf16[2,4,288], index: 5, kind: output, shape index: {}]  }
   0x1 LB: > { %s1633_s19 = sadd.s32 4294967295, %s1738_s18   ;;  %p1637_p0 = scmp.ge.s32.totalorder %s1738_s18, 1  ;;  %s1738_s18 = sphi %s1779_s18, %s15_s18  }
   0x2   : > { %p197_p1 = scmp.lt.s32.totalorder %s1738_s18, 3 }
   0x4   : > { %p198_p2 = pnand %p1637_p0, %p197_p1 }
   0x5   : > { %p230_p3 = scmp.lt.s32.totalorder (!%p198_p2), %s1633_s19, 1  ;;  %s1740_s24 = smov (!%p198_p2), 127  }
   0x6   : > { %201 = sbr.rel (%p198_p2) target bundleno = 500 (0x1f4), region = 40  ;;  %s1741_s25 = smov (!%p198_p2), 126  }
   0x7   : > { %s1742_s26 = smov (!%p198_p2), 110   ;;  %s1743_s27 = smov (!%p198_p2), 109  }
   0x8   : > { %s1744_s28 = smov (!%p198_p2), 108   ;;  %s1745_s29 = smov (!%p198_p2), 92  }
   0x9   : > { %s1746_s30 = smov (!%p198_p2), 91   ;;  %s1747_s9 = smov (!%p198_p2), 90  }
   0xb   : > { %s2107_s19 = smov (!%p230_p3, %s1633_s19), 1  ;;  %vm271_vm0 = vcmask 1041408   ;;  %vm267_vm1 = vcmask 31744   ;;  %v1854_v45 = vld [vmem:[%s2102_s2] sm:$0x3]  ;;  %vm389_vm2 = vcmask 1031168  }
   0xc   : > { %s1787_s20 = smul.u32 6, %s2107_s19  ;;  %v1641_v59 = vld [vmem:[%s2102_s2 + $0x2] sm:$0x3]  ;;  %vm264_vm3 = vcmask 1039360   ;;  %vm463_vm4 = vcmask 900096   ;;  %vm537_vm5 = vcmask 891904  }
   0xd   : > { %vm611_vm6 = vcmask 883712   ;;  %vm685_vm7 = vcmask 752640   ;;  %vm759_vm8 = vcmask 744448   ;;  %vm833_vm9 = vcmask 736256  }
   0xe   : > { %s1793_s23 = scalar_lea.vmem %s2100_s0, %s1787_s20  ;;  %s1834_s8 = scalar_lea.vmem %s2101_s1, %s1787_s20  ;;  %vm1561_vm10 = vcmask 1043458   ;;  %vm1563_vm12 = vcmask 259076   ;;  %vm1554_vm13 = vcmask 1045508   ;;  %vm1558_vm14 = vcmask 1043456  }
   0xf   : > { %v247_v0 = vld [vmem:[%s1793_s23] sm:$0x3f]  ;;  %vm1562_vm11 = vmor %vm1561_vm10, %vm271_vm0 }
  0x10   : > { %251 = vst [vmem:[#allocation1] ss:$4 sm:$0xff] %v247_v0  ;;  %v374_v4 = vld [vmem:[%s1793_s23] sm:$0x3f]  ;;  %vm1564_vm15 = vmor %vm1563_vm12, %vm1562_vm11 }
  0x11   : > { %v448_v8 = vld [vmem:[%s1793_s23] sm:$0x3f] }
  0x12   : > { %v522_v12 = vld [vmem:[%s1793_s23] sm:$0x3f] }
  0x13   : > { %v596_v16 = vld [vmem:[%s1793_s23] sm:$0x3f] }
  0x14   : > { %v670_v20 = vld [vmem:[%s1793_s23] sm:$0x3f] }
  0x15   : > { %v744_v24 = vld [vmem:[%s1793_s23] sm:$0x3f] }
  0x16   : > { %v818_v28 = vld [vmem:[%s1793_s23] sm:$0x3f] }
  0x17   : > { %v252_v1 = vld.sshfl [vmem:[#allocation1] sm:$0xff pattern:$0x73625140]  ;;  %v256_v2 = vld.sshfl [vmem:[#allocation1 + $0x10] sm:$0xff pattern:$0x73625140] }
  0x18   : > { %258 = vrot.lane.b32.xlu0 %v252_v1, %s1740_s24  ;;  %262 = vrot.lane.b32.xlu1 %v256_v2, %s1740_s24  ;;  %v254_v3 = vld.sshfl [vmem:[#allocation1 + $0x8] sm:$0xff pattern:$0x73625140]  ;;  %v891_v32 = vld [vmem:[%s1834_s8] sm:$0x3f] }
  0x19   : > { %320 = vst [vmem:[#allocation1] ss:$4 sm:$0xff] %v247_v0  ;;  %v950_v36 = vld [vmem:[%s1834_s8] sm:$0x3f] }
  0x1a   : > { %v1023_v41 = vld [vmem:[%s1834_s8] sm:$0x3f] }
  0x1b   : > { %v1096_v46 = vld [vmem:[%s1834_s8] sm:$0x3f] }
  0x1c   : > { %v1169_v50 = vld [vmem:[%s1834_s8] sm:$0x3f] }
  0x1d   : > { %v1242_v57 = vld [vmem:[%s1834_s8] sm:$0x3f] }
  0x1e   : > { %v1882_v2 = vld [vmem:[%s2102_s2 + $0x4] sm:$0x3] }
  0x20   : > { %260 = vrot.lane.b32.xlu0 %v254_v3, %s1740_s24  ;;  %v1800_v5 = vld.sshfl [vmem:[#allocation1] sm:$0xff pattern:$0x73625140]  ;;  %v1802_v6 = vld.sshfl [vmem:[#allocation1 + $0x8] sm:$0xff pattern:$0x73625140] }
  0x21   : > { %v1804_v7 = vld.sshfl [vmem:[#allocation1 + $0x10] sm:$0xff pattern:$0x73625140]  ;;  %v327_v40 = vsel %vm271_vm0, %v1800_v5, 0 }
  0x22   : > { %376 = vst [vmem:[#allocation1] ss:$4 sm:$0xff] %v374_v4  ;;  %340 = vmatpush.bf16.msra.mxu3 %v327_v40 }
  0x25   : > { %1645 = vmatmul.msk.bf16.vlgmr.msra.gmra.mxu3 %vm267_vm1, %v1854_v45 }
  0x29   : > { %v377_v9 = vld.sshfl [vmem:[#allocation1] sm:$0xff pattern:$0x73625140]  ;;  %v379_v10 = vld.sshfl [vmem:[#allocation1 + $0x8] sm:$0xff pattern:$0x73625140] }
  0x2a   : > { %v381_v11 = vld.sshfl [vmem:[#allocation1 + $0x10] sm:$0xff pattern:$0x73625140]  ;;  %383 = vrot.lane.b32.xlu1 %v377_v9, %s1741_s25  ;;  %385 = vrot.lane.b32.xlu2 %v379_v10, %s1741_s25  ;;  %v331_v9 = vsel %vm271_vm0, %v1804_v7, 0 }
  0x2b   : > { %450 = vst [vmem:[#allocation1] ss:$4 sm:$0xff] %v448_v8  ;;  %v329_v8 = vsel %vm271_vm0, %v1802_v6, 0 }
  0x32   : > { %v453_v13 = vld.sshfl [vmem:[#allocation1 + $0x8] sm:$0xff pattern:$0x73625140]  ;;  %v455_v14 = vld.sshfl [vmem:[#allocation1 + $0x10] sm:$0xff pattern:$0x73625140]  ;;  %387 = vrot.lane.b32.xlu2 %v381_v11, %s1741_s25 }
  0x33   : > { %459 = vrot.lane.b32.xlu1 %v453_v13, %s1742_s26  ;;  %v451_v15 = vld.sshfl [vmem:[#allocation1] sm:$0xff pattern:$0x73625140] }
  0x34   : > { %457 = vrot.lane.b32.xlu0 %v451_v15, %s1742_s26  ;;  %524 = vst [vmem:[#allocation1] ss:$4 sm:$0xff] %v522_v12 }
  0x3a   : > { %461 = vrot.lane.b32.xlu2 %v455_v14, %s1742_s26  ;;  %v1315_v14 = vld [vmem:[%s1834_s8] sm:$0x3f] }
  0x3b   : > { %v527_v17 = vld.sshfl [vmem:[#allocation1 + $0x8] sm:$0xff pattern:$0x73625140]  ;;  %v529_v18 = vld.sshfl [vmem:[#allocation1 + $0x10] sm:$0xff pattern:$0x73625140] }
  0x3c   : > { %533 = vrot.lane.b32.xlu1 %v527_v17, %s1743_s27  ;;  %v525_v19 = vld.sshfl [vmem:[#allocation1] sm:$0xff pattern:$0x73625140] }
  0x3d   : > { %531 = vrot.lane.b32.xlu0 %v525_v19, %s1743_s27  ;;  %598 = vst [vmem:[#allocation1] ss:$4 sm:$0xff] %v596_v16 }
  0x42   : > { %535 = vrot.lane.b32.xlu2 %v529_v18, %s1743_s27 }
  0x44   : > { %v601_v21 = vld.sshfl [vmem:[#allocation1 + $0x8] sm:$0xff pattern:$0x73625140]  ;;  %v603_v22 = vld.sshfl [vmem:[#allocation1 + $0x10] sm:$0xff pattern:$0x73625140] }
  0x45   : > { %607 = vrot.lane.b32.xlu1 %v601_v21, %s1744_s28  ;;  %v599_v23 = vld.sshfl [vmem:[#allocation1] sm:$0xff pattern:$0x73625140] }
  0x46   : > { %605 = vrot.lane.b32.xlu0 %v599_v23, %s1744_s28  ;;  %672 = vst [vmem:[#allocation1] ss:$4 sm:$0xff] %v670_v20  ;;  %v1388_v20 = vld [vmem:[%s1834_s8] sm:$0x3f] }
  0x4a   : > { %609 = vrot.lane.b32.xlu2 %v603_v22, %s1744_s28  ;;  %v1652_v22 = vld [vmem:[%s2102_s2 + $0x6] sm:$0x3] }
  0x4d   : > { %v675_v25 = vld.sshfl [vmem:[#allocation1 + $0x8] sm:$0xff pattern:$0x73625140]  ;;  %v677_v26 = vld.sshfl [vmem:[#allocation1 + $0x10] sm:$0xff pattern:$0x73625140] }
  0x4e   : > { %681 = vrot.lane.b32.xlu1 %v675_v25, %s1745_s29  ;;  %v673_v27 = vld.sshfl [vmem:[#allocation1] sm:$0xff pattern:$0x73625140] }
  0x4f   : > { %679 = vrot.lane.b32.xlu0 %v673_v27, %s1745_s29  ;;  %746 = vst [vmem:[#allocation1] ss:$4 sm:$0xff] %v744_v24 }
  0x52   : > { %683 = vrot.lane.b32.xlu2 %v677_v26, %s1745_s29 }
  0x56   : > { %v749_v29 = vld.sshfl [vmem:[#allocation1 + $0x8] sm:$0xff pattern:$0x73625140]  ;;  %v751_v30 = vld.sshfl [vmem:[#allocation1 + $0x10] sm:$0xff pattern:$0x73625140] }
  0x57   : > { %755 = vrot.lane.b32.xlu1 %v749_v29, %s1746_s30  ;;  %v747_v31 = vld.sshfl [vmem:[#allocation1] sm:$0xff pattern:$0x73625140] }
  0x58   : > { %753 = vrot.lane.b32.xlu0 %v747_v31, %s1746_s30  ;;  %820 = vst [vmem:[#allocation1] ss:$4 sm:$0xff] %v818_v28 }
  0x5a   : > { %757 = vrot.lane.b32.xlu2 %v751_v30, %s1746_s30 }
  0x5f   : > { %v823_v33 = vld.sshfl [vmem:[#allocation1 + $0x8] sm:$0xff pattern:$0x73625140]  ;;  %v825_v34 = vld.sshfl [vmem:[#allocation1 + $0x10] sm:$0xff pattern:$0x73625140] }
  0x60   : > { %829 = vrot.lane.b32.xlu1 %v823_v33, %s1747_s9  ;;  %v821_v35 = vld.sshfl [vmem:[#allocation1] sm:$0xff pattern:$0x73625140] }
  0x61   : > { %827 = vrot.lane.b32.xlu0 %v821_v35, %s1747_s9  ;;  %893 = vst [vmem:[#allocation1] ss:$4 sm:$0xff] %v891_v32 }
  0x62   : > { %831 = vrot.lane.b32.xlu2 %v825_v34, %s1747_s9 }
  0x68   : > { %v1841_v37 = vld.sshfl [vmem:[#allocation1] sm:$0xff pattern:$0x73625140]  ;;  %v1843_v38 = vld.sshfl [vmem:[#allocation1 + $0x8] sm:$0xff pattern:$0x73625140] }
  0x69   : > { %v1845_v39 = vld.sshfl [vmem:[#allocation1 + $0x10] sm:$0xff pattern:$0x73625140] }
  0x6a   : > { %952 = vst [vmem:[#allocation1] ss:$4 sm:$0xff] %v950_v36 }
  0x71   : > { %v955_v42 = vld.sshfl [vmem:[#allocation1 + $0x8] sm:$0xff pattern:$0x73625140]  ;;  %v957_v43 = vld.sshfl [vmem:[#allocation1 + $0x10] sm:$0xff pattern:$0x73625140] }
  0x72   : > { %961 = vrot.lane.b32.xlu1 %v955_v42, %s1740_s24  ;;  %v953_v44 = vld.sshfl [vmem:[#allocation1] sm:$0xff pattern:$0x73625140]  ;;  %963 = vrot.lane.b32.xlu2 %v957_v43, %s1740_s24 }
  0x73   : > { %959 = vrot.lane.b32.xlu0 %v953_v44, %s1740_s24  ;;  %1025 = vst [vmem:[#allocation1] ss:$4 sm:$0xff] %v1023_v41  ;;  %v1461_v41 = vld [vmem:[%s1834_s8] sm:$0x3f] }
  0x7a   : > { %v1028_v47 = vld.sshfl [vmem:[#allocation1 + $0x8] sm:$0xff pattern:$0x73625140]  ;;  %v1030_v48 = vld.sshfl [vmem:[#allocation1 + $0x10] sm:$0xff pattern:$0x73625140] }
  0x7b   : > { %1034 = vrot.lane.b32.xlu1 %v1028_v47, %s1741_s25  ;;  %v1026_v49 = vld.sshfl [vmem:[#allocation1] sm:$0xff pattern:$0x73625140]  ;;  %1036 = vrot.lane.b32.xlu2 %v1030_v48, %s1741_s25 }
  0x7c   : > { %1032 = vrot.lane.b32.xlu0 %v1026_v49, %s1741_s25  ;;  %1098 = vst [vmem:[#allocation1] ss:$4 sm:$0xff] %v1096_v46 }
  0x83   : > { %v1101_v51 = vld.sshfl [vmem:[#allocation1 + $0x8] sm:$0xff pattern:$0x73625140]  ;;  %v1103_v52 = vld.sshfl [vmem:[#allocation1 + $0x10] sm:$0xff pattern:$0x73625140] }
  0x84   : > { %v386_v53 = vpop.permute.xlu2 %385  ;;  %1107 = vrot.lane.b32.xlu1 %v1101_v51, %s1742_s26  ;;  %v1099_v54 = vld.sshfl [vmem:[#allocation1] sm:$0xff pattern:$0x73625140]  ;;  %1109 = vrot.lane.b32.xlu2 %v1103_v52, %s1742_s26 }
  0x85   : > { %1105 = vrot.lane.b32.xlu0 %v1099_v54, %s1742_s26  ;;  %1171 = vst [vmem:[#allocation1] ss:$4 sm:$0xff] %v1169_v50 }
  0x8a   : > { %v259_v55 = vpop.permute.xlu0 %258  ;;  %v263_v56 = vpop.permute.xlu1 %262 }
  0x8b   : > { %v279_v58 = vsel %vm271_vm0, %v263_v56, 0 }
  0x8c   : > { %314 = vmatpush.bf16.msra.mxu2 %v279_v58  ;;  %v388_v60 = vpop.permute.xlu2 %387  ;;  %v1176_v61 = vld.sshfl [vmem:[#allocation1 + $0x10] sm:$0xff pattern:$0x73625140]  ;;  %v1174_v62 = vld.sshfl [vmem:[#allocation1 + $0x8] sm:$0xff pattern:$0x73625140] }
  0x8d   : > { %v391_v63 = vsel %vm389_vm2, %v386_v53, %v388_v60  ;;  %1180 = vrot.lane.b32.xlu1 %v1174_v62, %s1743_s27  ;;  %v1172_v0 = vld.sshfl [vmem:[#allocation1] sm:$0xff pattern:$0x73625140]  ;;  %1182 = vrot.lane.b32.xlu2 %v1176_v61, %s1743_s27  ;;  %v402_v15 = vsel %vm271_vm0, %v388_v60, 0  ;;  %v1656_v58 = vld [vmem:[%s2102_s2 + $0x8] sm:$0x3] }
  0x8e   : > { %v399_v1 = vsel %vm271_vm0, %v391_v63, 0  ;;  %1178 = vrot.lane.b32.xlu0 %v1172_v0, %s1743_s27  ;;  %1244 = vst [vmem:[#allocation1] ss:$4 sm:$0xff] %v1242_v57 }
  0x8f   : > { %1644 = vmatmul.msk.bf16.vlgmr.msra.gmra.mxu2 %vm267_vm1, %v1641_v59  ;;  %424 = vmatpush.bf16.msrb.mxu3 %v399_v1 }
  0x92   : > { %v261_v3 = vpop.permute.xlu0 %260  ;;  %1650 = vmatmul.msk.bf16.vlgmr.msrb.gmra.mxu3 %vm267_vm1, %v1882_v2 }
  0x93   : > { %v265_v4 = vsel %vm264_vm3, %v259_v55, %v261_v3  ;;  %v266_v5 = vsel %vm264_vm3, %v261_v3, %v263_v56  ;;  %v1660_v56 = vld [vmem:[%s2102_s2 + $0xa] sm:$0x3] }
  0x94   : > { %v273_v10 = vsel %vm271_vm0, %v265_v4, 0  ;;  %v276_v11 = vsel %vm271_vm0, %v266_v5, 0  ;;  %v462_v12 = vpop.permute.xlu2 %461 }
  0x95   : > { %288 = vmatpush.bf16.msra.mxu0 %v273_v10  ;;  %301 = vmatpush.bf16.msra.mxu1 %v276_v11  ;;  %v476_v13 = vsel %vm271_vm0, %v462_v12, 0  ;;  %v1249_v16 = vld.sshfl [vmem:[#allocation1 + $0x10] sm:$0xff pattern:$0x73625140] }
  0x96   : > { %511 = vmatpush.bf16.msra.mxu3 %v476_v13  ;;  %1255 = vrot.lane.b32.xlu2 %v1249_v16, %s1744_s28  ;;  %v1247_v6 = vld.sshfl [vmem:[#allocation1 + $0x8] sm:$0xff pattern:$0x73625140]  ;;  %v1245_v7 = vld.sshfl [vmem:[#allocation1] sm:$0xff pattern:$0x73625140] }
  0x97   : > { %1253 = vrot.lane.b32.xlu1 %v1247_v6, %s1744_s28  ;;  %1317 = vst [vmem:[#allocation1] ss:$4 sm:$0xff] %v1315_v14  ;;  %1251 = vrot.lane.b32.xlu0 %v1245_v7, %s1744_s28  ;;  %v900_v16 = vsel %vm271_vm0, %v1841_v37, 0  ;;  %v1668_v37 = vld [vmem:[%s2102_s2 + $0xe] sm:$0x3] }
  0x98   : > { %1642 = vmatmul.msk.bf16.vlgmr.msra.gmra.mxu0 %vm267_vm1, %v1641_v59  ;;  %1643 = vmatmul.msk.bf16.vlgmr.msra.gmra.mxu1 %vm267_vm1, %v1641_v59 }
  0x99   : > { %353 = vmatpush.bf16.msrb.mxu0 %v329_v8  ;;  %366 = vmatpush.bf16.msrb.mxu1 %v331_v9 }
  0x9c   : > { %v384_v17 = vpop.permute.xlu1 %383  ;;  %v536_v25 = vpop.permute.xlu2 %535 }
  0x9d   : > { %437 = vmatpush.bf16.msra.mxu0 %v402_v15  ;;  %v390_v18 = vsel %vm389_vm2, %v384_v17, %v386_v53  ;;  %v550_v31 = vsel %vm271_vm0, %v536_v25, 0 }
  0x9e   : > { %v396_v19 = vsel %vm271_vm0, %v390_v18, 0  ;;  %v1322_v21 = vld.sshfl [vmem:[#allocation1 + $0x10] sm:$0xff pattern:$0x73625140] }
  0x9f   : > { %411 = vmatpush.bf16.msrb.mxu2 %v396_v19  ;;  %1328 = vrot.lane.b32.xlu2 %v1322_v21, %s1745_s29  ;;  %v1320_v23 = vld.sshfl [vmem:[#allocation1 + $0x8] sm:$0xff pattern:$0x73625140]  ;;  %v1318_v24 = vld.sshfl [vmem:[#allocation1] sm:$0xff pattern:$0x73625140] }
  0xa0   : > { %1326 = vrot.lane.b32.xlu1 %v1320_v23, %s1745_s29  ;;  %1324 = vrot.lane.b32.xlu0 %v1318_v24, %s1745_s29  ;;  %1390 = vst [vmem:[#allocation1] ss:$4 sm:$0xff] %v1388_v20  ;;  %s244_s29 = scalar_lea.vmem %s2105_s5, %s1787_s20 }
  0xa2   : > { %1649 = vmatmul.msk.bf16.vlgmr.msrb.gmra.mxu2 %vm267_vm1, %v1882_v2  ;;  %1655 = vmatmul.msk.bf16.vlgmr.msra.gmra.mxu3 %vm267_vm1, %v1652_v22 }
  0xa4   : > { %v610_v35 = vpop.permute.xlu2 %609 }
  0xa5   : > { %v460_v26 = vpop.permute.xlu1 %459  ;;  %v624_v47 = vsel %vm271_vm0, %v610_v35, 0 }
  0xa6   : > { %v465_v27 = vsel %vm463_vm4, %v460_v26, %v462_v12  ;;  %v458_v28 = vpop.permute.xlu0 %457  ;;  %v1664_v12 = vld [vmem:[%s2102_s2 + $0xc] sm:$0x3] }
  0xa7   : > { %v473_v29 = vsel %vm271_vm0, %v465_v27, 0  ;;  %v464_v30 = vsel %vm463_vm4, %v458_v28, %v460_v26  ;;  %v1395_v33 = vld.sshfl [vmem:[#allocation1 + $0x10] sm:$0xff pattern:$0x73625140]  ;;  %v904_v26 = vsel %vm271_vm0, %v1845_v39, 0 }
  0xa8   : > { %v470_v32 = vsel %vm271_vm0, %v464_v30, 0  ;;  %1646 = vmatmul.msk.bf16.vlgmr.msrb.gmra.mxu0 %vm267_vm1, %v1854_v45  ;;  %1647 = vmatmul.msk.bf16.vlgmr.msrb.gmra.mxu1 %vm267_vm1, %v1854_v45  ;;  %v1393_v45 = vld.sshfl [vmem:[#allocation1 + $0x8] sm:$0xff pattern:$0x73625140] }
  0xa9   : > { %485 = vmatpush.bf16.msra.mxu1 %v470_v32  ;;  %498 = vmatpush.bf16.msra.mxu2 %v473_v29  ;;  %v1391_v46 = vld.sshfl [vmem:[#allocation1] sm:$0xff pattern:$0x73625140] }
  0xaa   : > { %1401 = vrot.lane.b32.xlu2 %v1395_v33, %s1746_s30  ;;  %1399 = vrot.lane.b32.xlu1 %v1393_v45, %s1746_s30  ;;  %1463 = vst [vmem:[#allocation1] ss:$4 sm:$0xff] %v1461_v41 }
  0xab   : > { %1397 = vrot.lane.b32.xlu0 %v1391_v46, %s1746_s30  ;;  %v1679_v46 = vld [vmem:[%s2103_s3 + $0x2] sm:$0x3] }
  0xac   : > { %v684_v51 = vpop.permute.xlu2 %683 }
  0xad   : > { %585 = vmatpush.bf16.msrb.mxu2 %v550_v31  ;;  %v698_v3 = vsel %vm271_vm0, %v684_v51, 0 }
  0xae   : > { %v534_v34 = vpop.permute.xlu1 %533 }
  0xaf   : > { %v539_v36 = vsel %vm537_vm5, %v534_v34, %v536_v25  ;;  %v532_v40 = vpop.permute.xlu0 %531  ;;  %v902_v25 = vsel %vm271_vm0, %v1843_v38, 0  ;;  %v890_v38 = vld [vmem:[%s2103_s3] sm:$0x3] }
  0xb0   : > { %v547_v42 = vsel %vm271_vm0, %v539_v36, 0  ;;  %v538_v43 = vsel %vm537_vm5, %v532_v40, %v534_v34  ;;  %v1672_v34 = vld [vmem:[%s2102_s2 + $0x10] sm:$0x3] }
  0xb1   : > { %v544_v44 = vsel %vm271_vm0, %v538_v43, 0  ;;  %572 = vmatpush.bf16.msrb.mxu1 %v547_v42  ;;  %v1466_v55 = vld.sshfl [vmem:[#allocation1 + $0x8] sm:$0xff pattern:$0x73625140]  ;;  %v342_v43 = vpop.f32.mrf.mxu3 }
  0xb2   : > { %1654 = vmatmul.msk.bf16.vlgmr.msra.gmra.mxu2 %vm267_vm1, %v1652_v22  ;;  %559 = vmatpush.bf16.msrb.mxu0 %v544_v44  ;;  %v1464_v57 = vld.sshfl [vmem:[#allocation1] sm:$0xff pattern:$0x73625140]  ;;  %v1468_v6 = vld.sshfl [vmem:[#allocation1 + $0x10] sm:$0xff pattern:$0x73625140] }
  0xb3   : > { %1472 = vrot.lane.b32.xlu1 %v1466_v55, %s1747_s9  ;;  %1470 = vrot.lane.b32.xlu0 %v1464_v57, %s1747_s9 }
  0xb4   : > { %v758_v60 = vpop.permute.xlu2 %757  ;;  %1474 = vrot.lane.b32.xlu2 %v1468_v6, %s1747_s9 }
  0xb5   : > { %v772_v63 = vsel %vm271_vm0, %v758_v60, 0 }
  0xb7   : > { %v608_v48 = vpop.permute.xlu1 %607 }
  0xb8   : > { %1651 = vmatmul.msk.bf16.vlgmr.msra.gmra.mxu0 %vm267_vm1, %v1882_v2  ;;  %1653 = vmatmul.msk.bf16.vlgmr.msra.gmra.mxu1 %vm267_vm1, %v1652_v22  ;;  %v606_v49 = vpop.permute.xlu0 %605  ;;  %v613_v50 = vsel %vm611_vm6, %v608_v48, %v610_v35 }
  0xb9   : > { %v612_v52 = vsel %vm611_vm6, %v606_v49, %v608_v48  ;;  %v621_v53 = vsel %vm271_vm0, %v613_v50, 0  ;;  %659 = vmatpush.bf16.msra.mxu1 %v624_v47  ;;  %v344_v47 = vpop.f32.mrf.mxu3 }
  0xba   : > { %v618_v54 = vsel %vm271_vm0, %v612_v52, 0  ;;  %646 = vmatpush.bf16.msra.mxu0 %v621_v53 }
  0xbb   : > { %633 = vmatpush.bf16.msrb.mxu3 %v618_v54 }
  0xbc   : > { %v832_v13 = vpop.permute.xlu2 %831 }
  0xbd   : > { %v846_v14 = vsel %vm271_vm0, %v832_v13, 0 }
  0xbe   : > { %1661 = vmatmul.msk.bf16.vlgmr.msrb.gmra.mxu3 %vm267_vm1, %v1660_v56 }
  0xc0   : > { %v682_v59 = vpop.permute.xlu1 %681 }
  0xc1   : > { %v680_v61 = vpop.permute.xlu0 %679  ;;  %v687_v62 = vsel %vm685_vm7, %v682_v59, %v684_v51 }
  0xc2   : > { %1659 = vmatmul.msk.bf16.vlgmr.msrb.gmra.mxu2 %vm267_vm1, %v1656_v58  ;;  %v686_v0 = vsel %vm685_vm7, %v680_v61, %v682_v59  ;;  %v695_v1 = vsel %vm271_vm0, %v687_v62, 0 }
  0xc3   : > { %v692_v2 = vsel %vm271_vm0, %v686_v0, 0  ;;  %720 = vmatpush.bf16.msra.mxu3 %v695_v1 }
  0xc4   : > { %707 = vmatpush.bf16.msra.mxu2 %v692_v2 }
  0xc7   : > { %807 = vmatpush.bf16.msrb.mxu3 %v772_v63 }
  0xc8   : > { %1657 = vmatmul.msk.bf16.vlgmr.msrb.gmra.mxu0 %vm267_vm1, %v1656_v58  ;;  %1658 = vmatmul.msk.bf16.vlgmr.msrb.gmra.mxu1 %vm267_vm1, %v1656_v58 }
  0xc9   : > { %733 = vmatpush.bf16.msrb.mxu0 %v698_v3  ;;  %v756_v4 = vpop.permute.xlu1 %755 }
  0xca   : > { %v761_v5 = vsel %vm759_vm8, %v756_v4, %v758_v60  ;;  %v754_v8 = vpop.permute.xlu0 %753  ;;  %v1683_v60 = vld [vmem:[%s2103_s3 + $0x4] sm:$0x3] }
  0xcb   : > { %v769_v9 = vsel %vm271_vm0, %v761_v5, 0  ;;  %v760_v10 = vsel %vm759_vm8, %v754_v8, %v756_v4 }
  0xcc   : > { %v766_v11 = vsel %vm271_vm0, %v760_v10, 0  ;;  %794 = vmatpush.bf16.msrb.mxu2 %v769_v9  ;;  %v964_v21 = vpop.permute.xlu2 %963 }
  0xcd   : > { %781 = vmatpush.bf16.msrb.mxu1 %v766_v11  ;;  %v977_v40 = vsel %vm271_vm0, %v964_v21, 0 }
  0xce   : > { %1666 = vmatmul.msk.bf16.vlgmr.msra.gmra.mxu3 %vm267_vm1, %v1664_v12 }
  0xcf   : > { %913 = vmatpush.bf16.msra.mxu3 %v900_v16 }
  0xd2   : > { %1665 = vmatmul.msk.bf16.vlgmr.msra.gmra.mxu2 %vm267_vm1, %v1664_v12  ;;  %v830_v15 = vpop.permute.xlu1 %829 }
  0xd3   : > { %v835_v7 = vsel %vm833_vm9, %v830_v15, %v832_v13  ;;  %v828_v17 = vpop.permute.xlu0 %827  ;;  %881 = vmatpush.bf16.msra.mxu2 %v846_v14 }
  0xd4   : > { %v834_v18 = vsel %vm833_vm9, %v828_v17, %v830_v15  ;;  %v843_v19 = vsel %vm271_vm0, %v835_v7, 0  ;;  %v1691_v15 = vld [vmem:[%s2103_s3 + $0x8] sm:$0x3] }
  0xd5   : > { %v840_v20 = vsel %vm271_vm0, %v834_v18, 0  ;;  %v1037_v30 = vpop.permute.xlu2 %1036 }
  0xd6   : > { %v1050_v39 = vsel %vm271_vm0, %v1037_v30, 0 }
  0xd8   : > { %1662 = vmatmul.msk.bf16.vlgmr.msra.gmra.mxu0 %vm267_vm1, %v1660_v56  ;;  %1663 = vmatmul.msk.bf16.vlgmr.msra.gmra.mxu1 %vm267_vm1, %v1660_v56 }
  0xd9   : > { %855 = vmatpush.bf16.msra.mxu0 %v840_v20  ;;  %868 = vmatpush.bf16.msra.mxu1 %v843_v19  ;;  %v1687_v20 = vld [vmem:[%s2103_s3 + $0x6] sm:$0x3] }
  0xde   : > { %1671 = vmatmul.msk.bf16.vlgmr.msrb.gmra.mxu3 %vm267_vm1, %v1668_v37  ;;  %v1110_v45 = vpop.permute.xlu2 %1109 }
  0xdf   : > { %v1123_v49 = vsel %vm271_vm0, %v1110_v45, 0 }
  0xe2   : > { %1670 = vmatmul.msk.bf16.vlgmr.msrb.gmra.mxu2 %vm267_vm1, %v1668_v37 }
  0xe4   : > { %v962_v22 = vpop.permute.xlu1 %961 }
  0xe5   : > { %v960_v23 = vpop.permute.xlu0 %959  ;;  %v966_v24 = vsel %vm264_vm3, %v962_v22, %v964_v21 }
  0xe6   : > { %v965_v27 = vsel %vm264_vm3, %v960_v23, %v962_v22  ;;  %v974_v28 = vsel %vm271_vm0, %v966_v24, 0 }
  0xe7   : > { %v971_v29 = vsel %vm271_vm0, %v965_v27, 0  ;;  %999 = vmatpush.bf16.msrb.mxu3 %v974_v28  ;;  %v1183_v55 = vpop.permute.xlu2 %1182 }
  0xe8   : > { %1667 = vmatmul.msk.bf16.vlgmr.msrb.gmra.mxu0 %vm267_vm1, %v1664_v12  ;;  %1669 = vmatmul.msk.bf16.vlgmr.msrb.gmra.mxu1 %vm267_vm1, %v1668_v37  ;;  %v1196_v10 = vsel %vm271_vm0, %v1183_v55, 0 }
  0xe9   : > { %926 = vmatpush.bf16.msrb.mxu0 %v902_v25  ;;  %939 = vmatpush.bf16.msrb.mxu1 %v904_v26 }
  0xea   : > { %986 = vmatpush.bf16.msrb.mxu2 %v971_v29 }
  0xed   : > { %v1035_v31 = vpop.permute.xlu1 %1034 }
  0xee   : > { %1676 = vmatmul.msk.bf16.vlgmr.msra.gmra.mxu3 %vm267_vm1, %v890_v38  ;;  %v1039_v32 = vsel %vm389_vm2, %v1035_v31, %v1037_v30  ;;  %v1033_v33 = vpop.permute.xlu0 %1032 }
  0xef   : > { %1085 = vmatpush.bf16.msra.mxu3 %v1050_v39  ;;  %v1047_v35 = vsel %vm271_vm0, %v1039_v32, 0  ;;  %v1038_v36 = vsel %vm389_vm2, %v1033_v33, %v1035_v31 }
  0xf0   : > { %v1044_v41 = vsel %vm271_vm0, %v1038_v36, 0  ;;  %v1256_v62 = vpop.permute.xlu2 %1255 }
  0xf1   : > { %v1269_v27 = vsel %vm271_vm0, %v1256_v62, 0 }
  0xf2   : > { %1675 = vmatmul.msk.bf16.vlgmr.msra.gmra.mxu2 %vm267_vm1, %v1672_v34 }
  0xf3   : > { %1072 = vmatpush.bf16.msra.mxu2 %v1047_v35  ;;  %v1695_v35 = vld [vmem:[%s2103_s3 + $0xa] sm:$0x3] }
  0xf6   : > { %v1108_v42 = vpop.permute.xlu1 %1107 }
  0xf7   : > { %v1106_v44 = vpop.permute.xlu0 %1105  ;;  %v1112_v53 = vsel %vm463_vm4, %v1108_v42, %v1110_v45 }
  0xf8   : > { %1673 = vmatmul.msk.bf16.vlgmr.msra.gmra.mxu0 %vm267_vm1, %v1672_v34  ;;  %1674 = vmatmul.msk.bf16.vlgmr.msra.gmra.mxu1 %vm267_vm1, %v1672_v34  ;;  %v1111_v54 = vsel %vm463_vm4, %v1106_v44, %v1108_v42  ;;  %v1120_v56 = vsel %vm271_vm0, %v1112_v53, 0 }
  0xf9   : > { %1012 = vmatpush.bf16.msra.mxu0 %v977_v40  ;;  %1059 = vmatpush.bf16.msra.mxu1 %v1044_v41  ;;  %v1117_v57 = vsel %vm271_vm0, %v1111_v54, 0  ;;  %v1329_v12 = vpop.permute.xlu2 %1328 }
  0xfa   : > { %v1342_v16 = vsel %vm271_vm0, %v1329_v12, 0 }
  0xfe   : > { %1681 = vmatmul.msk.bf16.vlgmr.msrb.gmra.mxu3 %vm267_vm1, %v1679_v46 }
  0xff   : > { %v1181_v48 = vpop.permute.xlu1 %1180 }
 0x100   : > { %v1179_v50 = vpop.permute.xlu0 %1178  ;;  %v1185_v3 = vsel %vm537_vm5, %v1181_v48, %v1183_v55 }
 0x101   : > { %v1184_v51 = vsel %vm537_vm5, %v1179_v50, %v1181_v48  ;;  %v1193_v9 = vsel %vm271_vm0, %v1185_v3, 0 }
 0x102   : > { %1680 = vmatmul.msk.bf16.vlgmr.msrb.gmra.mxu2 %vm267_vm1, %v1679_v46  ;;  %v1190_v52 = vsel %vm271_vm0, %v1184_v51, 0 }
 0x103   : > { %1158 = vmatpush.bf16.msrb.mxu2 %v1123_v49  ;;  %1205 = vmatpush.bf16.msrb.mxu3 %v1190_v52 }
 0x104   : > { %v1402_v32 = vpop.permute.xlu2 %1401 }
 0x105   : > { %v1415_v42 = vsel %vm271_vm0, %v1402_v32, 0 }
 0x108   : > { %1677 = vmatmul.msk.bf16.vlgmr.msrb.gmra.mxu0 %vm267_vm1, %v890_v38  ;;  %1678 = vmatmul.msk.bf16.vlgmr.msrb.gmra.mxu1 %vm267_vm1, %v890_v38 }
 0x109   : > { %1132 = vmatpush.bf16.msrb.mxu0 %v1117_v57  ;;  %1145 = vmatpush.bf16.msrb.mxu1 %v1120_v56  ;;  %v1254_v58 = vpop.permute.xlu1 %1253  ;;  %v1252_v59 = vpop.permute.xlu0 %1251 }
 0x10a   : > { %v1257_v61 = vsel %vm611_vm6, %v1252_v59, %v1254_v58  ;;  %v1258_v63 = vsel %vm611_vm6, %v1254_v58, %v1256_v62  ;;  %v1699_v59 = vld [vmem:[%s2103_s3 + $0xc] sm:$0x3] }
 0x10b   : > { %v1263_v0 = vsel %vm271_vm0, %v1257_v61, 0  ;;  %v1266_v1 = vsel %vm271_vm0, %v1258_v63, 0 }
 0x10e   : > { %1686 = vmatmul.msk.bf16.vlgmr.msra.gmra.mxu3 %vm267_vm1, %v1683_v60  ;;  %v1475_v61 = vpop.permute.xlu2 %1474 }
 0x10f   : > { %1291 = vmatpush.bf16.msra.mxu3 %v1266_v1 }
 0x112   : > { %1685 = vmatmul.msk.bf16.vlgmr.msra.gmra.mxu2 %vm267_vm1, %v1683_v60  ;;  %v316_v2 = vpop.f32.mrf.mxu2  ;;  %v1327_v14 = vpop.permute.xlu1 %1326 }
 0x113   : > { %1278 = vmatpush.bf16.msra.mxu2 %v1263_v0  ;;  %v1331_v17 = vsel %vm685_vm7, %v1327_v14, %v1329_v12  ;;  %v1325_v19 = vpop.permute.xlu0 %1324 }
 0x114   : > { %v1339_v37 = vsel %vm271_vm0, %v1331_v17, 0  ;;  %v1330_v21 = vsel %vm685_vm7, %v1325_v19, %v1327_v14  ;;  %v1707_v14 = vld [vmem:[%s2103_s3 + $0x10] sm:$0x3] }
 0x115   : > { %v290_v4 = vpop.f32.mrf.mxu0  ;;  %v303_v5 = vpop.f32.mrf.mxu1  ;;  %v1336_v28 = vsel %vm271_vm0, %v1330_v21, 0 }
 0x116   : > { %v343_v8 = vadd.f32 %v342_v43, %v290_v4  ;;  %v426_v11 = vpop.f32.mrf.mxu3 }
 0x118   : > { %1682 = vmatmul.msk.bf16.vlgmr.msra.gmra.mxu0 %vm267_vm1, %v1679_v46  ;;  %1684 = vmatmul.msk.bf16.vlgmr.msra.gmra.mxu1 %vm267_vm1, %v1683_v60 }
 0x119   : > { %1218 = vmatpush.bf16.msra.mxu0 %v1193_v9  ;;  %1231 = vmatpush.bf16.msra.mxu1 %v1196_v10 }
 0x11a   : > { %v318_v13 = vpop.f32.mrf.mxu2 }
 0x11b   : > { %v1748_v13 = vmov 0  }
 0x11c   : > { %v1400_v30 = vpop.permute.xlu1 %1399  ;;  %1731 = vset.pattern.permute.xlu0 %v1748_v13 }
 0x11d   : > { %v292_v6 = vpop.f32.mrf.mxu0  ;;  %v305_v7 = vpop.f32.mrf.mxu1  ;;  %v1404_v46 = vsel %vm759_vm8, %v1400_v30, %v1402_v32 }
 0x11e   : > { %1692 = vmatmul.msk.bf16.vlgmr.msrb.gmra.mxu3 %vm267_vm1, %v1691_v15  ;;  %v428_v18 = vpop.f32.mrf.mxu3  ;;  %v1398_v31 = vpop.permute.xlu0 %1397  ;;  %v1412_v53 = vsel %vm271_vm0, %v1404_v46, 0  ;;  %v1703_v7 = vld [vmem:[%s2103_s3 + $0xe] sm:$0x3] }
 0x11f   : > { %1377 = vmatpush.bf16.msrb.mxu3 %v1342_v16  ;;  %v1403_v47 = vsel %vm759_vm8, %v1398_v31, %v1400_v30 }
 0x120   : > { %v1409_v54 = vsel %vm271_vm0, %v1403_v47, 0 }
 0x122   : > { %1690 = vmatmul.msk.bf16.vlgmr.msrb.gmra.mxu2 %vm267_vm1, %v1687_v20 }
 0x123   : > { %1364 = vmatpush.bf16.msrb.mxu2 %v1339_v37 }
 0x125   : > { %v413_v22 = vpop.f32.mrf.mxu2  ;;  %v355_v23 = vpop.f32.mrf.mxu0 }
 0x126   : > { %v443_v24 = vadd.f32 %v413_v22, %v343_v8  ;;  %v356_v25 = vadd.f32 %v355_v23, %v303_v5  ;;  %v368_v26 = vpop.f32.mrf.mxu1  ;;  %v513_v29 = vpop.f32.mrf.mxu3  ;;  %v1488_v8 = vsel %vm271_vm0, %v1475_v61, 0 }
 0x127   : > { %v369_v38 = vadd.f32 %v368_v26, %v316_v2  ;;  %v1473_v41 = vpop.permute.xlu1 %1472  ;;  %v1471_v43 = vpop.permute.xlu0 %1470 }
 0x128   : > { %v444_v39 = vadd.f32 %v426_v11, %v356_v25  ;;  %1688 = vmatmul.msk.bf16.vlgmr.msrb.gmra.mxu0 %vm267_vm1, %v1687_v20  ;;  %1689 = vmatmul.msk.bf16.vlgmr.msrb.gmra.mxu1 %vm267_vm1, %v1687_v20  ;;  %v1476_v44 = vsel %vm833_vm9, %v1471_v43, %v1473_v41  ;;  %v1477_v63 = vsel %vm833_vm9, %v1473_v41, %v1475_v61  ;;  %v1532_v11 = vld [vmem:[%s2104_s4] sm:$0xf] }
 0x129   : > { %1304 = vmatpush.bf16.msrb.mxu0 %v1269_v27  ;;  %1351 = vmatpush.bf16.msrb.mxu1 %v1336_v28  ;;  %v1482_v45 = vsel %vm271_vm0, %v1476_v44, 0  ;;  %v1485_v5 = vsel %vm271_vm0, %v1477_v63, 0 }
 0x12a   : > { %1535 = vperm.xlu0 %1731, %v1532_v11  }
 0x12d   : > { %v415_v33 = vpop.f32.mrf.mxu2  ;;  %v357_v34 = vpop.f32.mrf.mxu0 }
 0x12e   : > { %v370_v36 = vpop.f32.mrf.mxu1  ;;  %1697 = vmatmul.msk.bf16.vlgmr.msra.gmra.mxu3 %vm267_vm1, %v1695_v35  ;;  %v515_v40 = vpop.f32.mrf.mxu3 }
 0x12f   : > { %1497 = vmatpush.bf16.msra.mxu3 %v1482_v45 }
 0x132   : > { %1696 = vmatmul.msk.bf16.vlgmr.msra.gmra.mxu2 %vm267_vm1, %v1695_v35 }
 0x133   : > { %1450 = vmatpush.bf16.msra.mxu2 %v1415_v42 }
 0x135   : > { %v500_v48 = vpop.f32.mrf.mxu2  ;;  %v439_v49 = vpop.f32.mrf.mxu0 }
 0x136   : > { %v518_v50 = vadd.f32 %v500_v48, %v444_v39  ;;  %v445_v51 = vadd.f32 %v439_v49, %v369_v38  ;;  %v487_v52 = vpop.f32.mrf.mxu1 }
 0x137   : > { %v517_v55 = vadd.f32 %v487_v52, %v443_v24 }
 0x138   : > { %v519_v56 = vadd.f32 %v513_v29, %v445_v51  ;;  %1693 = vmatmul.msk.bf16.vlgmr.msra.gmra.mxu0 %vm267_vm1, %v1691_v15  ;;  %1694 = vmatmul.msk.bf16.vlgmr.msra.gmra.mxu1 %vm267_vm1, %v1691_v15 }
 0x139   : > { %1424 = vmatpush.bf16.msra.mxu0 %v1409_v54  ;;  %1437 = vmatpush.bf16.msra.mxu1 %v1412_v53 }
 0x13d   : > { %v502_v57 = vpop.f32.mrf.mxu2  ;;  %v441_v58 = vpop.f32.mrf.mxu0 }
 0x13e   : > { %v489_v60 = vpop.f32.mrf.mxu1  ;;  %1702 = vmatmul.msk.bf16.vlgmr.msrb.gmra.mxu3 %vm267_vm1, %v1699_v59 }
 0x141   : > { %v635_v62 = vpop.f32.mrf.mxu3 }
 0x142   : > { %1701 = vmatmul.msk.bf16.vlgmr.msrb.gmra.mxu2 %vm267_vm1, %v1699_v59 }
 0x145   : > { %v587_v0 = vpop.f32.mrf.mxu2  ;;  %v561_v1 = vpop.f32.mrf.mxu0 }
 0x146   : > { %v593_v2 = vadd.f32 %v587_v0, %v519_v56  ;;  %v591_v3 = vadd.f32 %v561_v1, %v517_v55  ;;  %v574_v4 = vpop.f32.mrf.mxu1 }
 0x147   : > { %v592_v9 = vadd.f32 %v574_v4, %v518_v50 }
 0x148   : > { %v665_v10 = vadd.f32 %v635_v62, %v591_v3  ;;  %1698 = vmatmul.msk.bf16.vlgmr.msrb.gmra.mxu0 %vm267_vm1, %v1695_v35  ;;  %1700 = vmatmul.msk.bf16.vlgmr.msrb.gmra.mxu1 %vm267_vm1, %v1699_v59 }
 0x149   : > { %v637_v12 = vpop.f32.mrf.mxu3  ;;  %1510 = vmatpush.bf16.msrb.mxu0 %v1485_v5  ;;  %1523 = vmatpush.bf16.msrb.mxu1 %v1488_v8 }
 0x14d   : > { %v589_v15 = vpop.f32.mrf.mxu2  ;;  %v563_v16 = vpop.f32.mrf.mxu0 }
 0x14e   : > { %v576_v6 = vpop.f32.mrf.mxu1  ;;  %1708 = vmatmul.msk.bf16.vlgmr.msra.gmra.mxu3 %vm267_vm1, %v1707_v14 }
 0x151   : > { %v722_v17 = vpop.f32.mrf.mxu3 }
 0x152   : > { %1706 = vmatmul.msk.bf16.vlgmr.msra.gmra.mxu2 %vm267_vm1, %v1703_v7 }
 0x155   : > { %v709_v18 = vpop.f32.mrf.mxu2  ;;  %v648_v19 = vpop.f32.mrf.mxu0 }
 0x156   : > { %v739_v20 = vadd.f32 %v709_v18, %v665_v10  ;;  %v666_v37 = vadd.f32 %v648_v19, %v592_v9  ;;  %v661_v21 = vpop.f32.mrf.mxu1 }
 0x157   : > { %v667_v22 = vadd.f32 %v661_v21, %v593_v2 }
 0x158   : > { %v740_v23 = vadd.f32 %v722_v17, %v666_v37  ;;  %1704 = vmatmul.msk.bf16.vlgmr.msra.gmra.mxu0 %vm267_vm1, %v1703_v7  ;;  %1705 = vmatmul.msk.bf16.vlgmr.msra.gmra.mxu1 %vm267_vm1, %v1703_v7 }
 0x159   : > { %v724_v24 = vpop.f32.mrf.mxu3 }
 0x15d   : > { %v711_v25 = vpop.f32.mrf.mxu2  ;;  %v650_v26 = vpop.f32.mrf.mxu0 }
 0x15e   : > { %v663_v27 = vpop.f32.mrf.mxu1 }
 0x161   : > { %v809_v28 = vpop.f32.mrf.mxu3 }
 0x165   : > { %v796_v29 = vpop.f32.mrf.mxu2  ;;  %v735_v38 = vpop.f32.mrf.mxu0 }
 0x166   : > { %v814_v30 = vadd.f32 %v796_v29, %v740_v23  ;;  %v741_v39 = vadd.f32 %v735_v38, %v667_v22  ;;  %v783_v31 = vpop.f32.mrf.mxu1 }
 0x167   : > { %v813_v32 = vadd.f32 %v783_v31, %v739_v20 }
 0x168   : > { %v815_v33 = vadd.f32 %v809_v28, %v741_v39  ;;  %1709 = vmatmul.msk.bf16.vlgmr.msrb.gmra.mxu0 %vm267_vm1, %v1707_v14  ;;  %1710 = vmatmul.msk.bf16.vlgmr.msrb.gmra.mxu1 %vm267_vm1, %v1707_v14 }
 0x169   : > { %v811_v34 = vpop.f32.mrf.mxu3 }
 0x16d   : > { %v798_v35 = vpop.f32.mrf.mxu2  ;;  %v737_v36 = vpop.f32.mrf.mxu0 }
 0x16e   : > { %v785_v40 = vpop.f32.mrf.mxu1 }
 0x171   : > { %v915_v41 = vpop.f32.mrf.mxu3 }
 0x175   : > { %v883_v42 = vpop.f32.mrf.mxu2  ;;  %v857_v43 = vpop.f32.mrf.mxu0 }
 0x176   : > { %v889_v44 = vadd.f32 %v883_v42, %v815_v33  ;;  %v887_v45 = vadd.f32 %v857_v43, %v813_v32  ;;  %v870_v46 = vpop.f32.mrf.mxu1 }
 0x177   : > { %v888_v47 = vadd.f32 %v870_v46, %v814_v30 }
 0x178   : > { %v945_v48 = vadd.f32 %v915_v41, %v887_v45 }
 0x179   : > { %v917_v49 = vpop.f32.mrf.mxu3 }
 0x17d   : > { %v885_v50 = vpop.f32.mrf.mxu2  ;;  %v859_v51 = vpop.f32.mrf.mxu0 }
 0x17e   : > { %v872_v52 = vpop.f32.mrf.mxu1 }
 0x181   : > { %v1001_v53 = vpop.f32.mrf.mxu3 }
 0x185   : > { %v988_v54 = vpop.f32.mrf.mxu2  ;;  %v928_v55 = vpop.f32.mrf.mxu0 }
 0x186   : > { %v1018_v56 = vadd.f32 %v988_v54, %v945_v48  ;;  %v946_v57 = vadd.f32 %v928_v55, %v888_v47  ;;  %v941_v58 = vpop.f32.mrf.mxu1 }
 0x187   : > { %v947_v59 = vadd.f32 %v941_v58, %v889_v44 }
 0x188   : > { %v1019_v60 = vadd.f32 %v1001_v53, %v946_v57 }
 0x189   : > { %v1003_v61 = vpop.f32.mrf.mxu3 }
 0x18d   : > { %v990_v62 = vpop.f32.mrf.mxu2  ;;  %v930_v63 = vpop.f32.mrf.mxu0 }
 0x18e   : > { %v943_v0 = vpop.f32.mrf.mxu1 }
 0x191   : > { %v1087_v1 = vpop.f32.mrf.mxu3 }
 0x195   : > { %v1074_v2 = vpop.f32.mrf.mxu2  ;;  %v1014_v3 = vpop.f32.mrf.mxu0 }
 0x196   : > { %v1092_v4 = vadd.f32 %v1074_v2, %v1019_v60  ;;  %v1020_v5 = vadd.f32 %v1014_v3, %v947_v59  ;;  %v1061_v8 = vpop.f32.mrf.mxu1 }
 0x197   : > { %v1091_v9 = vadd.f32 %v1061_v8, %v1018_v56 }
 0x198   : > { %v1093_v10 = vadd.f32 %v1087_v1, %v1020_v5 }
 0x199   : > { %v1089_v11 = vpop.f32.mrf.mxu3 }
 0x19c   : > { %v1536_v59 = vpop.permute.xlu0 %1535 }
 0x19d   : > { %v1076_v12 = vpop.f32.mrf.mxu2  ;;  %v1016_v13 = vpop.f32.mrf.mxu0 }
 0x19e   : > { %v1063_v14 = vpop.f32.mrf.mxu1 }
 0x1a1   : > { %v1207_v15 = vpop.f32.mrf.mxu3 }
 0x1a5   : > { %v1160_v16 = vpop.f32.mrf.mxu2  ;;  %v1134_v6 = vpop.f32.mrf.mxu0 }
 0x1a6   : > { %v1147_v7 = vpop.f32.mrf.mxu1  ;;  %v1164_v35 = vadd.f32 %v1134_v6, %v1091_v9  ;;  %v1166_v46 = vadd.f32 %v1160_v16, %v1093_v10 }
 0x1a7   : > { %v1165_v44 = vadd.f32 %v1147_v7, %v1092_v4 }
 0x1a8   : > { %v1237_v42 = vadd.f32 %v1207_v15, %v1164_v35 }
 0x1a9   : > { %v1209_v17 = vpop.f32.mrf.mxu3 }
 0x1ad   : > { %v1162_v18 = vpop.f32.mrf.mxu2  ;;  %v1136_v19 = vpop.f32.mrf.mxu0 }
 0x1ae   : > { %v1149_v20 = vpop.f32.mrf.mxu1 }
 0x1b1   : > { %v1293_v37 = vpop.f32.mrf.mxu3 }
 0x1b5   : > { %v1280_v21 = vpop.f32.mrf.mxu2  ;;  %v1220_v22 = vpop.f32.mrf.mxu0 }
 0x1b6   : > { %v1233_v23 = vpop.f32.mrf.mxu1  ;;  %v1310_v45 = vadd.f32 %v1280_v21, %v1237_v42  ;;  %v1238_v47 = vadd.f32 %v1220_v22, %v1165_v44 }
 0x1b7   : > { %v1239_v49 = vadd.f32 %v1233_v23, %v1166_v46 }
 0x1b8   : > { %v1311_v55 = vadd.f32 %v1293_v37, %v1238_v47 }
 0x1b9   : > { %v1295_v24 = vpop.f32.mrf.mxu3 }
 0x1bd   : > { %v1282_v25 = vpop.f32.mrf.mxu2  ;;  %v1222_v26 = vpop.f32.mrf.mxu0 }
 0x1be   : > { %v1235_v27 = vpop.f32.mrf.mxu1 }
 0x1c1   : > { %v1379_v28 = vpop.f32.mrf.mxu3 }
 0x1c5   : > { %v1366_v29 = vpop.f32.mrf.mxu2  ;;  %v1306_v38 = vpop.f32.mrf.mxu0 }
 0x1c6   : > { %v1353_v30 = vpop.f32.mrf.mxu1  ;;  %v1312_v54 = vadd.f32 %v1306_v38, %v1239_v49  ;;  %v1384_v56 = vadd.f32 %v1366_v29, %v1311_v55 }
 0x1c7   : > { %v1383_v48 = vadd.f32 %v1353_v30, %v1310_v45 }
 0x1c8   : > { %v1385_v58 = vadd.f32 %v1379_v28, %v1312_v54 }
 0x1c9   : > { %v1381_v39 = vpop.f32.mrf.mxu3 }
 0x1cd   : > { %v1368_v31 = vpop.f32.mrf.mxu2  ;;  %v1308_v32 = vpop.f32.mrf.mxu0 }
 0x1ce   : > { %v1355_v33 = vpop.f32.mrf.mxu1 }
 0x1d1   : > { %v1499_v34 = vpop.f32.mrf.mxu3 }
 0x1d5   : > { %v1452_v36 = vpop.f32.mrf.mxu2  ;;  %v1426_v40 = vpop.f32.mrf.mxu0 }
 0x1d6   : > { %v1439_v41 = vpop.f32.mrf.mxu1  ;;  %v1456_v52 = vadd.f32 %v1426_v40, %v1383_v48  ;;  %v1458_v61 = vadd.f32 %v1452_v36, %v1385_v58 }
 0x1d7   : > { %v1457_v60 = vadd.f32 %v1439_v41, %v1384_v56 }
 0x1d8   : > { %v1529_v57 = vadd.f32 %v1499_v34, %v1456_v52 }
 0x1d9   : > { %v1501_v43 = vpop.f32.mrf.mxu3 }
 0x1da   : > { %v1538_v63 = vadd.f32 %v1536_v59, %v1529_v57 }
 0x1dc   : > { %v1541_v5 = vmax.f32 %v1538_v63, 0.0 }
 0x1dd   : > { %v1428_v50 = vpop.f32.mrf.mxu0  ;;  %v1454_v51 = vpop.f32.mrf.mxu2 }
 0x1de   : > { %v1441_v53 = vpop.f32.mrf.mxu1 }
 0x1e5   : > { %v1512_v62 = vpop.f32.mrf.mxu0 }
 0x1e6   : > { %v1530_v0 = vadd.f32 %v1512_v62, %v1457_v60  ;;  %v1525_v1 = vpop.f32.mrf.mxu1 }
 0x1e7   : > { %v1531_v2 = vadd.f32 %v1525_v1, %v1458_v61 }
 0x1e8   : > { %v1539_v3 = vadd.f32 %v1536_v59, %v1530_v0 }
 0x1e9   : > { %v1540_v4 = vadd.f32 %v1536_v59, %v1531_v2 }
 0x1ea   : > { %v1542_v8 = vmax.f32 %v1539_v3, 0.0 }
 0x1eb   : > { %v1543_v9 = vmax.f32 %v1540_v4, 0.0 }
 0x1ec   : > { %v1544_v10 = vpack.c.bf16 %v1542_v8, %v1541_v5 }
 0x1ed   : > { %v1545_v11 = vpack.c.bf16 %v1543_v9, %v1543_v9  ;;  %v1514_v12 = vpop.f32.mrf.mxu0 }
 0x1ee   : > { %v1548_v13 = vrot.slane %v1544_v10, 2  ;;  %v1527_v14 = vpop.f32.mrf.mxu1 }
 0x1ef   : > { %v1549_v15 = vrot.slane %v1545_v11, 4  ;;  %v1550_v16 = vrot.slane %v1545_v11, 6 }
 0x1f0   : > { %v1553_v6 = vsel %vm271_vm0, %v1544_v10, %v1548_v13 }
 0x1f1   : > { %v1557_v7 = vsel %vm1554_vm13, %v1549_v15, %v1550_v16 }
 0x1f2   : > { %v1559_v17 = vsel %vm1558_vm14, %v1553_v6, %v1557_v7 }
 0x1f3   : > { %1565 = vst.msk [vmem:[%s244_s29] sm:$0x3f] %vm1564_vm15, %v1559_v17 }
 0x1f4 PF: > { %s15_s18 = sadd.s32 1, %s1738_s18  }
 0x1f5   : > { %p12_p4 = scmp.ge.s32.totalorder %s15_s18, 4  }
 0x1f7   :  { %14 = sbr.rel (!%p12_p4) target bundleno = 1 (0x1), region = 89 }

</bundles_post_ra>
